<compile_context>
chip_gen: v5e
topology: v5e:2x2
jax: 0.10.0
libtpu: 0.0.40
codegen_flags: <defaults>
</compile_context>

<pallas_src>
import jax
import jax.numpy as jnp
from jax.experimental import pallas as pl
from jax.experimental.pallas import tpu as pltpu

EPS = 1e-5


def _stage(act, wkt, sel, gamma, beta):
    """One Conv1d(k=4,s=2,p=1) + BatchNorm1d(train) + ReLU stage, fully in VMEM.

    act:   (N*L_in, C_in)  channels-last activation (f32 value)
    wkt:   (4*C_in, C_out) weight, rows ordered (tap k major, input channel minor)
    sel:   (L_out, L_in-1) one-hot rows selecting every second stride-1 position
    gamma/beta: (1, C_out)
    returns (N*L_out, C_out)
    """
    l_out = sel.shape[0]
    ls = sel.shape[1]              # number of stride-1 positions = L_in - 1
    l_in = 2 * l_out               # stride 2, pad 1, k 4  ->  L_out = L_in // 2
    c_in = act.shape[1]
    k_taps = wkt.shape[0] // c_in  # = 4
    n_batch = act.shape[0] // l_in
    assert act.shape[0] == n_batch * l_in and ls == l_in - 1

    zero_row = jnp.zeros((1, c_in), jnp.float32)
    z_rows = []
    for n in range(n_batch):                       # static unroll over batch
        a_n = act[n * l_in:(n + 1) * l_in, :]      # (L_in, C_in)
        ap = jnp.concatenate([zero_row, a_n, zero_row], axis=0)   # padded (L_in+2, C_in)
        # stride-1 im2col via unit-stride shifted slices; column order = (k, c_in)
        p1 = jnp.concatenate([ap[k:k + ls, :] for k in range(k_taps)], axis=1)  # (ls, 4*C_in)
        z_full = jnp.dot(p1, wkt, preferred_element_type=jnp.float32)           # (ls, C_out)
        # stride-2 downsample of the output rows as a one-hot matmul (MXU is idle anyway)
        z_rows.append(jnp.dot(sel, z_full, preferred_element_type=jnp.float32)) # (L_out, C_out)
    z = jnp.concatenate(z_rows, axis=0) if n_batch > 1 else z_rows[0]            # (N*L_out, C_out)

    # BatchNorm1d, training mode: biased batch statistics over all (N, L_out) rows.
    mean = jnp.mean(z, axis=0, keepdims=True)
    var = jnp.mean(jnp.square(z - mean), axis=0, keepdims=True)
    y = gamma * ((z - mean) * jax.lax.rsqrt(var + EPS)) + beta
    return jnp.maximum(y, 0.0)                     # ReLU


def fused_encoder_kernel(*refs):
    # refs = [x_ref, (wkt, sel, gamma, beta) * n_layers, o_ref]
    x_ref, o_ref = refs[0], refs[-1]
    layer_refs = refs[1:-1]
    act = x_ref[...]
    for li in range(len(layer_refs) // 4):
        wkt_ref, sel_ref, g_ref, b_ref = layer_refs[4 * li:4 * li + 4]
        act = _stage(act, wkt_ref[...], sel_ref[...], g_ref[...], b_ref[...])
    o_ref[...] = act                               # only the final, 128-lane activation hits HBM


def encoder_forward(x, params):
    """x: (N, C_in, L) NCL (PyTorch layout) -> (N, latent_dim, L // 16) NCL."""
    N, C_in, L = x.shape
    # one boundary layout change: NCL -> (N*L, C) channels-last
    x2d = jnp.transpose(x, (0, 2, 1)).reshape(N * L, C_in).astype(jnp.float32)

    kernel_args = [x2d]
    l_cur, c_last = L, C_in
    for (w, gamma, beta) in params:
        c_out, c_in_l, k = w.shape
        assert l_cur % 2 == 0
        l_out = l_cur // 2
        ls = l_cur - 1  # stride-1 positions of a pad=1, k=4 window
        # weight rows ordered (tap k major, input channel minor) to match in-kernel patches
        wkt = jnp.transpose(w, (0, 2, 1)).reshape(c_out, k * c_in_l).T.astype(jnp.float32)
        # one-hot "take rows 0, 2, 4, ..." selection matrix (tiny, host-built constant)
        sel = (jnp.arange(ls)[None, :] == 2 * jnp.arange(l_out)[:, None]).astype(jnp.float32)
        kernel_args += [wkt, sel,
                        gamma.reshape(1, c_out).astype(jnp.float32),
                        beta.reshape(1, c_out).astype(jnp.float32)]
        l_cur, c_last = l_out, c_out

    vmem_spec = pl.BlockSpec(memory_space=pltpu.MemorySpace.VMEM)
    out2d = pl.pallas_call(
        fused_encoder_kernel,
        out_shape=jax.ShapeDtypeStruct((N * l_cur, c_last), jnp.float32),
        in_specs=[vmem_spec] * len(kernel_args),
        out_specs=vmem_spec,
    )(*kernel_args)

    # boundary layout change back to PyTorch NCL
    return out2d.reshape(N, l_cur, c_last).transpose(0, 2, 1)


def init_params(key, input_channels=1, latent_dim=128):
    # Conv bias is intentionally omitted: training-mode BatchNorm cancels it exactly.
    channels = [input_channels, 32, 64, 128, latent_dim]
    K = 4
    params = []
    for li in range(4):
        c_in, c_out = channels[li], channels[li + 1]
        key, kw, kg, kb = jax.random.split(key, 4)
        bound = 1.0 / jnp.sqrt(c_in * K)
        w = jax.random.uniform(kw, (c_out, c_in, K), jnp.float32, -bound, bound)
        gamma = 1.0 + 0.1 * jax.random.normal(kg, (c_out,), jnp.float32)
        beta = 0.1 * jax.random.normal(kb, (c_out,), jnp.float32)
        params.append((w, gamma, beta))
    return params


def _reference_forward(x, params):
    """Pure-JAX/XLA reference (Conv1d + training-mode BN + ReLU), for validation."""
    for (w, gamma, beta) in params:
        z = jax.lax.conv_general_dilated(
            x, w, window_strides=(2,), padding=[(1, 1)],
            dimension_numbers=("NCH", "OIH", "NCH"))
        mean = jnp.mean(z, axis=(0, 2), keepdims=True)
        var = jnp.mean((z - mean) ** 2, axis=(0, 2), keepdims=True)
        zn = (z - mean) * jax.lax.rsqrt(var + EPS)
        x = jnp.maximum(gamma[None, :, None] * zn + beta[None, :, None], 0.0)
    return x


if __name__ == "__main__":
    key = jax.random.PRNGKey(0)
    kx, kp = jax.random.split(key)
    # Input (N, C_in, L) -- PyTorch Conv1d layout
    x = jax.random.normal(kx, (2, 1, 128), jnp.float32)
    params = init_params(kp, input_channels=1, latent_dim=128)

    y = jax.jit(encoder_forward)(x, params)
    y = jax.block_until_ready(y)

    assert y.shape == (2, 128, 8), y.shape           # L: 128 -> 64 -> 32 -> 16 -> 8
    assert bool(jnp.all(jnp.isfinite(y)))
    assert bool(jnp.all(y >= 0.0))                   # ReLU output

    y_ref = jax.block_until_ready(jax.jit(_reference_forward)(x, params))
    max_err = float(jnp.max(jnp.abs(y - y_ref)))
    assert max_err < 5e-2, f"mismatch vs reference: {max_err}"

    print("KERNEL_OK")
</pallas_src>

<mosaic_0001>
module attributes {stable_mosaic.version = 11 : i64} {
  func.func @fused_encoder_kernel(%arg0: memref<256x1xf32, #tpu.memory_space<vmem>>, %arg1: memref<4x32xf32, #tpu.memory_space<vmem>>, %arg2: memref<64x127xf32, #tpu.memory_space<vmem>>, %arg3: memref<1x32xf32, #tpu.memory_space<vmem>>, %arg4: memref<1x32xf32, #tpu.memory_space<vmem>>, %arg5: memref<128x64xf32, #tpu.memory_space<vmem>>, %arg6: memref<32x63xf32, #tpu.memory_space<vmem>>, %arg7: memref<1x64xf32, #tpu.memory_space<vmem>>, %arg8: memref<1x64xf32, #tpu.memory_space<vmem>>, %arg9: memref<256x128xf32, #tpu.memory_space<vmem>>, %arg10: memref<16x31xf32, #tpu.memory_space<vmem>>, %arg11: memref<1x128xf32, #tpu.memory_space<vmem>>, %arg12: memref<1x128xf32, #tpu.memory_space<vmem>>, %arg13: memref<512x128xf32, #tpu.memory_space<vmem>>, %arg14: memref<8x15xf32, #tpu.memory_space<vmem>>, %arg15: memref<1x128xf32, #tpu.memory_space<vmem>>, %arg16: memref<1x128xf32, #tpu.memory_space<vmem>>, %arg17: memref<16x128xf32, #tpu.memory_space<vmem>>) attributes {dimension_semantics = [], scalar_prefetch = 0 : i64, scratch_operands = 0 : i64, tpu.core_type = #tpu.core_type<tc>} {
    %c0 = arith.constant 0 : index
    %c0_0 = arith.constant 0 : index
    %0 = vector.load %arg0[%c0, %c0_0] : memref<256x1xf32, #tpu.memory_space<vmem>>, vector<256x1xf32>
    %c0_1 = arith.constant 0 : index
    %c0_2 = arith.constant 0 : index
    %1 = vector.load %arg1[%c0_1, %c0_2] : memref<4x32xf32, #tpu.memory_space<vmem>>, vector<4x32xf32>
    %c0_3 = arith.constant 0 : index
    %c0_4 = arith.constant 0 : index
    %2 = vector.load %arg2[%c0_3, %c0_4] : memref<64x127xf32, #tpu.memory_space<vmem>>, vector<64x127xf32>
    %c0_5 = arith.constant 0 : index
    %c0_6 = arith.constant 0 : index
    %3 = vector.load %arg3[%c0_5, %c0_6] : memref<1x32xf32, #tpu.memory_space<vmem>>, vector<1x32xf32>
    %c0_7 = arith.constant 0 : index
    %c0_8 = arith.constant 0 : index
    %4 = vector.load %arg4[%c0_7, %c0_8] : memref<1x32xf32, #tpu.memory_space<vmem>>, vector<1x32xf32>
    %cst = arith.constant 0.000000e+00 : f32
    %5 = vector.broadcast %cst : f32 to vector<1x1xf32>
    %6 = vector.extract_strided_slice %0 {offsets = [0, 0], sizes = [128, 1], strides = [1, 1]} : vector<256x1xf32> to vector<128x1xf32>
    %7 = tpu.concatenate %5, %6, %5 in 0 : vector<1x1xf32>, vector<128x1xf32>, vector<1x1xf32> -> vector<130x1xf32>
    %8 = vector.extract_strided_slice %7 {offsets = [0, 0], sizes = [127, 1], strides = [1, 1]} : vector<130x1xf32> to vector<127x1xf32>
    %9 = vector.extract_strided_slice %7 {offsets = [1, 0], sizes = [127, 1], strides = [1, 1]} : vector<130x1xf32> to vector<127x1xf32>
    %10 = vector.extract_strided_slice %7 {offsets = [2, 0], sizes = [127, 1], strides = [1, 1]} : vector<130x1xf32> to vector<127x1xf32>
    %11 = vector.extract_strided_slice %7 {offsets = [3, 0], sizes = [127, 1], strides = [1, 1]} : vector<130x1xf32> to vector<127x1xf32>
    %12 = tpu.concatenate %8, %9, %10, %11 in 1 : vector<127x1xf32>, vector<127x1xf32>, vector<127x1xf32>, vector<127x1xf32> -> vector<127x4xf32>
    %cst_9 = arith.constant dense<0.000000e+00> : vector<127x32xf32>
    %13 = tpu.matmul %12, %1, %cst_9 {dimension_numbers = #tpu.dot_dimension_numbers<[1], [0], [0], [1], [0, 0, 1, 1], [], []>} : vector<127x4xf32>, vector<4x32xf32>, vector<127x32xf32> -> vector<127x32xf32>
    %cst_10 = arith.constant dense<0.000000e+00> : vector<64x32xf32>
    %14 = tpu.matmul %2, %13, %cst_10 {dimension_numbers = #tpu.dot_dimension_numbers<[1], [0], [0], [1], [0, 0, 1, 1], [], []>} : vector<64x127xf32>, vector<127x32xf32>, vector<64x32xf32> -> vector<64x32xf32>
    %15 = vector.extract_strided_slice %0 {offsets = [128, 0], sizes = [128, 1], strides = [1, 1]} : vector<256x1xf32> to vector<128x1xf32>
    %16 = tpu.concatenate %5, %15, %5 in 0 : vector<1x1xf32>, vector<128x1xf32>, vector<1x1xf32> -> vector<130x1xf32>
    %17 = vector.extract_strided_slice %16 {offsets = [0, 0], sizes = [127, 1], strides = [1, 1]} : vector<130x1xf32> to vector<127x1xf32>
    %18 = vector.extract_strided_slice %16 {offsets = [1, 0], sizes = [127, 1], strides = [1, 1]} : vector<130x1xf32> to vector<127x1xf32>
    %19 = vector.extract_strided_slice %16 {offsets = [2, 0], sizes = [127, 1], strides = [1, 1]} : vector<130x1xf32> to vector<127x1xf32>
    %20 = vector.extract_strided_slice %16 {offsets = [3, 0], sizes = [127, 1], strides = [1, 1]} : vector<130x1xf32> to vector<127x1xf32>
    %21 = tpu.concatenate %17, %18, %19, %20 in 1 : vector<127x1xf32>, vector<127x1xf32>, vector<127x1xf32>, vector<127x1xf32> -> vector<127x4xf32>
    %cst_11 = arith.constant dense<0.000000e+00> : vector<127x32xf32>
    %22 = tpu.matmul %21, %1, %cst_11 {dimension_numbers = #tpu.dot_dimension_numbers<[1], [0], [0], [1], [0, 0, 1, 1], [], []>} : vector<127x4xf32>, vector<4x32xf32>, vector<127x32xf32> -> vector<127x32xf32>
    %cst_12 = arith.constant dense<0.000000e+00> : vector<64x32xf32>
    %23 = tpu.matmul %2, %22, %cst_12 {dimension_numbers = #tpu.dot_dimension_numbers<[1], [0], [0], [1], [0, 0, 1, 1], [], []>} : vector<64x127xf32>, vector<127x32xf32>, vector<64x32xf32> -> vector<64x32xf32>
    %24 = tpu.concatenate %14, %23 in 0 : vector<64x32xf32>, vector<64x32xf32> -> vector<128x32xf32>
    %cst_13 = arith.constant dense<0.000000e+00> : vector<32xf32>
    %25 = vector.multi_reduction <add>, %24, %cst_13 [0] : vector<128x32xf32> to vector<32xf32>
    %26 = vector.shape_cast %25 : vector<32xf32> to vector<1x32xf32>
    %cst_14 = arith.constant 1.280000e+02 : f32
    %27 = vector.broadcast %cst_14 : f32 to vector<1x32xf32>
    %28 = arith.divf %26, %27 : vector<1x32xf32>
    %29 = vector.broadcast %28 : vector<1x32xf32> to vector<128x32xf32>
    %30 = arith.subf %24, %29 : vector<128x32xf32>
    %31 = arith.mulf %30, %30 : vector<128x32xf32>
    %cst_15 = arith.constant dense<0.000000e+00> : vector<32xf32>
    %32 = vector.multi_reduction <add>, %31, %cst_15 [0] : vector<128x32xf32> to vector<32xf32>
    %33 = vector.shape_cast %32 : vector<32xf32> to vector<1x32xf32>
    %cst_16 = arith.constant 1.280000e+02 : f32
    %34 = vector.broadcast %cst_16 : f32 to vector<1x32xf32>
    %35 = arith.divf %33, %34 : vector<1x32xf32>
    %36 = vector.broadcast %28 : vector<1x32xf32> to vector<128x32xf32>
    %37 = arith.subf %24, %36 : vector<128x32xf32>
    %cst_17 = arith.constant 9.99999974E-6 : f32
    %38 = vector.broadcast %cst_17 : f32 to vector<1x32xf32>
    %39 = arith.addf %35, %38 : vector<1x32xf32>
    %40 = math.rsqrt %39 : vector<1x32xf32>
    %41 = vector.broadcast %40 : vector<1x32xf32> to vector<128x32xf32>
    %42 = arith.mulf %37, %41 : vector<128x32xf32>
    %43 = vector.broadcast %3 : vector<1x32xf32> to vector<128x32xf32>
    %44 = arith.mulf %43, %42 : vector<128x32xf32>
    %45 = vector.broadcast %4 : vector<1x32xf32> to vector<128x32xf32>
    %46 = arith.addf %44, %45 : vector<128x32xf32>
    %cst_18 = arith.constant 0.000000e+00 : f32
    %47 = vector.broadcast %cst_18 : f32 to vector<128x32xf32>
    %48 = arith.maximumf %46, %47 : vector<128x32xf32>
    %c0_19 = arith.constant 0 : index
    %c0_20 = arith.constant 0 : index
    %49 = vector.load %arg5[%c0_19, %c0_20] : memref<128x64xf32, #tpu.memory_space<vmem>>, vector<128x64xf32>
    %c0_21 = arith.constant 0 : index
    %c0_22 = arith.constant 0 : index
    %50 = vector.load %arg6[%c0_21, %c0_22] : memref<32x63xf32, #tpu.memory_space<vmem>>, vector<32x63xf32>
    %c0_23 = arith.constant 0 : index
    %c0_24 = arith.constant 0 : index
    %51 = vector.load %arg7[%c0_23, %c0_24] : memref<1x64xf32, #tpu.memory_space<vmem>>, vector<1x64xf32>
    %c0_25 = arith.constant 0 : index
    %c0_26 = arith.constant 0 : index
    %52 = vector.load %arg8[%c0_25, %c0_26] : memref<1x64xf32, #tpu.memory_space<vmem>>, vector<1x64xf32>
    %cst_27 = arith.constant 0.000000e+00 : f32
    %53 = vector.broadcast %cst_27 : f32 to vector<1x32xf32>
    %54 = vector.extract_strided_slice %48 {offsets = [0, 0], sizes = [64, 32], strides = [1, 1]} : vector<128x32xf32> to vector<64x32xf32>
    %55 = tpu.concatenate %53, %54, %53 in 0 : vector<1x32xf32>, vector<64x32xf32>, vector<1x32xf32> -> vector<66x32xf32>
    %56 = vector.extract_strided_slice %55 {offsets = [0, 0], sizes = [63, 32], strides = [1, 1]} : vector<66x32xf32> to vector<63x32xf32>
    %57 = vector.extract_strided_slice %55 {offsets = [1, 0], sizes = [63, 32], strides = [1, 1]} : vector<66x32xf32> to vector<63x32xf32>
    %58 = vector.extract_strided_slice %55 {offsets = [2, 0], sizes = [63, 32], strides = [1, 1]} : vector<66x32xf32> to vector<63x32xf32>
    %59 = vector.extract_strided_slice %55 {offsets = [3, 0], sizes = [63, 32], strides = [1, 1]} : vector<66x32xf32> to vector<63x32xf32>
    %60 = tpu.concatenate %56, %57, %58, %59 in 1 : vector<63x32xf32>, vector<63x32xf32>, vector<63x32xf32>, vector<63x32xf32> -> vector<63x128xf32>
    %cst_28 = arith.constant dense<0.000000e+00> : vector<63x64xf32>
    %61 = tpu.matmul %60, %49, %cst_28 {dimension_numbers = #tpu.dot_dimension_numbers<[1], [0], [0], [1], [0, 0, 1, 1], [], []>} : vector<63x128xf32>, vector<128x64xf32>, vector<63x64xf32> -> vector<63x64xf32>
    %cst_29 = arith.constant dense<0.000000e+00> : vector<32x64xf32>
    %62 = tpu.matmul %50, %61, %cst_29 {dimension_numbers = #tpu.dot_dimension_numbers<[1], [0], [0], [1], [0, 0, 1, 1], [], []>} : vector<32x63xf32>, vector<63x64xf32>, vector<32x64xf32> -> vector<32x64xf32>
    %63 = vector.extract_strided_slice %48 {offsets = [64, 0], sizes = [64, 32], strides = [1, 1]} : vector<128x32xf32> to vector<64x32xf32>
    %64 = tpu.concatenate %53, %63, %53 in 0 : vector<1x32xf32>, vector<64x32xf32>, vector<1x32xf32> -> vector<66x32xf32>
    %65 = vector.extract_strided_slice %64 {offsets = [0, 0], sizes = [63, 32], strides = [1, 1]} : vector<66x32xf32> to vector<63x32xf32>
    %66 = vector.extract_strided_slice %64 {offsets = [1, 0], sizes = [63, 32], strides = [1, 1]} : vector<66x32xf32> to vector<63x32xf32>
    %67 = vector.extract_strided_slice %64 {offsets = [2, 0], sizes = [63, 32], strides = [1, 1]} : vector<66x32xf32> to vector<63x32xf32>
    %68 = vector.extract_strided_slice %64 {offsets = [3, 0], sizes = [63, 32], strides = [1, 1]} : vector<66x32xf32> to vector<63x32xf32>
    %69 = tpu.concatenate %65, %66, %67, %68 in 1 : vector<63x32xf32>, vector<63x32xf32>, vector<63x32xf32>, vector<63x32xf32> -> vector<63x128xf32>
    %cst_30 = arith.constant dense<0.000000e+00> : vector<63x64xf32>
    %70 = tpu.matmul %69, %49, %cst_30 {dimension_numbers = #tpu.dot_dimension_numbers<[1], [0], [0], [1], [0, 0, 1, 1], [], []>} : vector<63x128xf32>, vector<128x64xf32>, vector<63x64xf32> -> vector<63x64xf32>
    %cst_31 = arith.constant dense<0.000000e+00> : vector<32x64xf32>
    %71 = tpu.matmul %50, %70, %cst_31 {dimension_numbers = #tpu.dot_dimension_numbers<[1], [0], [0], [1], [0, 0, 1, 1], [], []>} : vector<32x63xf32>, vector<63x64xf32>, vector<32x64xf32> -> vector<32x64xf32>
    %72 = tpu.concatenate %62, %71 in 0 : vector<32x64xf32>, vector<32x64xf32> -> vector<64x64xf32>
    %cst_32 = arith.constant dense<0.000000e+00> : vector<64xf32>
    %73 = vector.multi_reduction <add>, %72, %cst_32 [0] : vector<64x64xf32> to vector<64xf32>
    %74 = vector.shape_cast %73 : vector<64xf32> to vector<1x64xf32>
    %cst_33 = arith.constant 6.400000e+01 : f32
    %75 = vector.broadcast %cst_33 : f32 to vector<1x64xf32>
    %76 = arith.divf %74, %75 : vector<1x64xf32>
    %77 = vector.broadcast %76 : vector<1x64xf32> to vector<64x64xf32>
    %78 = arith.subf %72, %77 : vector<64x64xf32>
    %79 = arith.mulf %78, %78 : vector<64x64xf32>
    %cst_34 = arith.constant dense<0.000000e+00> : vector<64xf32>
    %80 = vector.multi_reduction <add>, %79, %cst_34 [0] : vector<64x64xf32> to vector<64xf32>
    %81 = vector.shape_cast %80 : vector<64xf32> to vector<1x64xf32>
    %cst_35 = arith.constant 6.400000e+01 : f32
    %82 = vector.broadcast %cst_35 : f32 to vector<1x64xf32>
    %83 = arith.divf %81, %82 : vector<1x64xf32>
    %84 = vector.broadcast %76 : vector<1x64xf32> to vector<64x64xf32>
    %85 = arith.subf %72, %84 : vector<64x64xf32>
    %cst_36 = arith.constant 9.99999974E-6 : f32
    %86 = vector.broadcast %cst_36 : f32 to vector<1x64xf32>
    %87 = arith.addf %83, %86 : vector<1x64xf32>
    %88 = math.rsqrt %87 : vector<1x64xf32>
    %89 = vector.broadcast %88 : vector<1x64xf32> to vector<64x64xf32>
    %90 = arith.mulf %85, %89 : vector<64x64xf32>
    %91 = vector.broadcast %51 : vector<1x64xf32> to vector<64x64xf32>
    %92 = arith.mulf %91, %90 : vector<64x64xf32>
    %93 = vector.broadcast %52 : vector<1x64xf32> to vector<64x64xf32>
    %94 = arith.addf %92, %93 : vector<64x64xf32>
    %cst_37 = arith.constant 0.000000e+00 : f32
    %95 = vector.broadcast %cst_37 : f32 to vector<64x64xf32>
    %96 = arith.maximumf %94, %95 : vector<64x64xf32>
    %c0_38 = arith.constant 0 : index
    %c0_39 = arith.constant 0 : index
    %97 = vector.load %arg9[%c0_38, %c0_39] : memref<256x128xf32, #tpu.memory_space<vmem>>, vector<256x128xf32>
    %c0_40 = arith.constant 0 : index
    %c0_41 = arith.constant 0 : index
    %98 = vector.load %arg10[%c0_40, %c0_41] : memref<16x31xf32, #tpu.memory_space<vmem>>, vector<16x31xf32>
    %c0_42 = arith.constant 0 : index
    %c0_43 = arith.constant 0 : index
    %99 = vector.load %arg11[%c0_42, %c0_43] : memref<1x128xf32, #tpu.memory_space<vmem>>, vector<1x128xf32>
    %c0_44 = arith.constant 0 : index
    %c0_45 = arith.constant 0 : index
    %100 = vector.load %arg12[%c0_44, %c0_45] : memref<1x128xf32, #tpu.memory_space<vmem>>, vector<1x128xf32>
    %cst_46 = arith.constant 0.000000e+00 : f32
    %101 = vector.broadcast %cst_46 : f32 to vector<1x64xf32>
    %102 = vector.extract_strided_slice %96 {offsets = [0, 0], sizes = [32, 64], strides = [1, 1]} : vector<64x64xf32> to vector<32x64xf32>
    %103 = tpu.concatenate %101, %102, %101 in 0 : vector<1x64xf32>, vector<32x64xf32>, vector<1x64xf32> -> vector<34x64xf32>
    %104 = vector.extract_strided_slice %103 {offsets = [0, 0], sizes = [31, 64], strides = [1, 1]} : vector<34x64xf32> to vector<31x64xf32>
    %105 = vector.extract_strided_slice %103 {offsets = [1, 0], sizes = [31, 64], strides = [1, 1]} : vector<34x64xf32> to vector<31x64xf32>
    %106 = vector.extract_strided_slice %103 {offsets = [2, 0], sizes = [31, 64], strides = [1, 1]} : vector<34x64xf32> to vector<31x64xf32>
    %107 = vector.extract_strided_slice %103 {offsets = [3, 0], sizes = [31, 64], strides = [1, 1]} : vector<34x64xf32> to vector<31x64xf32>
    %108 = tpu.concatenate %104, %105, %106, %107 in 1 : vector<31x64xf32>, vector<31x64xf32>, vector<31x64xf32>, vector<31x64xf32> -> vector<31x256xf32>
    %cst_47 = arith.constant dense<0.000000e+00> : vector<31x128xf32>
    %109 = tpu.matmul %108, %97, %cst_47 {dimension_numbers = #tpu.dot_dimension_numbers<[1], [0], [0], [1], [0, 0, 1, 1], [], []>} : vector<31x256xf32>, vector<256x128xf32>, vector<31x128xf32> -> vector<31x128xf32>
    %cst_48 = arith.constant dense<0.000000e+00> : vector<16x128xf32>
    %110 = tpu.matmul %98, %109, %cst_48 {dimension_numbers = #tpu.dot_dimension_numbers<[1], [0], [0], [1], [0, 0, 1, 1], [], []>} : vector<16x31xf32>, vector<31x128xf32>, vector<16x128xf32> -> vector<16x128xf32>
    %111 = vector.extract_strided_slice %96 {offsets = [32, 0], sizes = [32, 64], strides = [1, 1]} : vector<64x64xf32> to vector<32x64xf32>
    %112 = tpu.concatenate %101, %111, %101 in 0 : vector<1x64xf32>, vector<32x64xf32>, vector<1x64xf32> -> vector<34x64xf32>
    %113 = vector.extract_strided_slice %112 {offsets = [0, 0], sizes = [31, 64], strides = [1, 1]} : vector<34x64xf32> to vector<31x64xf32>
    %114 = vector.extract_strided_slice %112 {offsets = [1, 0], sizes = [31, 64], strides = [1, 1]} : vector<34x64xf32> to vector<31x64xf32>
    %115 = vector.extract_strided_slice %112 {offsets = [2, 0], sizes = [31, 64], strides = [1, 1]} : vector<34x64xf32> to vector<31x64xf32>
    %116 = vector.extract_strided_slice %112 {offsets = [3, 0], sizes = [31, 64], strides = [1, 1]} : vector<34x64xf32> to vector<31x64xf32>
    %117 = tpu.concatenate %113, %114, %115, %116 in 1 : vector<31x64xf32>, vector<31x64xf32>, vector<31x64xf32>, vector<31x64xf32> -> vector<31x256xf32>
    %cst_49 = arith.constant dense<0.000000e+00> : vector<31x128xf32>
    %118 = tpu.matmul %117, %97, %cst_49 {dimension_numbers = #tpu.dot_dimension_numbers<[1], [0], [0], [1], [0, 0, 1, 1], [], []>} : vector<31x256xf32>, vector<256x128xf32>, vector<31x128xf32> -> vector<31x128xf32>
    %cst_50 = arith.constant dense<0.000000e+00> : vector<16x128xf32>
    %119 = tpu.matmul %98, %118, %cst_50 {dimension_numbers = #tpu.dot_dimension_numbers<[1], [0], [0], [1], [0, 0, 1, 1], [], []>} : vector<16x31xf32>, vector<31x128xf32>, vector<16x128xf32> -> vector<16x128xf32>
    %120 = tpu.concatenate %110, %119 in 0 : vector<16x128xf32>, vector<16x128xf32> -> vector<32x128xf32>
    %cst_51 = arith.constant dense<0.000000e+00> : vector<128xf32>
    %121 = vector.multi_reduction <add>, %120, %cst_51 [0] : vector<32x128xf32> to vector<128xf32>
    %122 = vector.shape_cast %121 : vector<128xf32> to vector<1x128xf32>
    %cst_52 = arith.constant 3.200000e+01 : f32
    %123 = vector.broadcast %cst_52 : f32 to vector<1x128xf32>
    %124 = arith.divf %122, %123 : vector<1x128xf32>
    %125 = vector.broadcast %124 : vector<1x128xf32> to vector<32x128xf32>
    %126 = arith.subf %120, %125 : vector<32x128xf32>
    %127 = arith.mulf %126, %126 : vector<32x128xf32>
    %cst_53 = arith.constant dense<0.000000e+00> : vector<128xf32>
    %128 = vector.multi_reduction <add>, %127, %cst_53 [0] : vector<32x128xf32> to vector<128xf32>
    %129 = vector.shape_cast %128 : vector<128xf32> to vector<1x128xf32>
    %cst_54 = arith.constant 3.200000e+01 : f32
    %130 = vector.broadcast %cst_54 : f32 to vector<1x128xf32>
    %131 = arith.divf %129, %130 : vector<1x128xf32>
    %132 = vector.broadcast %124 : vector<1x128xf32> to vector<32x128xf32>
    %133 = arith.subf %120, %132 : vector<32x128xf32>
    %cst_55 = arith.constant 9.99999974E-6 : f32
    %134 = vector.broadcast %cst_55 : f32 to vector<1x128xf32>
    %135 = arith.addf %131, %134 : vector<1x128xf32>
    %136 = math.rsqrt %135 : vector<1x128xf32>
    %137 = vector.broadcast %136 : vector<1x128xf32> to vector<32x128xf32>
    %138 = arith.mulf %133, %137 : vector<32x128xf32>
    %139 = vector.broadcast %99 : vector<1x128xf32> to vector<32x128xf32>
    %140 = arith.mulf %139, %138 : vector<32x128xf32>
    %141 = vector.broadcast %100 : vector<1x128xf32> to vector<32x128xf32>
    %142 = arith.addf %140, %141 : vector<32x128xf32>
    %cst_56 = arith.constant 0.000000e+00 : f32
    %143 = vector.broadcast %cst_56 : f32 to vector<32x128xf32>
    %144 = arith.maximumf %142, %143 : vector<32x128xf32>
    %c0_57 = arith.constant 0 : index
    %c0_58 = arith.constant 0 : index
    %145 = vector.load %arg13[%c0_57, %c0_58] : memref<512x128xf32, #tpu.memory_space<vmem>>, vector<512x128xf32>
    %c0_59 = arith.constant 0 : index
    %c0_60 = arith.constant 0 : index
    %146 = vector.load %arg14[%c0_59, %c0_60] : memref<8x15xf32, #tpu.memory_space<vmem>>, vector<8x15xf32>
    %c0_61 = arith.constant 0 : index
    %c0_62 = arith.constant 0 : index
    %147 = vector.load %arg15[%c0_61, %c0_62] : memref<1x128xf32, #tpu.memory_space<vmem>>, vector<1x128xf32>
    %c0_63 = arith.constant 0 : index
    %c0_64 = arith.constant 0 : index
    %148 = vector.load %arg16[%c0_63, %c0_64] : memref<1x128xf32, #tpu.memory_space<vmem>>, vector<1x128xf32>
    %cst_65 = arith.constant 0.000000e+00 : f32
    %149 = vector.broadcast %cst_65 : f32 to vector<1x128xf32>
    %150 = vector.extract_strided_slice %144 {offsets = [0, 0], sizes = [16, 128], strides = [1, 1]} : vector<32x128xf32> to vector<16x128xf32>
    %151 = tpu.concatenate %149, %150, %149 in 0 : vector<1x128xf32>, vector<16x128xf32>, vector<1x128xf32> -> vector<18x128xf32>
    %152 = vector.extract_strided_slice %151 {offsets = [0, 0], sizes = [15, 128], strides = [1, 1]} : vector<18x128xf32> to vector<15x128xf32>
    %153 = vector.extract_strided_slice %151 {offsets = [1, 0], sizes = [15, 128], strides = [1, 1]} : vector<18x128xf32> to vector<15x128xf32>
    %154 = vector.extract_strided_slice %151 {offsets = [2, 0], sizes = [15, 128], strides = [1, 1]} : vector<18x128xf32> to vector<15x128xf32>
    %155 = vector.extract_strided_slice %151 {offsets = [3, 0], sizes = [15, 128], strides = [1, 1]} : vector<18x128xf32> to vector<15x128xf32>
    %156 = tpu.concatenate %152, %153, %154, %155 in 1 : vector<15x128xf32>, vector<15x128xf32>, vector<15x128xf32>, vector<15x128xf32> -> vector<15x512xf32>
    %cst_66 = arith.constant dense<0.000000e+00> : vector<15x128xf32>
    %157 = tpu.matmul %156, %145, %cst_66 {dimension_numbers = #tpu.dot_dimension_numbers<[1], [0], [0], [1], [0, 0, 1, 1], [], []>} : vector<15x512xf32>, vector<512x128xf32>, vector<15x128xf32> -> vector<15x128xf32>
    %cst_67 = arith.constant dense<0.000000e+00> : vector<8x128xf32>
    %158 = tpu.matmul %146, %157, %cst_67 {dimension_numbers = #tpu.dot_dimension_numbers<[1], [0], [0], [1], [0, 0, 1, 1], [], []>} : vector<8x15xf32>, vector<15x128xf32>, vector<8x128xf32> -> vector<8x128xf32>
    %159 = vector.extract_strided_slice %144 {offsets = [16, 0], sizes = [16, 128], strides = [1, 1]} : vector<32x128xf32> to vector<16x128xf32>
    %160 = tpu.concatenate %149, %159, %149 in 0 : vector<1x128xf32>, vector<16x128xf32>, vector<1x128xf32> -> vector<18x128xf32>
    %161 = vector.extract_strided_slice %160 {offsets = [0, 0], sizes = [15, 128], strides = [1, 1]} : vector<18x128xf32> to vector<15x128xf32>
    %162 = vector.extract_strided_slice %160 {offsets = [1, 0], sizes = [15, 128], strides = [1, 1]} : vector<18x128xf32> to vector<15x128xf32>
    %163 = vector.extract_strided_slice %160 {offsets = [2, 0], sizes = [15, 128], strides = [1, 1]} : vector<18x128xf32> to vector<15x128xf32>
    %164 = vector.extract_strided_slice %160 {offsets = [3, 0], sizes = [15, 128], strides = [1, 1]} : vector<18x128xf32> to vector<15x128xf32>
    %165 = tpu.concatenate %161, %162, %163, %164 in 1 : vector<15x128xf32>, vector<15x128xf32>, vector<15x128xf32>, vector<15x128xf32> -> vector<15x512xf32>
    %cst_68 = arith.constant dense<0.000000e+00> : vector<15x128xf32>
    %166 = tpu.matmul %165, %145, %cst_68 {dimension_numbers = #tpu.dot_dimension_numbers<[1], [0], [0], [1], [0, 0, 1, 1], [], []>} : vector<15x512xf32>, vector<512x128xf32>, vector<15x128xf32> -> vector<15x128xf32>
    %cst_69 = arith.constant dense<0.000000e+00> : vector<8x128xf32>
    %167 = tpu.matmul %146, %166, %cst_69 {dimension_numbers = #tpu.dot_dimension_numbers<[1], [0], [0], [1], [0, 0, 1, 1], [], []>} : vector<8x15xf32>, vector<15x128xf32>, vector<8x128xf32> -> vector<8x128xf32>
    %168 = tpu.concatenate %158, %167 in 0 : vector<8x128xf32>, vector<8x128xf32> -> vector<16x128xf32>
    %cst_70 = arith.constant dense<0.000000e+00> : vector<128xf32>
    %169 = vector.multi_reduction <add>, %168, %cst_70 [0] : vector<16x128xf32> to vector<128xf32>
    %170 = vector.shape_cast %169 : vector<128xf32> to vector<1x128xf32>
    %cst_71 = arith.constant 1.600000e+01 : f32
    %171 = vector.broadcast %cst_71 : f32 to vector<1x128xf32>
    %172 = arith.divf %170, %171 : vector<1x128xf32>
    %173 = vector.broadcast %172 : vector<1x128xf32> to vector<16x128xf32>
    %174 = arith.subf %168, %173 : vector<16x128xf32>
    %175 = arith.mulf %174, %174 : vector<16x128xf32>
    %cst_72 = arith.constant dense<0.000000e+00> : vector<128xf32>
    %176 = vector.multi_reduction <add>, %175, %cst_72 [0] : vector<16x128xf32> to vector<128xf32>
    %177 = vector.shape_cast %176 : vector<128xf32> to vector<1x128xf32>
    %cst_73 = arith.constant 1.600000e+01 : f32
    %178 = vector.broadcast %cst_73 : f32 to vector<1x128xf32>
    %179 = arith.divf %177, %178 : vector<1x128xf32>
    %180 = vector.broadcast %172 : vector<1x128xf32> to vector<16x128xf32>
    %181 = arith.subf %168, %180 : vector<16x128xf32>
    %cst_74 = arith.constant 9.99999974E-6 : f32
    %182 = vector.broadcast %cst_74 : f32 to vector<1x128xf32>
    %183 = arith.addf %179, %182 : vector<1x128xf32>
    %184 = math.rsqrt %183 : vector<1x128xf32>
    %185 = vector.broadcast %184 : vector<1x128xf32> to vector<16x128xf32>
    %186 = arith.mulf %181, %185 : vector<16x128xf32>
    %187 = vector.broadcast %147 : vector<1x128xf32> to vector<16x128xf32>
    %188 = arith.mulf %187, %186 : vector<16x128xf32>
    %189 = vector.broadcast %148 : vector<1x128xf32> to vector<16x128xf32>
    %190 = arith.addf %188, %189 : vector<16x128xf32>
    %cst_75 = arith.constant 0.000000e+00 : f32
    %191 = vector.broadcast %cst_75 : f32 to vector<16x128xf32>
    %192 = arith.maximumf %190, %191 : vector<16x128xf32>
    %c0_76 = arith.constant 0 : index
    %c0_77 = arith.constant 0 : index
    %193 = vector.load %arg17[%c0_76, %c0_77] : memref<16x128xf32, #tpu.memory_space<vmem>>, vector<16x128xf32>
    tpu.vector_store %arg17[%c0_76, %c0_77], %192 {strides = array<i32>} : memref<16x128xf32, #tpu.memory_space<vmem>>, vector<16x128xf32>,
    return
  }
}

</mosaic_0001>

<bundles_post_ra>
// kernel: encoder_forward.1
= control target key start
LH: loop header
LB: loop body
LE: loop exit
PB: predicated region body
PF: predicated region fallthrough
CT: control target
= control target key end

     0   :  { %s5379_s0 = inlined_call_operand.vmem [shape: f32[256,1], index: 0, kind: input, shape index: {}]   ;;  %s5380_s1 = inlined_call_operand.vmem [shape: f32[4,32], index: 1, kind: input, shape index: {}]   ;;  %s5381_s2 = inlined_call_operand.vmem [shape: f32[64,127], index: 2, kind: input, shape index: {}]   ;;  %s5382_s3 = inlined_call_operand.vmem [shape: f32[1,32], index: 3, kind: input, shape index: {}]   ;;  %s5383_s4 = inlined_call_operand.vmem [shape: f32[1,32], index: 4, kind: input, shape index: {}]   ;;  %s5384_s5 = inlined_call_operand.vmem [shape: f32[128,64], index: 5, kind: input, shape index: {}]   ;;  %s5385_s6 = inlined_call_operand.vmem [shape: f32[32,63], index: 6, kind: input, shape index: {}]   ;;  %s5386_s7 = inlined_call_operand.vmem [shape: f32[1,64], index: 7, kind: input, shape index: {}]   ;;  %s5387_s8 = inlined_call_operand.vmem [shape: f32[1,64], index: 8, kind: input, shape index: {}]   ;;  %s5388_s9 = inlined_call_operand.vmem [shape: f32[256,128], index: 9, kind: input, shape index: {}]   ;;  %s5389_s10 = inlined_call_operand.vmem [shape: f32[16,31], index: 10, kind: input, shape index: {}]   ;;  %s5390_s11 = inlined_call_operand.vmem [shape: f32[1,128], index: 11, kind: input, shape index: {}]   ;;  %s5391_s12 = inlined_call_operand.vmem [shape: f32[1,128], index: 12, kind: input, shape index: {}]   ;;  %s5392_s13 = inlined_call_operand.vmem [shape: f32[512,128], index: 13, kind: input, shape index: {}]   ;;  %s5393_s14 = inlined_call_operand.vmem [shape: f32[8,15], index: 14, kind: input, shape index: {}]   ;;  %s5394_s15 = inlined_call_operand.vmem [shape: f32[1,128], index: 15, kind: input, shape index: {}]   ;;  %s5395_s16 = inlined_call_operand.vmem [shape: f32[1,128], index: 16, kind: input, shape index: {}]   ;;  %s5396_s17 = inlined_call_operand.hbm [shape: f32[16,128], index: 17, kind: output, shape index: {}]  }
   0x1   :  { %5407 = sst [smem:[#allocation14_spill]] %s5379_s0 }
   0x2   :  { %5408 = sst [smem:[#allocation15_spill]] %s5380_s1 }
   0x3   :  { %s5409_s26 = sld [smem:[#allocation14_spill]]  ;;  %vm116_vm0 = vcmask 1040384   ;;  %vm331_vm1 = vcmask 1044480   ;;  %vm168_vm2 = vcmask 1046528   ;;  %s3133_s20 = smov 3   ;;  %vm249_vm3 = vcmask 1045504  }
   0x4   :  { %s3134_s21 = smov 1  }
   0x9   :  { %v57_v0 = vld [vmem:[%s5409_s26] sm:$0xff]  ;;  %v58_v1 = vld [vmem:[%s5409_s26 + $0x8] sm:$0xff]  ;;  %v59_v18 = vld [vmem:[%s5409_s26 + $0x10] sm:$0xff] }
   0xa   :  { %v117_v2 = vrot.slane %v57_v0, 7  ;;  %v118_v3 = vrot.slane %v58_v1, 7  ;;  %v73_v4 = vld [vmem:[%s5409_s26 + $0x80] sm:$0xff]  ;;  %v74_v5 = vld [vmem:[%s5409_s26 + $0x88] sm:$0xff]  ;;  %v120_v24 = vrot.slane %v59_v18, 7 }
   0xb   :  { %v667_v6 = vrot.slane %v73_v4, 7  ;;  %v668_v7 = vrot.slane %v74_v5, 7 }
   0xc   :  { %v3249_v8 = vsel %vm116_vm0, %v117_v2, %v118_v3  ;;  %v3252_v9 = vsel %vm116_vm0, 0.0, %v117_v2 }
   0xd   :  { %v332_v10 = vrot.slane %v3252_v9, 3  ;;  %v333_v11 = vrot.slane %v3249_v8, 3  ;;  %v169_v12 = vrot.slane %v3252_v9, 1  ;;  %v170_v13 = vrot.slane %v3249_v8, 1 }
   0xe   :  { %v3259_v14 = vsel %vm116_vm0, %v667_v6, %v668_v7  ;;  %v3262_v15 = vsel %vm116_vm0, 0.0, %v667_v6  ;;  %v250_v22 = vrot.slane %v3252_v9, 2  ;;  %v251_v23 = vrot.slane %v3249_v8, 2 }
   0xf   :  { %v334_v16 = vsel %vm331_vm1, %v332_v10, %v333_v11  ;;  %v171_v17 = vsel %vm168_vm2, %v169_v12, %v170_v13  ;;  %v799_v19 = vrot.slane %v3259_v14, 2  ;;  %v718_v20 = vrot.slane %v3262_v15, 1 }
  0x10   :  { %365 = vrot.lane.b32.xlu1 %v334_v16, %s3133_s20  ;;  %200 = vrot.lane.b32.xlu0 %v171_v17, %s3134_s21  ;;  %v719_v21 = vrot.slane %v3259_v14, 1  ;;  %v798_v25 = vrot.slane %v3262_v15, 2 }
  0x11   :  { %22 = vsyncpa [#allocation3], 0  ;;  %v252_v28 = vsel %vm249_vm3, %v250_v22, %v251_v23  ;;  %s3135_s22 = smov 2   ;;  %v3282_v29 = vsel %vm116_vm0, %v118_v3, %v120_v24  ;;  %v879_v30 = vrot.slane %v3262_v15, 3  ;;  %v880_v31 = vrot.slane %v3259_v14, 3  ;;  %v75_v32 = vld [vmem:[%s5409_s26 + $0x90] sm:$0xff] }
  0x12   :  { %v800_v26 = vsel %vm249_vm3, %v798_v25, %v799_v19  ;;  %v720_v27 = vsel %vm168_vm2, %v718_v20, %v719_v21  ;;  %v172_v33 = vrot.slane %v3282_v29, 1  ;;  %v253_v34 = vrot.slane %v3282_v29, 2  ;;  %v60_v41 = vld [vmem:[%s5409_s26 + $0x18] sm:$0xff]  ;;  %v61_v59 = vld [vmem:[%s5409_s26 + $0x20] sm:$0xff]  ;;  %v62_v17 = vld [vmem:[%s5409_s26 + $0x28] sm:$0xff]  ;;  %s5410_s25 = sld [smem:[#allocation15_spill]] }
  0x13   :  { %831 = vrot.lane.b32.xlu2 %v800_v26, %s3135_s22  ;;  %v670_v35 = vrot.slane %v75_v32, 7  ;;  %v881_v36 = vsel %vm331_vm1, %v879_v30, %v880_v31  ;;  %v335_v40 = vrot.slane %v3282_v29, 3  ;;  %v122_v44 = vrot.slane %v60_v41, 7  ;;  %v76_v50 = vld [vmem:[%s5409_s26 + $0x98] sm:$0xff]  ;;  %v77_v4 = vld [vmem:[%s5409_s26 + $0xa0] sm:$0xff]  ;;  %v78_v26 = vld [vmem:[%s5409_s26 + $0xa8] sm:$0xff] }
  0x14   :  { %v173_v37 = vsel %vm168_vm2, %v170_v13, %v172_v33  ;;  %v254_v38 = vsel %vm249_vm3, %v251_v23, %v253_v34  ;;  %v672_v53 = vrot.slane %v76_v50, 7  ;;  %v124_v62 = vrot.slane %v61_v59, 7  ;;  %s3145_s1 = smov 8  }
  0x15   :  { %v3298_v39 = vsel %vm116_vm0, %v668_v7, %v670_v35  ;;  %v336_v45 = vsel %vm331_vm1, %v333_v11, %v335_v40  ;;  %v3313_v48 = vsel %vm116_vm0, %v120_v24, %v122_v44  ;;  %v674_v7 = vrot.slane %v77_v4, 7 }
  0x16   :  { %v721_v42 = vrot.slane %v3298_v39, 1  ;;  %v801_v43 = vrot.slane %v3298_v39, 2  ;;  %v882_v49 = vrot.slane %v3298_v39, 3  ;;  %v174_v51 = vrot.slane %v3313_v48, 1 }
  0x17   :  { %v255_v52 = vrot.slane %v3313_v48, 2  ;;  %v3328_v57 = vsel %vm116_vm0, %v670_v35, %v672_v53  ;;  %v337_v58 = vrot.slane %v3313_v48, 3  ;;  %v3343_v2 = vsel %vm116_vm0, %v122_v44, %v124_v62 }
  0x18   :  { %749 = vrot.lane.b32.xlu1 %v720_v27, %s3134_s21  ;;  %283 = vrot.lane.b32.xlu0 %v252_v28, %s3135_s22  ;;  %v722_v46 = vsel %vm168_vm2, %v719_v21, %v721_v42  ;;  %v802_v47 = vsel %vm249_vm3, %v799_v19, %v801_v43  ;;  %v883_v54 = vsel %vm331_vm1, %v880_v31, %v882_v49  ;;  %v723_v60 = vrot.slane %v3328_v57, 1 }
  0x19   :  { %v175_v55 = vsel %vm168_vm2, %v172_v33, %v174_v51  ;;  %v256_v56 = vsel %vm249_vm3, %v253_v34, %v255_v52  ;;  %v803_v61 = vrot.slane %v3328_v57, 2  ;;  %v338_v63 = vsel %vm331_vm1, %v335_v40, %v337_v58 }
  0x1a   :  { %v724_v0 = vsel %vm168_vm2, %v721_v42, %v723_v60  ;;  %v884_v3 = vrot.slane %v3328_v57, 3  ;;  %v176_v5 = vrot.slane %v3343_v2, 1  ;;  %v257_v6 = vrot.slane %v3343_v2, 2 }
  0x1b   :  { %912 = vrot.lane.b32.xlu2 %v881_v36, %s3133_s20  ;;  %v804_v1 = vsel %vm249_vm3, %v801_v43, %v803_v61  ;;  %v3358_v13 = vsel %vm116_vm0, %v672_v53, %v674_v7  ;;  %v339_v16 = vrot.slane %v3343_v2, 3  ;;  %v126_v20 = vrot.slane %v62_v17, 7  ;;  %v63_v36 = vld [vmem:[%s5409_s26 + $0x30] sm:$0xff] }
  0x1c   :  { %v885_v10 = vsel %vm331_vm1, %v882_v49, %v884_v3  ;;  %v177_v11 = vsel %vm168_vm2, %v174_v51, %v176_v5  ;;  %v258_v12 = vsel %vm249_vm3, %v255_v52, %v257_v6  ;;  %v725_v18 = vrot.slane %v3358_v13, 1 }
  0x1d   :  { %v805_v19 = vrot.slane %v3358_v13, 2  ;;  %v340_v21 = vsel %vm331_vm1, %v337_v58, %v339_v16  ;;  %v3373_v24 = vsel %vm116_vm0, %v124_v62, %v126_v20  ;;  %v886_v25 = vrot.slane %v3358_v13, 3 }
  0x1e   :  { %v726_v22 = vsel %vm168_vm2, %v723_v60, %v725_v18  ;;  %v178_v27 = vrot.slane %v3373_v24, 1  ;;  %v259_v28 = vrot.slane %v3373_v24, 2  ;;  %v676_v30 = vrot.slane %v78_v26, 7 }
  0x1f   :  { %v806_v23 = vsel %vm249_vm3, %v803_v61, %v805_v19  ;;  %v887_v31 = vsel %vm331_vm1, %v884_v3, %v886_v25  ;;  %v341_v35 = vrot.slane %v3373_v24, 3  ;;  %v128_v40 = vrot.slane %v63_v36, 7  ;;  %v80_v3 = vld [vmem:[%s5409_s26 + $0xb8] sm:$0xff] }
  0x20   :  { %202 = vrot.lane.b32.xlu0 %v173_v37, %s3134_s21  ;;  %285 = vrot.lane.b32.xlu1 %v254_v38, %s3135_s22  ;;  %v179_v32 = vsel %vm168_vm2, %v176_v5, %v178_v27  ;;  %v260_v33 = vsel %vm249_vm3, %v257_v6, %v259_v28  ;;  %v3388_v34 = vsel %vm116_vm0, %v674_v7, %v676_v30  ;;  %v680_v6 = vrot.slane %v80_v3, 7 }
  0x21   :  { %v727_v37 = vrot.slane %v3388_v34, 1  ;;  %v807_v38 = vrot.slane %v3388_v34, 2  ;;  %v342_v41 = vsel %vm331_vm1, %v339_v16, %v341_v35  ;;  %v3403_v44 = vsel %vm116_vm0, %v126_v20, %v128_v40 }
  0x22   :  { %v261_v49 = vrot.slane %v3403_v44, 2  ;;  %vm513_vm4 = vcmask 1043456   ;;  %vm413_vm5 = vcmask 7168   ;;  %vm430_vm6 = vcmask 15360  }
  0x23   :  { %367 = vrot.lane.b32.xlu2 %v336_v45, %s3133_s20  ;;  %v728_v42 = vsel %vm168_vm2, %v725_v18, %v727_v37  ;;  %v808_v43 = vsel %vm249_vm3, %v805_v19, %v807_v38  ;;  %v888_v45 = vrot.slane %v3388_v34, 3  ;;  %v65_v18 = vld [vmem:[%s5409_s26 + $0x40] sm:$0xff]  ;;  %vm447_vm7 = vcmask 23552  }
  0x24   :  { %v262_v53 = vsel %vm249_vm3, %v259_v28, %v261_v49  ;;  %vm464_vm8 = vcmask 31744   ;;  %vm582_vm9 = vcmask 1039360   ;;  %vm1165_vm10 = vcmask 261120  }
  0x25   :  { %v889_v51 = vsel %vm331_vm1, %v886_v25, %v888_v45  ;;  %vm1549_vm15 = vcmask 523264  }
  0x28   :  { %751 = vrot.lane.b32.xlu0 %v722_v46, %s3134_s21  ;;  %833 = vrot.lane.b32.xlu1 %v802_v47, %s3135_s22  ;;  %v79_v46 = vld [vmem:[%s5409_s26 + $0xb0] sm:$0xff]  ;;  %v180_v47 = vrot.slane %v3403_v44, 1 }
  0x29   :  { %v678_v50 = vrot.slane %v79_v46, 7 }
  0x2a   :  { %v181_v52 = vsel %vm168_vm2, %v178_v27, %v180_v47 }
  0x2b   :  { %914 = vrot.lane.b32.xlu2 %v883_v54, %s3133_s20  ;;  %v3418_v54 = vsel %vm116_vm0, %v676_v30, %v678_v50  ;;  %v3451_v16 = vsel %vm116_vm0, %v678_v50, %v680_v6  ;;  %v81_v30 = vld [vmem:[%s5409_s26 + $0xc0] sm:$0xff] }
  0x2c   :  { %v729_v58 = vrot.slane %v3418_v54, 1  ;;  %v809_v59 = vrot.slane %v3418_v54, 2  ;;  %v731_v20 = vrot.slane %v3451_v16, 1  ;;  %v892_v28 = vrot.slane %v3451_v16, 3 }
  0x2e   :  { %v730_v62 = vsel %vm168_vm2, %v727_v37, %v729_v58  ;;  %v732_v25 = vsel %vm168_vm2, %v729_v58, %v731_v20  ;;  %v3502_v58 = vld [vmem:[%s5409_s26 + $0xc8] sm:$0xff] }
  0x2f   :  { %v684_v3 = vrot.slane %v3502_v58, 7 }
  0x30   :  { %204 = vrot.lane.b32.xlu0 %v175_v55, %s3134_s21  ;;  %287 = vrot.lane.b32.xlu1 %v256_v56, %s3135_s22  ;;  %v343_v55 = vrot.slane %v3403_v44, 3  ;;  %v64_v56 = vld [vmem:[%s5409_s26 + $0x38] sm:$0xff] }
  0x31   :  { %v130_v60 = vrot.slane %v64_v56, 7 }
  0x32   :  { %v344_v61 = vsel %vm331_vm1, %v341_v35, %v343_v55  ;;  %v682_v35 = vrot.slane %v81_v30, 7 }
  0x33   :  { %369 = vrot.lane.b32.xlu2 %v338_v63, %s3133_s20  ;;  %v810_v63 = vsel %vm249_vm3, %v807_v38, %v809_v59 }
  0x38   :  { %753 = vrot.lane.b32.xlu0 %v724_v0, %s3134_s21  ;;  %835 = vrot.lane.b32.xlu1 %v804_v1, %s3135_s22  ;;  %v3433_v0 = vsel %vm116_vm0, %v128_v40, %v130_v60  ;;  %v890_v1 = vrot.slane %v3418_v54, 3  ;;  %v3481_v40 = vsel %vm116_vm0, %v680_v6, %v682_v35 }
  0x39   :  { %v182_v4 = vrot.slane %v3433_v0, 1  ;;  %v263_v5 = vrot.slane %v3433_v0, 2  ;;  %v345_v17 = vrot.slane %v3433_v0, 3  ;;  %v813_v46 = vrot.slane %v3481_v40, 2 }
  0x3a   :  { %v891_v7 = vsel %vm331_vm1, %v888_v45, %v890_v1  ;;  %v893_v36 = vsel %vm331_vm1, %v890_v1, %v892_v28  ;;  %v733_v45 = vrot.slane %v3481_v40, 1  ;;  %v894_v56 = vrot.slane %v3481_v40, 3 }
  0x3b   :  { %916 = vrot.lane.b32.xlu2 %v885_v10, %s3133_s20  ;;  %v89_v10 = vld [vmem:[%s5410_s25] sm:$0xf]  ;;  %s3139_s25 = smov 32  }
  0x3c   :  { %2899 = vmatpush.msk.msra.mxu0 %vm513_vm4, %v89_v10  ;;  %2925 = vmatpush.msk.msra.mxu2 %vm513_vm4, %v89_v10  ;;  %vm1558_vm4 = vcmask 785408  }
  0x40   :  { %206 = vrot.lane.b32.xlu0 %v177_v11, %s3134_s21  ;;  %289 = vrot.lane.b32.xlu1 %v258_v12, %s3135_s22  ;;  %v183_v11 = vsel %vm168_vm2, %v180_v47, %v182_v4  ;;  %v264_v12 = vsel %vm249_vm3, %v261_v49, %v263_v5 }
  0x43   :  { %371 = vrot.lane.b32.xlu2 %v340_v21, %s3133_s20  ;;  %v811_v21 = vrot.slane %v3451_v16, 2 }
  0x45   :  { %v812_v26 = vsel %vm249_vm3, %v809_v59, %v811_v21 }
  0x48   :  { %755 = vrot.lane.b32.xlu0 %v726_v22, %s3134_s21  ;;  %837 = vrot.lane.b32.xlu1 %v806_v23, %s3135_s22  ;;  %v132_v22 = vrot.slane %v65_v18, 7  ;;  %v346_v23 = vsel %vm331_vm1, %v343_v55, %v345_v17  ;;  %v67_v18 = vld [vmem:[%s5409_s26 + $0x50] sm:$0xff] }
  0x4a   :  { %v3466_v27 = vsel %vm116_vm0, %v130_v60, %v132_v22 }
  0x4b   :  { %918 = vrot.lane.b32.xlu2 %v887_v31, %s3133_s20 }
  0x50   :  { %208 = vrot.lane.b32.xlu0 %v179_v32, %s3134_s21  ;;  %291 = vrot.lane.b32.xlu1 %v260_v33, %s3135_s22  ;;  %v184_v32 = vrot.slane %v3466_v27, 1  ;;  %v265_v33 = vrot.slane %v3466_v27, 2 }
  0x52   :  { %v185_v37 = vsel %vm168_vm2, %v182_v4, %v184_v32  ;;  %v266_v38 = vsel %vm249_vm3, %v263_v5, %v265_v33  ;;  %v895_v4 = vsel %vm331_vm1, %v892_v28, %v894_v56 }
  0x53   :  { %373 = vrot.lane.b32.xlu2 %v342_v41, %s3133_s20  ;;  %v347_v41 = vrot.slane %v3466_v27, 3 }
  0x58   :  { %757 = vrot.lane.b32.xlu0 %v728_v42, %s3134_s21  ;;  %839 = vrot.lane.b32.xlu1 %v808_v43, %s3135_s22  ;;  %v66_v42 = vld [vmem:[%s5409_s26 + $0x48] sm:$0xff] }
  0x59   :  { %v134_v50 = vrot.slane %v66_v42, 7 }
  0x5b   :  { %920 = vrot.lane.b32.xlu2 %v889_v51, %s3133_s20  ;;  %v348_v51 = vsel %vm331_vm1, %v345_v17, %v347_v41  ;;  %v3496_v55 = vsel %vm116_vm0, %v132_v22, %v134_v50 }
  0x5c   :  { %v186_v60 = vrot.slane %v3496_v55, 1  ;;  %v349_v17 = vrot.slane %v3496_v55, 3 }
  0x60   :  { %210 = vrot.lane.b32.xlu0 %v181_v52, %s3134_s21  ;;  %293 = vrot.lane.b32.xlu1 %v262_v53, %s3135_s22  ;;  %v734_v52 = vsel %vm168_vm2, %v731_v20, %v733_v45  ;;  %v814_v53 = vsel %vm249_vm3, %v811_v21, %v813_v46 }
  0x63   :  { %375 = vrot.lane.b32.xlu2 %v344_v61, %s3133_s20  ;;  %v267_v61 = vrot.slane %v3496_v55, 2 }
  0x68   :  { %759 = vrot.lane.b32.xlu0 %v730_v62, %s3134_s21  ;;  %841 = vrot.lane.b32.xlu1 %v810_v63, %s3135_s22 }
  0x6b   :  { %922 = vrot.lane.b32.xlu2 %v891_v7, %s3133_s20 }
  0x6d   :  { %v832_v19 = vpop.permute.xlu2 %831 }
  0x70   :  { %212 = vrot.lane.b32.xlu0 %v183_v11, %s3134_s21  ;;  %295 = vrot.lane.b32.xlu1 %v264_v12, %s3135_s22  ;;  %v187_v11 = vsel %vm168_vm2, %v184_v32, %v186_v60  ;;  %v268_v12 = vsel %vm249_vm3, %v265_v33, %v267_v61 }
  0x73   :  { %377 = vrot.lane.b32.xlu2 %v346_v23, %s3133_s20 }
  0x75   :  { %v913_v31 = vpop.permute.xlu2 %912 }
  0x78   :  { %761 = vrot.lane.b32.xlu0 %v732_v25, %s3134_s21  ;;  %843 = vrot.lane.b32.xlu1 %v812_v26, %s3135_s22  ;;  %v136_v25 = vrot.slane %v67_v18, 7  ;;  %v350_v26 = vsel %vm331_vm1, %v347_v41, %v349_v17 }
  0x7b   :  { %924 = vrot.lane.b32.xlu2 %v893_v36, %s3133_s20 }
  0x7d   :  { %v368_v43 = vpop.permute.xlu2 %367 }
  0x80   :  { %214 = vrot.lane.b32.xlu0 %v185_v37, %s3134_s21  ;;  %297 = vrot.lane.b32.xlu1 %v266_v38, %s3135_s22 }
  0x82   :  { %v366_v47 = vpop.permute.xlu1 %365  ;;  %v201_v49 = vpop.permute.xlu0 %200 }
  0x83   :  { %379 = vrot.lane.b32.xlu2 %v348_v51, %s3133_s20  ;;  %v414_v62 = vsel %vm413_vm5, %v3252_v9, %v201_v49 }
  0x85   :  { %v915_v59 = vpop.permute.xlu2 %914 }
  0x88   :  { %763 = vrot.lane.b32.xlu0 %v734_v52, %s3134_s21  ;;  %845 = vrot.lane.b32.xlu1 %v814_v53, %s3135_s22 }
  0x8a   :  { %v750_v63 = vpop.permute.xlu1 %749  ;;  %v284_v1 = vpop.permute.xlu0 %283 }
  0x8b   :  { %v960_v5 = vsel %vm413_vm5, %v3262_v15, %v750_v63  ;;  %v431_v6 = vsel %vm430_vm6, %v414_v62, %v284_v1  ;;  %926 = vrot.lane.b32.xlu2 %v895_v4, %s3133_s20  ;;  %v3524_v15 = vsel %vm116_vm0, %v682_v35, %v684_v3  ;;  %v3544_v35 = vsel %vm116_vm0, %v134_v50, %v136_v25 }
  0x8c   :  { %v448_v7 = vsel %vm447_vm7, %v431_v6, %v366_v47  ;;  %v976_v10 = vsel %vm430_vm6, %v960_v5, %v832_v19  ;;  %v735_v20 = vrot.slane %v3524_v15, 1  ;;  %v815_v21 = vrot.slane %v3524_v15, 2 }
  0x8d   :  { %2900 = vmatmul.msk.f32.vlgmr.msra.gmra.mxu0 %vm464_vm8, %v448_v7  ;;  %v992_v9 = vsel %vm447_vm7, %v976_v10, %v913_v31  ;;  %v370_v19 = vpop.permute.xlu2 %369  ;;  %v896_v36 = vrot.slane %v3524_v15, 3  ;;  %v188_v38 = vrot.slane %v3544_v35, 1  ;;  %v269_v41 = vrot.slane %v3544_v35, 2 }
  0x8e   :  { %2926 = vmatmul.msk.f32.vlgmr.msra.gmra.mxu2 %vm464_vm8, %v992_v9  ;;  %v736_v32 = vsel %vm168_vm2, %v733_v45, %v735_v20  ;;  %v816_v33 = vsel %vm249_vm3, %v813_v46, %v815_v21 }
  0x8f   :  { %v897_v46 = vsel %vm331_vm1, %v894_v56, %v896_v36  ;;  %v189_v51 = vsel %vm168_vm2, %v186_v60, %v188_v38  ;;  %v270_v52 = vsel %vm249_vm3, %v267_v61, %v269_v41  ;;  %v351_v56 = vrot.slane %v3544_v35, 3 }
  0x90   :  { %216 = vrot.lane.b32.xlu0 %v187_v11, %s3134_s21  ;;  %299 = vrot.lane.b32.xlu1 %v268_v12, %s3135_s22 }
  0x91   :  { %v352_v1 = vsel %vm331_vm1, %v349_v17, %v351_v56 }
  0x92   :  { %v203_v22 = vpop.permute.xlu0 %202  ;;  %v286_v23 = vpop.permute.xlu1 %285 }
  0x93   :  { %v415_v28 = vsel %vm413_vm5, %v3249_v8, %v203_v22  ;;  %381 = vrot.lane.b32.xlu2 %v350_v26, %s3133_s20  ;;  %v83_v8 = vld [vmem:[%s5409_s26 + $0xd0] sm:$0xff] }
  0x94   :  { %v432_v30 = vsel %vm430_vm6, %v415_v28, %v286_v23  ;;  %v686_v45 = vrot.slane %v83_v8, 7 }
  0x95   :  { %v449_v31 = vsel %vm447_vm7, %v432_v30, %v368_v43  ;;  %v917_v37 = vpop.permute.xlu2 %916 }
  0x96   :  { %2901 = vmatmul.msk.f32.gmra.mxu0 %vm464_vm8, %v449_v31  ;;  %v3564_v53 = vsel %vm116_vm0, %v684_v3, %v686_v45 }
  0x97   :  { %v817_v60 = vrot.slane %v3564_v53, 2  ;;  %v898_v9 = vrot.slane %v3564_v53, 3 }
  0x98   :  { %765 = vrot.lane.b32.xlu0 %v736_v32, %s3134_s21  ;;  %847 = vrot.lane.b32.xlu1 %v816_v33, %s3135_s22 }
  0x99   :  { %v818_v7 = vsel %vm249_vm3, %v815_v21, %v817_v60  ;;  %v899_v21 = vsel %vm331_vm1, %v896_v36, %v898_v9 }
  0x9a   :  { %v752_v42 = vpop.permute.xlu0 %751  ;;  %v834_v43 = vpop.permute.xlu1 %833 }
  0x9b   :  { %v961_v47 = vsel %vm413_vm5, %v3259_v14, %v752_v42  ;;  %928 = vrot.lane.b32.xlu2 %v897_v46, %s3133_s20  ;;  %v68_v14 = vld [vmem:[%s5409_s26 + $0x58] sm:$0xff] }
  0x9c   :  { %v977_v49 = vsel %vm430_vm6, %v961_v47, %v834_v43  ;;  %v138_v63 = vrot.slane %v68_v14, 7 }
  0x9d   :  { %v993_v50 = vsel %vm447_vm7, %v977_v49, %v915_v59  ;;  %v372_v58 = vpop.permute.xlu2 %371  ;;  %v737_v59 = vrot.slane %v3564_v53, 1 }
  0x9e   :  { %2927 = vmatmul.msk.f32.gmra.mxu2 %vm464_vm8, %v993_v50  ;;  %v3584_v10 = vsel %vm116_vm0, %v136_v25, %v138_v63 }
  0x9f   :  { %v738_v6 = vsel %vm168_vm2, %v735_v20, %v737_v59  ;;  %v190_v12 = vrot.slane %v3584_v10, 1  ;;  %v271_v17 = vrot.slane %v3584_v10, 2  ;;  %v353_v31 = vrot.slane %v3584_v10, 3 }
  0xa0   :  { %218 = vrot.lane.b32.xlu0 %v189_v51, %s3134_s21  ;;  %301 = vrot.lane.b32.xlu1 %v270_v52, %s3135_s22 }
  0xa1   :  { %v191_v26 = vsel %vm168_vm2, %v188_v38, %v190_v12  ;;  %v272_v28 = vsel %vm249_vm3, %v269_v41, %v271_v17  ;;  %v354_v41 = vsel %vm331_vm1, %v351_v56, %v353_v31 }
  0xa2   :  { %v205_v61 = vpop.permute.xlu0 %204  ;;  %v288_v62 = vpop.permute.xlu1 %287 }
  0xa3   :  { %v416_v3 = vsel %vm413_vm5, %v3282_v29, %v205_v61  ;;  %383 = vrot.lane.b32.xlu2 %v352_v1, %s3133_s20  ;;  %v84_v29 = vld [vmem:[%s5409_s26 + $0xd8] sm:$0xff] }
  0xa4   :  { %v433_v4 = vsel %vm430_vm6, %v416_v3, %v288_v62  ;;  %v688_v20 = vrot.slane %v84_v29, 7 }
  0xa5   :  { %v450_v5 = vsel %vm447_vm7, %v433_v4, %v370_v19  ;;  %v919_v11 = vpop.permute.xlu2 %918 }
  0xa6   :  { %2902 = vmatmul.msk.f32.gmra.mxu0 %vm464_vm8, %v450_v5  ;;  %v3604_v30 = vsel %vm116_vm0, %v686_v45, %v688_v20 }
  0xa7   :  { %v739_v33 = vrot.slane %v3604_v30, 1  ;;  %v819_v36 = vrot.slane %v3604_v30, 2  ;;  %v900_v50 = vrot.slane %v3604_v30, 3 }
  0xa8   :  { %767 = vrot.lane.b32.xlu0 %v738_v6, %s3134_s21  ;;  %849 = vrot.lane.b32.xlu1 %v818_v7, %s3135_s22 }
  0xa9   :  { %v740_v46 = vsel %vm168_vm2, %v737_v59, %v739_v33  ;;  %v820_v47 = vsel %vm249_vm3, %v817_v60, %v819_v36  ;;  %v901_v60 = vsel %vm331_vm1, %v898_v9, %v900_v50 }
  0xaa   :  { %v754_v18 = vpop.permute.xlu0 %753  ;;  %v836_v19 = vpop.permute.xlu1 %835 }
  0xab   :  { %v962_v22 = vsel %vm413_vm5, %v3298_v39, %v754_v18  ;;  %930 = vrot.lane.b32.xlu2 %v899_v21, %s3133_s20  ;;  %v69_v39 = vld [vmem:[%s5409_s26 + $0x60] sm:$0xff] }
  0xac   :  { %v978_v23 = vsel %vm430_vm6, %v962_v22, %v836_v19  ;;  %v140_v38 = vrot.slane %v69_v39, 7 }
  0xad   :  { %v994_v25 = vsel %vm447_vm7, %v978_v23, %v917_v37  ;;  %v374_v32 = vpop.permute.xlu2 %373 }
  0xae   :  { %2928 = vmatmul.msk.f32.gmra.mxu2 %vm464_vm8, %v994_v25  ;;  %v3624_v49 = vsel %vm116_vm0, %v138_v63, %v140_v38 }
  0xaf   :  { %v192_v52 = vrot.slane %v3624_v49, 1  ;;  %v273_v56 = vrot.slane %v3624_v49, 2  ;;  %v355_v5 = vrot.slane %v3624_v49, 3 }
  0xb0   :  { %220 = vrot.lane.b32.xlu0 %v191_v26, %s3134_s21  ;;  %303 = vrot.lane.b32.xlu1 %v272_v28, %s3135_s22 }
  0xb1   :  { %v193_v1 = vsel %vm168_vm2, %v190_v12, %v192_v52  ;;  %v274_v3 = vsel %vm249_vm3, %v271_v17, %v273_v56  ;;  %v356_v17 = vsel %vm331_vm1, %v353_v31, %v355_v5 }
  0xb2   :  { %v207_v8 = vpop.permute.xlu0 %206  ;;  %v290_v37 = vpop.permute.xlu1 %289 }
  0xb3   :  { %v417_v42 = vsel %vm413_vm5, %v3313_v48, %v207_v8  ;;  %385 = vrot.lane.b32.xlu2 %v354_v41, %s3133_s20  ;;  %v85_v48 = vld [vmem:[%s5409_s26 + $0xe0] sm:$0xff] }
  0xb4   :  { %v434_v43 = vsel %vm430_vm6, %v417_v42, %v290_v37  ;;  %v690_v59 = vrot.slane %v85_v48, 7 }
  0xb5   :  { %v451_v45 = vsel %vm447_vm7, %v434_v43, %v372_v58  ;;  %v921_v51 = vpop.permute.xlu2 %920 }
  0xb6   :  { %2903 = vmatmul.msk.f32.gmra.mxu0 %vm464_vm8, %v451_v45  ;;  %v3644_v4 = vsel %vm116_vm0, %v688_v20, %v690_v59 }
  0xb7   :  { %v741_v7 = vrot.slane %v3644_v4, 1  ;;  %v821_v9 = vrot.slane %v3644_v4, 2  ;;  %v902_v25 = vrot.slane %v3644_v4, 3 }
  0xb8   :  { %769 = vrot.lane.b32.xlu0 %v740_v46, %s3134_s21  ;;  %851 = vrot.lane.b32.xlu1 %v820_v47, %s3135_s22 }
  0xb9   :  { %v742_v21 = vsel %vm168_vm2, %v739_v33, %v741_v7  ;;  %v822_v22 = vsel %vm249_vm3, %v819_v36, %v821_v9  ;;  %v903_v36 = vsel %vm331_vm1, %v900_v50, %v902_v25 }
  0xba   :  { %v756_v14 = vpop.permute.xlu0 %755  ;;  %v838_v58 = vpop.permute.xlu1 %837 }
  0xbb   :  { %v963_v61 = vsel %vm413_vm5, %v3328_v57, %v756_v14  ;;  %932 = vrot.lane.b32.xlu2 %v901_v60, %s3133_s20  ;;  %v70_v57 = vld [vmem:[%s5409_s26 + $0x68] sm:$0xff] }
  0xbc   :  { %v979_v62 = vsel %vm430_vm6, %v963_v61, %v838_v58  ;;  %v142_v12 = vrot.slane %v70_v57, 7 }
  0xbd   :  { %v995_v63 = vsel %vm447_vm7, %v979_v62, %v919_v11  ;;  %v376_v6 = vpop.permute.xlu2 %375 }
  0xbe   :  { %2929 = vmatmul.msk.f32.gmra.mxu2 %vm464_vm8, %v995_v63  ;;  %v3664_v23 = vsel %vm116_vm0, %v140_v38, %v142_v12 }
  0xbf   :  { %v194_v28 = vrot.slane %v3664_v23, 1  ;;  %v275_v31 = vrot.slane %v3664_v23, 2  ;;  %v357_v45 = vrot.slane %v3664_v23, 3 }
  0xc0   :  { %222 = vrot.lane.b32.xlu0 %v193_v1, %s3134_s21  ;;  %305 = vrot.lane.b32.xlu1 %v274_v3, %s3135_s22 }
  0xc1   :  { %v195_v41 = vsel %vm168_vm2, %v192_v52, %v194_v28  ;;  %v276_v42 = vsel %vm249_vm3, %v273_v56, %v275_v31  ;;  %v358_v56 = vsel %vm331_vm1, %v355_v5, %v357_v45 }
  0xc2   :  { %v209_v29 = vpop.permute.xlu0 %208  ;;  %v292_v11 = vpop.permute.xlu1 %291 }
  0xc3   :  { %v418_v18 = vsel %vm413_vm5, %v3343_v2, %v209_v29  ;;  %387 = vrot.lane.b32.xlu2 %v356_v17, %s3133_s20  ;;  %v86_v2 = vld [vmem:[%s5409_s26 + $0xe8] sm:$0xff] }
  0xc4   :  { %v435_v19 = vsel %vm430_vm6, %v418_v18, %v292_v11  ;;  %v692_v33 = vrot.slane %v86_v2, 7 }
  0xc5   :  { %v452_v20 = vsel %vm447_vm7, %v435_v19, %v374_v32  ;;  %v923_v26 = vpop.permute.xlu2 %922 }
  0xc6   :  { %2904 = vmatmul.msk.f32.gmra.mxu0 %vm464_vm8, %v452_v20  ;;  %v3684_v43 = vsel %vm116_vm0, %v690_v59, %v692_v33 }
  0xc7   :  { %v743_v47 = vrot.slane %v3684_v43, 1  ;;  %v823_v50 = vrot.slane %v3684_v43, 2  ;;  %v904_v63 = vrot.slane %v3684_v43, 3 }
  0xc8   :  { %771 = vrot.lane.b32.xlu0 %v742_v21, %s3134_s21  ;;  %853 = vrot.lane.b32.xlu1 %v822_v22, %s3135_s22 }
  0xc9   :  { %v744_v60 = vsel %vm168_vm2, %v741_v7, %v743_v47  ;;  %v824_v61 = vsel %vm249_vm3, %v821_v9, %v823_v50  ;;  %v905_v9 = vsel %vm331_vm1, %v902_v25, %v904_v63 }
  0xca   :  { %v758_v39 = vpop.permute.xlu0 %757  ;;  %v840_v32 = vpop.permute.xlu1 %839 }
  0xcb   :  { %v964_v8 = vsel %vm413_vm5, %v3358_v13, %v758_v39  ;;  %934 = vrot.lane.b32.xlu2 %v903_v36, %s3133_s20  ;;  %v71_v13 = vld [vmem:[%s5409_s26 + $0x70] sm:$0xff] }
  0xcc   :  { %v980_v37 = vsel %vm430_vm6, %v964_v8, %v840_v32  ;;  %v144_v52 = vrot.slane %v71_v13, 7 }
  0xcd   :  { %v996_v38 = vsel %vm447_vm7, %v980_v37, %v921_v51  ;;  %v378_v46 = vpop.permute.xlu2 %377 }
  0xce   :  { %2930 = vmatmul.msk.f32.gmra.mxu2 %vm464_vm8, %v996_v38  ;;  %v3704_v62 = vsel %vm116_vm0, %v142_v12, %v144_v52 }
  0xcf   :  { %v196_v3 = vrot.slane %v3704_v62, 1  ;;  %v277_v5 = vrot.slane %v3704_v62, 2  ;;  %v359_v20 = vrot.slane %v3704_v62, 3 }
  0xd0   :  { %224 = vrot.lane.b32.xlu0 %v195_v41, %s3134_s21  ;;  %307 = vrot.lane.b32.xlu1 %v276_v42, %s3135_s22 }
  0xd1   :  { %v197_v17 = vsel %vm168_vm2, %v194_v28, %v196_v3  ;;  %v278_v18 = vsel %vm249_vm3, %v275_v31, %v277_v5  ;;  %v360_v31 = vsel %vm331_vm1, %v357_v45, %v359_v20 }
  0xd2   :  { %v211_v48 = vpop.permute.xlu0 %210  ;;  %v294_v51 = vpop.permute.xlu1 %293 }
  0xd3   :  { %v419_v14 = vsel %vm413_vm5, %v3373_v24, %v211_v48  ;;  %389 = vrot.lane.b32.xlu2 %v358_v56, %s3133_s20  ;;  %v87_v24 = vld [vmem:[%s5409_s26 + $0xf0] sm:$0xff] }
  0xd4   :  { %v436_v58 = vsel %vm430_vm6, %v419_v14, %v294_v51  ;;  %v694_v7 = vrot.slane %v87_v24, 7 }
  0xd5   :  { %v453_v59 = vsel %vm447_vm7, %v436_v58, %v376_v6  ;;  %v925_v1 = vpop.permute.xlu2 %924 }
  0xd6   :  { %2905 = vmatmul.msk.f32.gmra.mxu0 %vm464_vm8, %v453_v59  ;;  %v3724_v19 = vsel %vm116_vm0, %v692_v33, %v694_v7 }
  0xd7   :  { %v745_v22 = vrot.slane %v3724_v19, 1  ;;  %v825_v25 = vrot.slane %v3724_v19, 2  ;;  %v906_v38 = vrot.slane %v3724_v19, 3 }
  0xd8   :  { %773 = vrot.lane.b32.xlu0 %v744_v60, %s3134_s21  ;;  %855 = vrot.lane.b32.xlu1 %v824_v61, %s3135_s22 }
  0xd9   :  { %v746_v36 = vsel %vm168_vm2, %v743_v47, %v745_v22  ;;  %v826_v8 = vsel %vm249_vm3, %v823_v50, %v825_v25  ;;  %v907_v50 = vsel %vm331_vm1, %v904_v63, %v906_v38 }
  0xda   :  { %v760_v57 = vpop.permute.xlu0 %759  ;;  %v842_v6 = vpop.permute.xlu1 %841 }
  0xdb   :  { %v965_v29 = vsel %vm413_vm5, %v3388_v34, %v760_v57  ;;  %936 = vrot.lane.b32.xlu2 %v905_v9, %s3133_s20  ;;  %v72_v34 = vld [vmem:[%s5409_s26 + $0x78] sm:$0xff] }
  0xdc   :  { %v981_v11 = vsel %vm430_vm6, %v965_v29, %v842_v6  ;;  %v146_v28 = vrot.slane %v72_v34, 7 }
  0xdd   :  { %v997_v12 = vsel %vm447_vm7, %v981_v11, %v923_v26  ;;  %v380_v21 = vpop.permute.xlu2 %379 }
  0xde   :  { %2931 = vmatmul.msk.f32.gmra.mxu2 %vm464_vm8, %v997_v12  ;;  %v3744_v37 = vsel %vm116_vm0, %v144_v52, %v146_v28  ;;  %v166_v9 = vsel %vm116_vm0, %v146_v28, 0.0 }
  0xdf   :  { %v198_v42 = vrot.slane %v3744_v37, 1  ;;  %v279_v45 = vrot.slane %v3744_v37, 2  ;;  %v361_v59 = vrot.slane %v3744_v37, 3 }
  0xe0   :  { %226 = vrot.lane.b32.xlu0 %v197_v17, %s3134_s21  ;;  %309 = vrot.lane.b32.xlu1 %v278_v18, %s3135_s22 }
  0xe1   :  { %v199_v56 = vsel %vm168_vm2, %v196_v3, %v198_v42  ;;  %v280_v14 = vsel %vm249_vm3, %v277_v5, %v279_v45 }
  0xe2   :  { %v213_v2 = vpop.permute.xlu0 %212  ;;  %v296_v26 = vpop.permute.xlu1 %295 }
  0xe3   :  { %v420_v39 = vsel %vm413_vm5, %v3403_v44, %v213_v2  ;;  %391 = vrot.lane.b32.xlu2 %v360_v31, %s3133_s20  ;;  %v88_v44 = vld [vmem:[%s5409_s26 + $0xf8] sm:$0xff]  ;;  %v363_v2 = vrot.slane %v166_v9, 3 }
  0xe4   :  { %v437_v32 = vsel %vm430_vm6, %v420_v39, %v296_v26  ;;  %v696_v47 = vrot.slane %v88_v44, 7 }
  0xe5   :  { %v454_v33 = vsel %vm447_vm7, %v437_v32, %v378_v46  ;;  %v927_v41 = vpop.permute.xlu2 %926  ;;  %v364_v39 = vsel %vm331_vm1, %v361_v59, %v363_v2 }
  0xe6   :  { %2906 = vmatmul.msk.f32.gmra.mxu0 %vm464_vm8, %v454_v33  ;;  %v3764_v58 = vsel %vm116_vm0, %v694_v7, %v696_v47 }
  0xe7   :  { %v827_v61 = vrot.slane %v3764_v58, 2  ;;  %v908_v29 = vrot.slane %v3764_v58, 3 }
  0xe8   :  { %775 = vrot.lane.b32.xlu0 %v746_v36, %s3134_s21  ;;  %857 = vrot.lane.b32.xlu1 %v826_v8, %s3135_s22 }
  0xe9   :  { %v828_v7 = vsel %vm249_vm3, %v825_v25, %v827_v61  ;;  %v909_v18 = vsel %vm331_vm1, %v906_v38, %v908_v29  ;;  %v716_v25 = vsel %vm116_vm0, %v696_v47, 0.0 }
  0xea   :  { %v762_v13 = vpop.permute.xlu0 %761  ;;  %v844_v46 = vpop.permute.xlu1 %843  ;;  %v829_v28 = vrot.slane %v716_v25, 2  ;;  %v910_v38 = vrot.slane %v716_v25, 3 }
  0xeb   :  { %v966_v48 = vsel %vm413_vm5, %v3418_v54, %v762_v13  ;;  %938 = vrot.lane.b32.xlu2 %v907_v50, %s3133_s20  ;;  %v747_v54 = vrot.slane %v3764_v58, 1 }
  0xec   :  { %v982_v51 = vsel %vm430_vm6, %v966_v48, %v844_v46  ;;  %v830_v8 = vsel %vm249_vm3, %v827_v61, %v829_v28 }
  0xed   :  { %v998_v52 = vsel %vm447_vm7, %v982_v51, %v925_v1  ;;  %v382_v60 = vpop.permute.xlu2 %381  ;;  %v362_v1 = vsel %vm331_vm1, %v359_v20, %v361_v59  ;;  %v748_v6 = vsel %vm168_vm2, %v745_v22, %v747_v54 }
  0xee   :  { %2932 = vmatmul.msk.f32.gmra.mxu2 %vm464_vm8, %v998_v52 }
  0xf0   :  { %228 = vrot.lane.b32.xlu0 %v199_v56, %s3134_s21  ;;  %311 = vrot.lane.b32.xlu1 %v280_v14, %s3135_s22 }
  0xf2   :  { %v215_v63 = vpop.permute.xlu0 %214  ;;  %v298_v24 = vpop.permute.xlu1 %297 }
  0xf3   :  { %v421_v3 = vsel %vm413_vm5, %v3433_v0, %v215_v63  ;;  %393 = vrot.lane.b32.xlu2 %v362_v1, %s3133_s20  ;;  %v281_v0 = vrot.slane %v166_v9, 2 }
  0xf4   :  { %v438_v5 = vsel %vm430_vm6, %v421_v3, %v298_v24 }
  0xf5   :  { %v455_v57 = vsel %vm447_vm7, %v438_v5, %v380_v21  ;;  %v929_v11 = vpop.permute.xlu2 %928  ;;  %v282_v22 = vsel %vm249_vm3, %v279_v45, %v281_v0 }
  0xf6   :  { %2907 = vmatmul.msk.f32.gmra.mxu0 %vm464_vm8, %v455_v57 }
  0xf8   :  { %777 = vrot.lane.b32.xlu0 %v748_v6, %s3134_s21  ;;  %859 = vrot.lane.b32.xlu1 %v828_v7, %s3135_s22 }
  0xfa   :  { %v764_v12 = vpop.permute.xlu0 %763  ;;  %v846_v17 = vpop.permute.xlu1 %845 }
  0xfb   :  { %v967_v20 = vsel %vm413_vm5, %v3451_v16, %v764_v12  ;;  %940 = vrot.lane.b32.xlu2 %v909_v18, %s3133_s20 }
  0xfc   :  { %v983_v34 = vsel %vm430_vm6, %v967_v20, %v846_v17 }
  0xfd   :  { %v999_v21 = vsel %vm447_vm7, %v983_v34, %v927_v41  ;;  %v384_v26 = vpop.permute.xlu2 %383 }
  0xfe   :  { %2933 = vmatmul.msk.f32.gmra.mxu2 %vm464_vm8, %v999_v21 }
 0x100   :  { %230 = vrot.lane.b32.xlu0 %v198_v42, %s3134_s21  ;;  %313 = vrot.lane.b32.xlu1 %v282_v22, %s3135_s22  ;;  %v911_v42 = vsel %vm331_vm1, %v908_v29, %v910_v38 }
 0x102   :  { %v217_v16 = vpop.permute.xlu0 %216  ;;  %v300_v31 = vpop.permute.xlu1 %299 }
 0x103   :  { %v422_v32 = vsel %vm413_vm5, %v3466_v27, %v217_v16  ;;  %395 = vrot.lane.b32.xlu2 %v364_v39, %s3133_s20 }
 0x104   :  { %v439_v33 = vsel %vm430_vm6, %v422_v32, %v300_v31 }
 0x105   :  { %v456_v36 = vsel %vm447_vm7, %v439_v33, %v382_v60  ;;  %v931_v44 = vpop.permute.xlu2 %930 }
 0x106   :  { %2908 = vmatmul.msk.f32.gmra.mxu0 %vm464_vm8, %v456_v36 }
 0x108   :  { %779 = vrot.lane.b32.xlu0 %v747_v54, %s3134_s21  ;;  %861 = vrot.lane.b32.xlu1 %v830_v8, %s3135_s22 }
 0x10a   :  { %v766_v41 = vpop.permute.xlu0 %765  ;;  %v848_v45 = vpop.permute.xlu1 %847 }
 0x10b   :  { %v968_v27 = vsel %vm413_vm5, %v3481_v40, %v766_v41  ;;  %942 = vrot.lane.b32.xlu2 %v911_v42, %s3133_s20 }
 0x10c   :  { %v984_v13 = vsel %vm430_vm6, %v968_v27, %v848_v45 }
 0x10d   :  { %v1000_v46 = vsel %vm447_vm7, %v984_v13, %v929_v11  ;;  %v386_v47 = vpop.permute.xlu2 %385 }
 0x10e   :  { %2934 = vmatmul.msk.f32.gmra.mxu2 %vm464_vm8, %v1000_v46 }
 0x112   :  { %v219_v50 = vpop.permute.xlu0 %218  ;;  %v302_v51 = vpop.permute.xlu1 %301 }
 0x113   :  { %v423_v48 = vsel %vm413_vm5, %v3496_v55, %v219_v50 }
 0x114   :  { %v440_v52 = vsel %vm430_vm6, %v423_v48, %v302_v51 }
 0x115   :  { %v457_v56 = vsel %vm447_vm7, %v440_v52, %v384_v26  ;;  %v933_v40 = vpop.permute.xlu2 %932 }
 0x116   :  { %2909 = vmatmul.msk.f32.gmra.mxu0 %vm464_vm8, %v457_v56 }
 0x11a   :  { %v768_v14 = vpop.permute.xlu0 %767  ;;  %v850_v60 = vpop.permute.xlu1 %849 }
 0x11b   :  { %v969_v59 = vsel %vm413_vm5, %v3524_v15, %v768_v14 }
 0x11c   :  { %v985_v54 = vsel %vm430_vm6, %v969_v59, %v850_v60 }
 0x11d   :  { %v1001_v61 = vsel %vm447_vm7, %v985_v54, %v931_v44  ;;  %v388_v55 = vpop.permute.xlu2 %387 }
 0x11e   :  { %2935 = vmatmul.msk.f32.gmra.mxu2 %vm464_vm8, %v1001_v61 }
 0x122   :  { %v221_v63 = vpop.permute.xlu0 %220  ;;  %v304_v1 = vpop.permute.xlu1 %303 }
 0x123   :  { %v424_v24 = vsel %vm413_vm5, %v3544_v35, %v221_v63 }
 0x124   :  { %v441_v3 = vsel %vm430_vm6, %v424_v24, %v304_v1 }
 0x125   :  { %v458_v5 = vsel %vm447_vm7, %v441_v3, %v386_v47  ;;  %v935_v57 = vpop.permute.xlu2 %934 }
 0x126   :  { %2910 = vmatmul.msk.f32.gmra.mxu0 %vm464_vm8, %v458_v5 }
 0x12a   :  { %v770_v15 = vpop.permute.xlu0 %769  ;;  %v852_v7 = vpop.permute.xlu1 %851 }
 0x12b   :  { %v970_v6 = vsel %vm413_vm5, %v3564_v53, %v770_v15 }
 0x12c   :  { %v986_v9 = vsel %vm430_vm6, %v970_v6, %v852_v7  ;;  %v3884_v7 = vpop.f32.mrf.mxu2 }
 0x12d   :  { %v1002_v29 = vsel %vm447_vm7, %v986_v9, %v933_v40  ;;  %v390_v17 = vpop.permute.xlu2 %389 }
 0x12e   :  { %2936 = vmatmul.msk.f32.gmra.mxu2 %vm464_vm8, %v1002_v29 }
 0x132   :  { %v223_v35 = vpop.permute.xlu0 %222  ;;  %v306_v0 = vpop.permute.xlu1 %305 }
 0x133   :  { %v425_v11 = vsel %vm413_vm5, %v3584_v10, %v223_v35 }
 0x134   :  { %v442_v12 = vsel %vm430_vm6, %v425_v11, %v306_v0  ;;  %v1076_v29 = vpop.f32.mrf.mxu2 }
 0x135   :  { %v459_v18 = vsel %vm447_vm7, %v442_v12, %v388_v55  ;;  %v937_v10 = vpop.permute.xlu2 %936 }
 0x136   :  { %2911 = vmatmul.msk.f32.gmra.mxu0 %vm464_vm8, %v459_v18 }
 0x13a   :  { %v772_v53 = vpop.permute.xlu0 %771  ;;  %v854_v34 = vpop.permute.xlu1 %853 }
 0x13b   :  { %v971_v20 = vsel %vm413_vm5, %v3604_v30, %v772_v53 }
 0x13c   :  { %v987_v21 = vsel %vm430_vm6, %v971_v20, %v854_v34  ;;  %v1079_v11 = vpop.f32.mrf.mxu2 }
 0x13d   :  { %v1003_v22 = vsel %vm447_vm7, %v987_v21, %v935_v57  ;;  %v392_v30 = vpop.permute.xlu2 %391 }
 0x13e   :  { %2937 = vmatmul.msk.f32.gmra.mxu2 %vm464_vm8, %v1003_v22 }
 0x142   :  { %v225_v25 = vpop.permute.xlu0 %224  ;;  %v308_v26 = vpop.permute.xlu1 %307 }
 0x143   :  { %v426_v2 = vsel %vm413_vm5, %v3624_v49, %v225_v25 }
 0x144   :  { %v443_v28 = vsel %vm430_vm6, %v426_v2, %v308_v26  ;;  %v1082_v12 = vpop.f32.mrf.mxu2 }
 0x145   :  { %v460_v16 = vsel %vm447_vm7, %v443_v28, %v390_v17  ;;  %v939_v8 = vpop.permute.xlu2 %938 }
 0x146   :  { %2912 = vmatmul.msk.f32.gmra.mxu0 %vm464_vm8, %v460_v16 }
 0x14a   :  { %v774_v31 = vpop.permute.xlu0 %773  ;;  %v856_v32 = vpop.permute.xlu1 %855 }
 0x14b   :  { %v972_v39 = vsel %vm413_vm5, %v3644_v4, %v774_v31 }
 0x14c   :  { %v988_v33 = vsel %vm430_vm6, %v972_v39, %v856_v32 }
 0x14d   :  { %v1004_v36 = vsel %vm447_vm7, %v988_v33, %v937_v10  ;;  %v394_v46 = vpop.permute.xlu2 %393 }
 0x14e   :  { %2938 = vmatmul.msk.f32.gmra.mxu2 %vm464_vm8, %v1004_v36 }
 0x151   :  { %v1085_v18 = vpop.f32.mrf.mxu2 }
 0x152   :  { %v227_v49 = vpop.permute.xlu0 %226  ;;  %v310_v44 = vpop.permute.xlu1 %309 }
 0x153   :  { %v427_v38 = vsel %vm413_vm5, %v3664_v23, %v227_v49 }
 0x154   :  { %v444_v41 = vsel %vm430_vm6, %v427_v38, %v310_v44  ;;  %v90_v44 = vld [vmem:[%s5381_s2] sm:$0xff] }
 0x155   :  { %v461_v42 = vsel %vm447_vm7, %v444_v41, %v392_v30  ;;  %v91_v41 = vld [vmem:[%s5381_s2 + $0x8] sm:$0xff] }
 0x156   :  { %2913 = vmatmul.msk.f32.gmra.mxu0 %vm464_vm8, %v461_v42  ;;  %v92_v42 = vld [vmem:[%s5381_s2 + $0x10] sm:$0xff] }
 0x15a   :  { %v776_v4 = vpop.permute.xlu0 %775  ;;  %v858_v45 = vpop.permute.xlu1 %857 }
 0x15b   :  { %v973_v27 = vsel %vm413_vm5, %v3684_v43, %v776_v4  ;;  %v941_v43 = vpop.permute.xlu2 %940  ;;  %v93_v4 = vld [vmem:[%s5381_s2 + $0x18] sm:$0xff] }
 0x15c   :  { %v989_v13 = vsel %vm430_vm6, %v973_v27, %v858_v45  ;;  %v94_v27 = vld [vmem:[%s5381_s2 + $0x20] sm:$0xff]  ;;  %v95_v45 = vld [vmem:[%s5381_s2 + $0x28] sm:$0xff] }
 0x15d   :  { %v1005_v47 = vsel %vm447_vm7, %v989_v13, %v939_v8  ;;  %v96_v13 = vld [vmem:[%s5381_s2 + $0x30] sm:$0xff] }
 0x15e   :  { %2939 = vmatmul.msk.f32.gmra.mxu2 %vm464_vm8, %v1005_v47 }
 0x162   :  { %v229_v23 = vpop.permute.xlu0 %228  ;;  %v312_v48 = vpop.permute.xlu1 %311 }
 0x163   :  { %v428_v50 = vsel %vm413_vm5, %v3704_v62, %v229_v23  ;;  %v396_v62 = vpop.permute.xlu2 %395 }
 0x164   :  { %v445_v51 = vsel %vm430_vm6, %v428_v50, %v312_v48 }
 0x165   :  { %v462_v52 = vsel %vm447_vm7, %v445_v51, %v394_v46  ;;  %v97_v46 = vld [vmem:[%s5381_s2 + $0x38] sm:$0xff] }
 0x166   :  { %2914 = vmatmul.msk.f32.gmra.mxu0 %vm464_vm8, %v462_v52 }
 0x16a   :  { %v778_v56 = vpop.permute.xlu0 %777  ;;  %v860_v14 = vpop.permute.xlu1 %859 }
 0x16b   :  { %v974_v40 = vsel %vm413_vm5, %v3724_v19, %v778_v56  ;;  %v3877_v19 = vpop.f32.mrf.mxu0  ;;  %v943_v3 = vpop.permute.xlu2 %942 }
 0x16c   :  { %v990_v59 = vsel %vm430_vm6, %v974_v40, %v860_v14 }
 0x16d   :  { %v1006_v60 = vsel %vm447_vm7, %v990_v59, %v941_v43 }
 0x16e   :  { %2940 = vmatmul.msk.f32.gmra.mxu2 %vm464_vm8, %v1006_v60 }
 0x172   :  { %v231_v54 = vpop.permute.xlu0 %230  ;;  %v314_v55 = vpop.permute.xlu1 %313 }
 0x173   :  { %v429_v61 = vsel %vm413_vm5, %v3744_v37, %v231_v54  ;;  %v537_v37 = vpop.f32.mrf.mxu0 }
 0x174   :  { %v446_v63 = vsel %vm430_vm6, %v429_v61, %v314_v55 }
 0x175   :  { %v463_v24 = vsel %vm447_vm7, %v446_v63, %v396_v62 }
 0x176   :  { %2915 = vmatmul.msk.f32.gmra.mxu0 %vm464_vm8, %v463_v24 }
 0x17a   :  { %v780_v1 = vpop.permute.xlu0 %779  ;;  %v862_v15 = vpop.permute.xlu1 %861 }
 0x17b   :  { %v975_v5 = vsel %vm413_vm5, %v3764_v58, %v780_v1  ;;  %v540_v9 = vpop.f32.mrf.mxu0  ;;  %v1088_v58 = vpop.f32.mrf.mxu2  ;;  %vm1608_vm5 = vcmask 515072  }
 0x17c   :  { %v991_v57 = vsel %vm430_vm6, %v975_v5, %v862_v15 }
 0x17d   :  { %v1007_v6 = vsel %vm447_vm7, %v991_v57, %v943_v3 }
 0x17e   :  { %2941 = vmatmul.msk.f32.gmra.mxu2 %vm464_vm8, %v1007_v6 }
 0x183   :  { %v543_v35 = vpop.f32.mrf.mxu0  ;;  %v1091_v34 = vpop.f32.mrf.mxu2 }
 0x18b   :  { %v546_v0 = vpop.f32.mrf.mxu0  ;;  %v1094_v22 = vpop.f32.mrf.mxu2 }
 0x193   :  { %v549_v17 = vpop.f32.mrf.mxu0  ;;  %v1097_v25 = vpop.f32.mrf.mxu2 }
 0x19b   :  { %v552_v53 = vpop.f32.mrf.mxu0 }
 0x1a1   :  { %v1100_v26 = vpop.f32.mrf.mxu2 }
 0x1a3   :  { %v555_v20 = vpop.f32.mrf.mxu0 }
 0x1ab   :  { %v558_v21 = vpop.f32.mrf.mxu0 }
 0x1b1   :  { %v1103_v16 = vpop.f32.mrf.mxu2 }
 0x1b3   :  { %v561_v10 = vpop.f32.mrf.mxu0 }
 0x1bb   :  { %v564_v2 = vpop.f32.mrf.mxu0 }
 0x1c1   :  { %v1106_v31 = vpop.f32.mrf.mxu2 }
 0x1c3   :  { %v567_v28 = vpop.f32.mrf.mxu0 }
 0x1cb   :  { %v570_v30 = vpop.f32.mrf.mxu0 }
 0x1d1   :  { %v1109_v32 = vpop.f32.mrf.mxu2 }
 0x1d3   :  { %v573_v39 = vpop.f32.mrf.mxu0 }
 0x1e1   :  { %v1112_v36 = vpop.f32.mrf.mxu2 }
 0x1e3   :  { %v576_v33 = vpop.f32.mrf.mxu0 }
 0x1f1   :  { %v1115_v8 = vpop.f32.mrf.mxu2 }
 0x1f3   :  { %v579_v49 = vpop.f32.mrf.mxu0 }
 0x1f4   :  { %2916 = vmatpush.msk.msra.mxu1 %vm168_vm2, %v579_v49 }
 0x1f6   :  { %611 = vmatpush.msra.mxu1 %v576_v33 }
 0x1f8   :  { %612 = vmatpush.msra.mxu1 %v573_v39 }
 0x1fa   :  { %613 = vmatpush.msra.mxu1 %v570_v30 }
 0x1fc   :  { %614 = vmatpush.msra.mxu1 %v567_v28 }
 0x1fe   :  { %615 = vmatpush.msra.mxu1 %v564_v2 }
 0x200   :  { %616 = vmatpush.msra.mxu1 %v561_v10 }
 0x201   :  { %v1118_v38 = vpop.f32.mrf.mxu2 }
 0x202   :  { %617 = vmatpush.msra.mxu1 %v558_v21  ;;  %2942 = vmatpush.msk.msra.mxu3 %vm168_vm2, %v1118_v38 }
 0x204   :  { %618 = vmatpush.msra.mxu1 %v555_v20  ;;  %1125 = vmatpush.msra.mxu3 %v1115_v8 }
 0x206   :  { %619 = vmatpush.msra.mxu1 %v552_v53  ;;  %1126 = vmatpush.msra.mxu3 %v1112_v36  ;;  %v3136_v53 = vmov 128.0  }
 0x207   :  { %3091 = vrcp.f32 %v3136_v53 }
 0x208   :  { %620 = vmatpush.msra.mxu1 %v549_v17  ;;  %1127 = vmatpush.msra.mxu3 %v1109_v32 }
 0x20a   :  { %621 = vmatpush.msra.mxu1 %v546_v0  ;;  %1128 = vmatpush.msra.mxu3 %v1106_v31 }
 0x20c   :  { %622 = vmatpush.msra.mxu1 %v543_v35  ;;  %1129 = vmatpush.msra.mxu3 %v1103_v16 }
 0x20d   :  { %v3092_v10 = vpop.eup %3091 }
 0x20e   :  { %623 = vmatpush.msra.mxu1 %v540_v9  ;;  %1130 = vmatpush.msra.mxu3 %v1100_v26  ;;  %v1204_v26 = vmul.f32 128.0, %v3092_v10  ;;  %vm1208_vm11 = vweird.f32 %v3092_v10 }
 0x210   :  { %624 = vmatpush.msra.mxu1 %v537_v37  ;;  %1131 = vmatpush.msra.mxu3 %v1097_v25  ;;  %v1205_v39 = vsub.f32 1.0, %v1204_v26 }
 0x212   :  { %625 = vmatpush.msra.mxu1 %v3877_v19  ;;  %1132 = vmatpush.msra.mxu3 %v1094_v22  ;;  %v1206_v36 = vmul.f32 %v3092_v10, %v1205_v39 }
 0x213   :  { %2917 = vmatmul.msk.f32.vlgmr.msra.gmra.mxu1 %vm582_vm9, %v90_v44 }
 0x214   :  { %1133 = vmatpush.msra.mxu3 %v1091_v34  ;;  %v1207_v38 = vadd.f32 %v3092_v10, %v1206_v36 }
 0x216   :  { %1134 = vmatpush.msra.mxu3 %v1088_v58 }
 0x218   :  { %1135 = vmatpush.msra.mxu3 %v1085_v18 }
 0x21a   :  { %1136 = vmatpush.msra.mxu3 %v1082_v12 }
 0x21b   :  { %2918 = vmatmul.msk.f32.gmra.mxu1 %vm582_vm9, %v91_v41 }
 0x21c   :  { %1137 = vmatpush.msra.mxu3 %v1079_v11 }
 0x21e   :  { %1138 = vmatpush.msra.mxu3 %v1076_v29 }
 0x220   :  { %1139 = vmatpush.msra.mxu3 %v3884_v7 }
 0x221   :  { %2943 = vmatmul.msk.f32.vlgmr.msra.gmra.mxu3 %vm582_vm9, %v90_v44 }
 0x223   :  { %2919 = vmatmul.msk.f32.gmra.mxu1 %vm582_vm9, %v92_v42 }
 0x229   :  { %2944 = vmatmul.msk.f32.gmra.mxu3 %vm582_vm9, %v91_v41 }
 0x22b   :  { %2920 = vmatmul.msk.f32.gmra.mxu1 %vm582_vm9, %v93_v4 }
 0x231   :  { %2945 = vmatmul.msk.f32.gmra.mxu3 %vm582_vm9, %v92_v42  ;;  %v3988_v42 = vsel %vm1208_vm11, %v3092_v10, %v1207_v38 }
 0x233   :  { %2921 = vmatmul.msk.f32.gmra.mxu1 %vm582_vm9, %v94_v27 }
 0x239   :  { %2946 = vmatmul.msk.f32.gmra.mxu3 %vm582_vm9, %v93_v4 }
 0x23b   :  { %2922 = vmatmul.msk.f32.gmra.mxu1 %vm582_vm9, %v95_v45 }
 0x241   :  { %2947 = vmatmul.msk.f32.gmra.mxu3 %vm582_vm9, %v94_v27 }
 0x243   :  { %2923 = vmatmul.msk.f32.gmra.mxu1 %vm582_vm9, %v96_v13 }
 0x249   :  { %2948 = vmatmul.msk.f32.gmra.mxu3 %vm582_vm9, %v95_v45 }
 0x24b   :  { %2924 = vmatmul.msk.f32.gmra.mxu1 %vm582_vm9, %v97_v46 }
 0x251   :  { %2949 = vmatmul.msk.f32.gmra.mxu3 %vm582_vm9, %v96_v13 }
 0x259   :  { %2950 = vmatmul.msk.f32.gmra.mxu3 %vm582_vm9, %v97_v46 }
 0x290   :  { %v3930_v47 = vpop.f32.mrf.mxu1 }
 0x291   :  { %v1166_v60 = vsel %vm1165_vm10, %v3930_v47, 0.0 }
 0x298   :  { %v3932_v23 = vpop.f32.mrf.mxu1 }
 0x299   :  { %v1167_v14 = vsel %vm1165_vm10, %v3932_v23, 0.0 }
 0x29a   :  { %v1168_v54 = vadd.f32 %v1167_v14, %v1166_v60 }
 0x2a0   :  { %v3934_v50 = vpop.f32.mrf.mxu1 }
 0x2a1   :  { %v1169_v62 = vsel %vm1165_vm10, %v3934_v50, 0.0 }
 0x2a2   :  { %v1170_v55 = vadd.f32 %v1169_v62, %v1168_v54 }
 0x2a4   :  { %v3936_v48 = vpop.f32.mrf.mxu3 }
 0x2a5   :  { %v1181_v29 = vsel %vm1165_vm10, %v3936_v48, 0.0 }
 0x2a8   :  { %v3938_v51 = vpop.f32.mrf.mxu1 }
 0x2a9   :  { %v1171_v61 = vsel %vm1165_vm10, %v3938_v51, 0.0 }
 0x2aa   :  { %v1172_v19 = vadd.f32 %v1171_v61, %v1170_v55 }
 0x2ac   :  { %v3940_v52 = vpop.f32.mrf.mxu3 }
 0x2ad   :  { %v1183_v0 = vsel %vm1165_vm10, %v3940_v52, 0.0 }
 0x2b0   :  { %v3942_v43 = vpop.f32.mrf.mxu1 }
 0x2b1   :  { %v1173_v24 = vsel %vm1165_vm10, %v3942_v43, 0.0 }
 0x2b2   :  { %v1174_v3 = vadd.f32 %v1173_v24, %v1172_v19 }
 0x2b4   :  { %v3944_v56 = vpop.f32.mrf.mxu3 }
 0x2b5   :  { %v1185_v17 = vsel %vm1165_vm10, %v3944_v56, 0.0 }
 0x2b8   :  { %v3946_v40 = vpop.f32.mrf.mxu1 }
 0x2b9   :  { %v1175_v1 = vsel %vm1165_vm10, %v3946_v40, 0.0 }
 0x2ba   :  { %v1176_v57 = vadd.f32 %v1175_v1, %v1174_v3 }
 0x2bc   :  { %v3950_v59 = vpop.f32.mrf.mxu3 }
 0x2bd   :  { %v1187_v58 = vsel %vm1165_vm10, %v3950_v59, 0.0 }
 0x2c0   :  { %v645_v63 = vpop.f32.mrf.mxu1 }
 0x2c1   :  { %v1177_v15 = vsel %vm1165_vm10, %v645_v63, 0.0 }
 0x2c2   :  { %v1178_v6 = vadd.f32 %v1177_v15, %v1176_v57 }
 0x2c4   :  { %v3962_v5 = vpop.f32.mrf.mxu3 }
 0x2c5   :  { %v1189_v34 = vsel %vm1165_vm10, %v3962_v5, 0.0 }
 0x2c8   :  { %v648_v37 = vpop.f32.mrf.mxu1 }
 0x2c9   :  { %v1179_v7 = vsel %vm1165_vm10, %v648_v37, 0.0 }
 0x2ca   :  { %v1180_v9 = vadd.f32 %v1179_v7, %v1178_v6 }
 0x2cc   :  { %v1182_v35 = vadd.f32 %v1181_v29, %v1180_v9  ;;  %v3968_v11 = vpop.f32.mrf.mxu3 }
 0x2cd   :  { %v1191_v25 = vsel %vm1165_vm10, %v3968_v11, 0.0 }
 0x2ce   :  { %v1184_v12 = vadd.f32 %v1183_v0, %v1182_v35 }
 0x2d0   :  { %v1186_v18 = vadd.f32 %v1185_v17, %v1184_v12 }
 0x2d2   :  { %v1188_v20 = vadd.f32 %v1187_v58, %v1186_v18 }
 0x2d4   :  { %v1190_v21 = vadd.f32 %v1189_v34, %v1188_v20  ;;  %v3978_v22 = vpop.f32.mrf.mxu3 }
 0x2d5   :  { %v1193_v28 = vsel %vm1165_vm10, %v3978_v22, 0.0 }
 0x2d6   :  { %v1192_v2 = vadd.f32 %v1191_v25, %v1190_v21 }
 0x2d8   :  { %v1194_v16 = vadd.f32 %v1193_v28, %v1192_v2 }
 0x2dc   :  { %v3984_v30 = vpop.f32.mrf.mxu3 }
 0x2dd   :  { %v1195_v31 = vsel %vm1165_vm10, %v3984_v30, 0.0 }
 0x2de   :  { %v1196_v32 = vadd.f32 %v1195_v31, %v1194_v16 }
 0x2e0   :  { %v1197_v33 = vrot.slane %v1196_v32, 4 }
 0x2e2   :  { %v1198_v49 = vadd.f32 %v1197_v33, %v1196_v32 }
 0x2e4   :  { %v1199_v8 = vrot.slane %v1198_v49, 2 }
 0x2e6   :  { %v1200_v44 = vadd.f32 %v1199_v8, %v1198_v49 }
 0x2e8   :  { %v1201_v41 = vrot.slane %v1200_v44, 1 }
 0x2ea   :  { %v1202_v4 = vadd.f32 %v1201_v41, %v1200_v44 }
 0x2ec   :  { %v1210_v27 = vmul.f32 %v3988_v42, %v1202_v4 }
 0x2ee   :  { %v3992_v45 = vsub.f32 %v3930_v47, %v1210_v27  ;;  %v3995_v13 = vsub.f32 %v3932_v23, %v1210_v27  ;;  %v3998_v46 = vsub.f32 %v3934_v50, %v1210_v27  ;;  %v4001_v14 = vsub.f32 %v3938_v51, %v1210_v27 }
 0x2ef   :  { %v4008_v54 = vsub.f32 %v3942_v43, %v1210_v27  ;;  %v4013_v23 = vsub.f32 %v3946_v40, %v1210_v27  ;;  %v4019_v24 = vsub.f32 %v645_v63, %v1210_v27  ;;  %v4024_v3 = vsub.f32 %v648_v37, %v1210_v27 }
 0x2f0   :  { %v1227_v60 = vmul.f32 %v3992_v45, %v3992_v45  ;;  %v1228_v62 = vmul.f32 %v3995_v13, %v3995_v13  ;;  %v1229_v47 = vmul.f32 %v3998_v46, %v3998_v46  ;;  %v1230_v50 = vmul.f32 %v4001_v14, %v4001_v14 }
 0x2f1   :  { %v1231_v43 = vmul.f32 %v4008_v54, %v4008_v54  ;;  %v1232_v40 = vmul.f32 %v4013_v23, %v4013_v23  ;;  %v4030_v6 = vsub.f32 %v3936_v48, %v1210_v27  ;;  %v1233_v63 = vmul.f32 %v4019_v24, %v4019_v24 }
 0x2f2   :  { %v1243_v51 = vsel %vm1165_vm10, %v1227_v60, 0.0  ;;  %v1244_v61 = vsel %vm1165_vm10, %v1228_v62, 0.0  ;;  %v1246_v19 = vsel %vm1165_vm10, %v1229_v47, 0.0  ;;  %v1248_v15 = vsel %vm1165_vm10, %v1230_v50, 0.0 }
 0x2f3   :  { %v1245_v55 = vadd.f32 %v1244_v61, %v1243_v51  ;;  %v1250_v7 = vsel %vm1165_vm10, %v1231_v43, 0.0  ;;  %v4036_v29 = vsub.f32 %v3940_v52, %v1210_v27  ;;  %v1234_v37 = vmul.f32 %v4024_v3, %v4024_v3 }
 0x2f4   :  { %v1252_v35 = vsel %vm1165_vm10, %v1232_v40, 0.0  ;;  %v4042_v12 = vsub.f32 %v3944_v56, %v1210_v27  ;;  %v1235_v48 = vmul.f32 %v4030_v6, %v4030_v6  ;;  %v1254_v17 = vsel %vm1165_vm10, %v1233_v63, 0.0 }
 0x2f5   :  { %v1247_v1 = vadd.f32 %v1246_v19, %v1245_v55  ;;  %v4048_v53 = vsub.f32 %v3950_v59, %v1210_v27  ;;  %v1236_v52 = vmul.f32 %v4036_v29, %v4036_v29  ;;  %v1256_v58 = vsel %vm1165_vm10, %v1234_v37, 0.0 }
 0x2f6   :  { %v4054_v34 = vsub.f32 %v3962_v5, %v1210_v27  ;;  %v1237_v56 = vmul.f32 %v4042_v12, %v4042_v12  ;;  %v1258_v21 = vsel %vm1165_vm10, %v1235_v48, 0.0  ;;  %v4060_v25 = vsub.f32 %v3968_v11, %v1210_v27 }
 0x2f7   :  { %v1249_v57 = vadd.f32 %v1248_v15, %v1247_v1  ;;  %v1238_v59 = vmul.f32 %v4048_v53, %v4048_v53  ;;  %v1260_v2 = vsel %vm1165_vm10, %v1236_v52, 0.0  ;;  %v1225_v28 = vsub.f32 %v3978_v22, %v1210_v27 }
 0x2f8   :  { %v1239_v5 = vmul.f32 %v4054_v34, %v4054_v34  ;;  %v1262_v16 = vsel %vm1165_vm10, %v1237_v56, 0.0  ;;  %v1226_v39 = vsub.f32 %v3984_v30, %v1210_v27  ;;  %v1240_v11 = vmul.f32 %v4060_v25, %v4060_v25 }
 0x2f9   :  { %v1251_v9 = vadd.f32 %v1250_v7, %v1249_v57  ;;  %v1264_v32 = vsel %vm1165_vm10, %v1238_v59, 0.0  ;;  %v1241_v36 = vmul.f32 %v1225_v28, %v1225_v28  ;;  %v4081_v7 = vld [vmem:[%s5382_s3] ss:$0 sm:$0xff]  ;;  %s3137_s3 = smov 96  }
 0x2fa   :  { %v1266_v49 = vsel %vm1165_vm10, %v1239_v5, 0.0  ;;  %v1242_v38 = vmul.f32 %v1226_v39, %v1226_v39  ;;  %v1268_v22 = vsel %vm1165_vm10, %v1240_v11, 0.0 }
 0x2fb   :  { %v1253_v0 = vadd.f32 %v1252_v35, %v1251_v9  ;;  %v1270_v41 = vsel %vm1165_vm10, %v1241_v36, 0.0  ;;  %v4090_v35 = vld [vmem:[%s5383_s4] ss:$0 sm:$0xff]  ;;  %s3138_s4 = smov 64  }
 0x2fc   :  { %v1272_v60 = vsel %vm1165_vm10, %v1242_v38, 0.0 }
 0x2fd   :  { %v1255_v18 = vadd.f32 %v1254_v17, %v1253_v0 }
 0x2ff   :  { %v1257_v20 = vadd.f32 %v1256_v58, %v1255_v18 }
 0x301   :  { %v1259_v10 = vadd.f32 %v1258_v21, %v1257_v20 }
 0x303   :  { %v1261_v26 = vadd.f32 %v1260_v2, %v1259_v10 }
 0x305   :  { %v1263_v31 = vadd.f32 %v1262_v16, %v1261_v26 }
 0x307   :  { %v1265_v33 = vadd.f32 %v1264_v32, %v1263_v31 }
 0x309   :  { %v1267_v8 = vadd.f32 %v1266_v49, %v1265_v33 }
 0x30b   :  { %v1269_v44 = vadd.f32 %v1268_v22, %v1267_v8 }
 0x30d   :  { %v1271_v4 = vadd.f32 %v1270_v41, %v1269_v44 }
 0x30f   :  { %v1273_v30 = vadd.f32 %v1272_v60, %v1271_v4 }
 0x311   :  { %v1274_v27 = vrot.slane %v1273_v30, 4 }
 0x313   :  { %v1275_v62 = vadd.f32 %v1274_v27, %v1273_v30 }
 0x315   :  { %v1276_v47 = vrot.slane %v1275_v62, 2 }
 0x317   :  { %v1277_v50 = vadd.f32 %v1276_v47, %v1275_v62 }
 0x319   :  { %v1278_v51 = vrot.slane %v1277_v50, 1 }
 0x31b   :  { %v1279_v61 = vadd.f32 %v1278_v51, %v1277_v50 }
 0x31d   :  { %v1280_v55 = vmul.f32 %v1279_v61, %v3988_v42 }
 0x31f   :  { %v1281_v43 = vadd.f32 1e-05, %v1280_v55 }
 0x321   :  { %3093 = vrsqrt.f32 %v1281_v43  ;;  %vm1288_vm13 = vweird.f32 %v1281_v43 }
 0x327   :  { %v3094_v19 = vpop.eup %3093 }
 0x328   :  { %v1283_v1 = vmul.f32 %v3094_v19, %v1281_v43  ;;  %vm1289_vm12 = vweird.f32 %v3094_v19 }
 0x329   :  { %vm1290_vm14 = vmor %vm1288_vm13, %vm1289_vm12 }
 0x32a   :  { %v1284_v40 = vmul.f32 %v3094_v19, %v1283_v1 }
 0x32c   :  { %v1285_v15 = vmul.f32 0.5, %v1284_v40 }
 0x32e   :  { %v1286_v57 = vsub.f32 1.5, %v1285_v15 }
 0x330   :  { %v1287_v63 = vmul.f32 %v3094_v19, %v1286_v57 }
 0x332   :  { %v4083_v9 = vsel %vm1290_vm14, %v3094_v19, %v1287_v63 }
 0x333   :  { %v1306_v42 = vmul.f32 %v4083_v9, %v1225_v28  ;;  %v1307_v37 = vmul.f32 %v4083_v9, %v1226_v39  ;;  %v1292_v0 = vmul.f32 %v4083_v9, %v3992_v45  ;;  %v1293_v48 = vmul.f32 %v4083_v9, %v3995_v13 }
 0x334   :  { %v1294_v17 = vmul.f32 %v4083_v9, %v3998_v46  ;;  %v1295_v18 = vmul.f32 %v4083_v9, %v4001_v14  ;;  %v1296_v20 = vmul.f32 %v4083_v9, %v4008_v54  ;;  %v1297_v45 = vmul.f32 %v4083_v9, %v4013_v23 }
 0x335   :  { %v4101_v52 = vmul.f32 %v4081_v7, %v1306_v42  ;;  %v1326_v58 = vmul.f32 %v4081_v7, %v1307_v37  ;;  %v1311_v56 = vmul.f32 %v4081_v7, %v1292_v0  ;;  %v1312_v13 = vmul.f32 %v4081_v7, %v1293_v48 }
 0x336   :  { %v1313_v46 = vmul.f32 %v4081_v7, %v1294_v17  ;;  %v1314_v21 = vmul.f32 %v4081_v7, %v1295_v18  ;;  %v1315_v10 = vmul.f32 %v4081_v7, %v1296_v20  ;;  %v1316_v59 = vmul.f32 %v4081_v7, %v1297_v45 }
 0x337   :  { %v4113_v14 = vadd.f32 %v4090_v35, %v1326_v58  ;;  %v1298_v54 = vmul.f32 %v4083_v9, %v4019_v24  ;;  %v1330_v23 = vadd.f32 %v4090_v35, %v1311_v56  ;;  %v1331_v2 = vadd.f32 %v4090_v35, %v1312_v13 }
 0x338   :  { %v1332_v26 = vadd.f32 %v4090_v35, %v1313_v46  ;;  %v1333_v28 = vadd.f32 %v4090_v35, %v1314_v21  ;;  %v1334_v5 = vadd.f32 %v4090_v35, %v1315_v10  ;;  %v1335_v16 = vadd.f32 %v4090_v35, %v1316_v59 }
 0x339   :  { %v1317_v31 = vmul.f32 %v4081_v7, %v1298_v54  ;;  %v1346_v39 = vmax.f32 %v1330_v23, 0.0  ;;  %v1347_v11 = vmax.f32 %v1331_v2, 0.0  ;;  %v1305_v59 = vmul.f32 %v4083_v9, %v4060_v25 }
 0x33a   :  { %v1348_v32 = vmax.f32 %v1332_v26, 0.0  ;;  %v1349_v33 = vmax.f32 %v1333_v28, 0.0  ;;  %v1350_v36 = vmax.f32 %v1334_v5, 0.0  ;;  %v1351_v41 = vmax.f32 %v1335_v16, 0.0 }
 0x33b   :  { %v1336_v24 = vadd.f32 %v4090_v35, %v1317_v31  ;;  %v1392_v49 = vrot.slane %v1346_v39, 7  ;;  %v1393_v8 = vrot.slane %v1347_v11, 7  ;;  %v1299_v2 = vmul.f32 %v4083_v9, %v4024_v3 }
 0x33c   :  { %v1395_v38 = vrot.slane %v1348_v32, 7  ;;  %v1397_v22 = vrot.slane %v1349_v33, 7  ;;  %v1399_v44 = vrot.slane %v1350_v36, 7  ;;  %v1401_v46 = vrot.slane %v1351_v41, 7 }
 0x33d   :  { %v4128_v4 = vsel %vm116_vm0, %v1392_v49, %v1393_v8  ;;  %v4134_v30 = vsel %vm116_vm0, 0.0, %v1392_v49  ;;  %v1352_v27 = vmax.f32 %v1336_v24, 0.0  ;;  %v1318_v32 = vmul.f32 %v4081_v7, %v1299_v2 }
 0x33e   :  { %v4131_v60 = vsel %vm116_vm0, %v1393_v8, %v1395_v38  ;;  %v1500_v62 = vrot.slane %v4134_v30, 3  ;;  %v1501_v47 = vrot.slane %v4128_v4, 3  ;;  %v1459_v51 = vrot.slane %v4134_v30, 2 }
 0x33f   :  { %v1503_v50 = vrot.slane %v4131_v60, 3  ;;  %v1460_v61 = vrot.slane %v4128_v4, 2  ;;  %v1462_v55 = vrot.slane %v4131_v60, 2  ;;  %v1419_v43 = vrot.slane %v4134_v30, 1 }
 0x340   :  { %v1420_v19 = vrot.slane %v4128_v4, 1  ;;  %v1502_v1 = vsel %vm331_vm1, %v1500_v62, %v1501_v47  ;;  %v1422_v15 = vrot.slane %v4131_v60, 1  ;;  %v4148_v57 = vsel %vm116_vm0, %v1395_v38, %v1397_v22 }
 0x341   :  { %v1504_v40 = vsel %vm331_vm1, %v1501_v47, %v1503_v50  ;;  %v1461_v42 = vsel %vm249_vm3, %v1459_v51, %v1460_v61  ;;  %v1463_v37 = vsel %vm249_vm3, %v1460_v61, %v1462_v55  ;;  %v4155_v18 = vsel %vm116_vm0, %v1397_v22, %v1399_v44 }
 0x342   :  { %v2998_v63 = vpack.i.bf16 %v1504_v40, %v1502_v1  ;;  %v1421_v0 = vsel %vm168_vm2, %v1419_v43, %v1420_v19  ;;  %v2993_v48 = vpack.i.bf16 %v1463_v37, %v1461_v42  ;;  %v1423_v17 = vsel %vm168_vm2, %v1420_v19, %v1422_v15 }
 0x343   :  { %v2988_v58 = vpack.i.bf16 %v1423_v17, %v1421_v0  ;;  %v1464_v20 = vrot.slane %v4148_v57, 2  ;;  %v1466_v45 = vrot.slane %v4155_v18, 2  ;;  %v1424_v56 = vrot.slane %v4148_v57, 1 }
 0x344   :  { %2999 = vrot.lane.b32.xlu2 %v2998_v63, %s3137_s3  ;;  %2994 = vrot.lane.b32.xlu1 %v2993_v48, %s3138_s4  ;;  %v1426_v13 = vrot.slane %v4155_v18, 1  ;;  %v1403_v21 = vrot.slane %v1352_v27, 7  ;;  %v1505_v10 = vrot.slane %v4148_v57, 3  ;;  %v4174_v5 = vsel %vm116_vm0, %v1399_v44, %v1401_v46 }
 0x345   :  { %2989 = vrot.lane.b32.xlu0 %v2988_v58, %s3139_s25  ;;  %v1465_v54 = vsel %vm249_vm3, %v1462_v55, %v1464_v20  ;;  %v1467_v23 = vsel %vm249_vm3, %v1464_v20, %v1466_v45  ;;  %v1425_v26 = vsel %vm168_vm2, %v1422_v15, %v1424_v56  ;;  %v1428_v11 = vrot.slane %v4174_v5, 1 }
 0x346   :  { %v1427_v28 = vsel %vm168_vm2, %v1424_v56, %v1426_v13  ;;  %v4177_v16 = vsel %vm116_vm0, %v1401_v46, %v1403_v21  ;;  %v1506_v31 = vsel %vm331_vm1, %v1503_v50, %v1505_v10  ;;  %v3008_v25 = vpack.i.bf16 %v1467_v23, %v1465_v54 }
 0x347   :  { %v3003_v39 = vpack.i.bf16 %v1427_v28, %v1425_v26  ;;  %v1430_v3 = vrot.slane %v4177_v16, 1  ;;  %v1324_v33 = vmul.f32 %v4081_v7, %v1305_v59  ;;  %v1344_v36 = vadd.f32 %v4090_v35, %v4101_v52 }
 0x348   :  { %v1468_v24 = vrot.slane %v4174_v5, 2  ;;  %v1429_v8 = vsel %vm168_vm2, %v1426_v13, %v1428_v11  ;;  %v1337_v22 = vadd.f32 %v4090_v35, %v1318_v32  ;;  %v1507_v44 = vrot.slane %v4155_v18, 3 }
 0x349   :  { %v1343_v49 = vadd.f32 %v4090_v35, %v1324_v33  ;;  %v1431_v38 = vsel %vm168_vm2, %v1428_v11, %v1430_v3  ;;  %v1361_v41 = vmax.f32 %v4113_v14, 0.0  ;;  %v1300_v62 = vmul.f32 %v4083_v9, %v4030_v6 }
 0x34a   :  { %v1469_v52 = vsel %vm249_vm3, %v1466_v45, %v1468_v24  ;;  %v3013_v27 = vpack.i.bf16 %v1431_v38, %v1429_v8  ;;  %v1301_v47 = vmul.f32 %v4083_v9, %v4036_v29  ;;  %v1353_v50 = vmax.f32 %v1337_v22, 0.0 }
 0x34b   :  { %v1302_v51 = vmul.f32 %v4083_v9, %v4042_v12  ;;  %v1360_v61 = vmax.f32 %v1344_v36, 0.0  ;;  %v1508_v14 = vsel %vm331_vm1, %v1505_v10, %v1507_v44  ;;  %v4208_v55 = vrot.slane %v1361_v41, 7 }
 0x34c   :  { %1521 = vrot.lane.b32.xlu2 %v1506_v31, %s3137_s3  ;;  %3009 = vrot.lane.b32.xlu1 %v3008_v25, %s3138_s4  ;;  %v1509_v6 = vrot.slane %v4174_v5, 3  ;;  %v1511_v43 = vrot.slane %v4177_v16, 3  ;;  %v1470_v29 = vrot.slane %v4177_v16, 2  ;;  %v1319_v19 = vmul.f32 %v4081_v7, %v1300_v62 }
 0x34d   :  { %3004 = vrot.lane.b32.xlu0 %v3003_v39, %s3139_s25  ;;  %v1320_v1 = vmul.f32 %v4081_v7, %v1301_v47  ;;  %v1405_v12 = vrot.slane %v1353_v50, 7  ;;  %v1321_v40 = vmul.f32 %v4081_v7, %v1302_v51  ;;  %v1359_v15 = vmax.f32 %v1343_v49, 0.0 }
 0x34e   :  { %v1672_v63 = vrot.slane %v1360_v61, 7  ;;  %v1512_v42 = vsel %vm331_vm1, %v1509_v6, %v1511_v43  ;;  %v1471_v37 = vsel %vm249_vm3, %v1468_v24, %v1470_v29  ;;  %v1338_v0 = vadd.f32 %v4090_v35, %v1319_v19 }
 0x34f   :  { %v1339_v48 = vadd.f32 %v4090_v35, %v1320_v1  ;;  %v4223_v17 = vsel %vm116_vm0, %v1403_v21, %v1405_v12  ;;  %v1340_v58 = vadd.f32 %v4090_v35, %v1321_v40  ;;  %v4226_v20 = vrot.slane %v1359_v15, 7 }
 0x350   :  { %v4230_v45 = vsel %vm116_vm0, %v1672_v63, %v4208_v55  ;;  %v1304_v56 = vmul.f32 %v4083_v9, %v4054_v34  ;;  %v1510_v13 = vsel %vm331_vm1, %v1507_v44, %v1509_v6  ;;  %v1303_v46 = vmul.f32 %v4083_v9, %v4048_v53 }
 0x351   :  { %v1513_v21 = vrot.slane %v4223_v17, 3  ;;  %v4242_v10 = vsel %vm116_vm0, %v4226_v20, %v1672_v63  ;;  %v1472_v59 = vrot.slane %v4223_v17, 2  ;;  %v1354_v54 = vmax.f32 %v1338_v0, 0.0 }
 0x352   :  { %v1355_v23 = vmax.f32 %v1339_v48, 0.0  ;;  %v1356_v34 = vmax.f32 %v1340_v58, 0.0  ;;  %v1432_v2 = vrot.slane %v4223_v17, 1  ;;  %v1322_v26 = vmul.f32 %v4081_v7, %v1303_v46 }
 0x353   :  { %v1323_v28 = vmul.f32 %v4081_v7, %v1304_v56  ;;  %v1514_v53 = vsel %vm331_vm1, %v1511_v43, %v1513_v21  ;;  %v1417_v9 = vsel %vm116_vm0, %v1405_v12, 0.0  ;;  %v1473_v31 = vsel %vm249_vm3, %v1470_v29, %v1472_v59 }
 0x354   :  { %1484 = vrot.lane.b32.xlu2 %v1469_v52, %s3138_s4  ;;  %3014 = vrot.lane.b32.xlu1 %v3013_v27, %s3139_s25  ;;  %v1661_v25 = vrot.slane %v1354_v54, 7  ;;  %v1662_v39 = vrot.slane %v1355_v23, 7  ;;  %v1664_v11 = vrot.slane %v1356_v34, 7  ;;  %v1433_v32 = vsel %vm168_vm2, %v1430_v3, %v1432_v2 }
 0x355   :  { %1523 = vrot.lane.b32.xlu0 %v1508_v14, %s3137_s3  ;;  %v1341_v33 = vadd.f32 %v4090_v35, %v1322_v26  ;;  %v1342_v7 = vadd.f32 %v4090_v35, %v1323_v28  ;;  %v1515_v36 = vrot.slane %v1417_v9, 3  ;;  %v1474_v24 = vrot.slane %v1417_v9, 2 }
 0x356   :  { %v4260_v49 = vsel %vm116_vm0, %v1661_v25, %v1662_v39  ;;  %v4263_v8 = vsel %vm116_vm0, %v1662_v39, %v1664_v11  ;;  %v4266_v38 = vsel %vm116_vm0, 0.0, %v1661_v25  ;;  %v4319_v25 = vld [vmem:[%s5384_s5 + $0x78] sm:$0xff]  ;;  %v4326_v39 = vld [vmem:[%s5384_s5 + $0x70] sm:$0xff] }
 0x357   :  { %v1357_v22 = vmax.f32 %v1341_v33, 0.0  ;;  %v1358_v44 = vmax.f32 %v1342_v7, 0.0  ;;  %v1516_v3 = vsel %vm331_vm1, %v1513_v21, %v1515_v36  ;;  %v1475_v41 = vsel %vm249_vm3, %v1472_v59, %v1474_v24  ;;  %1567 = vmatpush.msrb.mxu1 %v4319_v25  ;;  %v4333_v33 = vld [vmem:[%s5384_s5 + $0x68] sm:$0xff]  ;;  %v4340_v36 = vld [vmem:[%s5384_s5 + $0x60] sm:$0xff] }
 0x358   :  { %v1769_v35 = vrot.slane %v4266_v38, 3  ;;  %v1770_v52 = vrot.slane %v4260_v49, 3  ;;  %v1772_v27 = vrot.slane %v4263_v8, 3  ;;  %v1728_v62 = vrot.slane %v4266_v38, 2 }
 0x359   :  { %v1729_v47 = vrot.slane %v4260_v49, 2  ;;  %v1731_v50 = vrot.slane %v4263_v8, 2  ;;  %v1688_v51 = vrot.slane %v4266_v38, 1  ;;  %v1689_v61 = vrot.slane %v4260_v49, 1  ;;  %1568 = vmatpush.msrb.mxu1 %v4326_v39 }
 0x35a   :  { %v1691_v14 = vrot.slane %v4263_v8, 1  ;;  %v1666_v6 = vrot.slane %v1357_v22, 7  ;;  %v1668_v43 = vrot.slane %v1358_v44, 7  ;;  %v1771_v29 = vsel %vm331_vm1, %v1769_v35, %v1770_v52  ;;  %v4348_v44 = vld [vmem:[%s5384_s5 + $0x58] sm:$0xff] }
 0x35b   :  { %v1773_v19 = vsel %vm331_vm1, %v1770_v52, %v1772_v27  ;;  %v1730_v1 = vsel %vm249_vm3, %v1728_v62, %v1729_v47  ;;  %v1732_v12 = vsel %vm249_vm3, %v1729_v47, %v1731_v50  ;;  %v1690_v40 = vsel %vm168_vm2, %v1688_v51, %v1689_v61  ;;  %1569 = vmatpush.msrb.mxu1 %v4333_v33  ;;  %v4366_v62 = vld [vmem:[%s5384_s5 + $0x48] sm:$0xff]  ;;  %v4372_v47 = vld [vmem:[%s5384_s5 + $0x40] sm:$0xff] }
 0x35c   :  { %1527 = vrot.lane.b32.xlu2 %v1512_v42, %s3137_s3  ;;  %1486 = vrot.lane.b32.xlu1 %v1471_v37, %s3138_s4  ;;  %v1692_v15 = vsel %vm168_vm2, %v1689_v61, %v1691_v14  ;;  %v4289_v63 = vsel %vm116_vm0, %v1664_v11, %v1666_v6  ;;  %v4292_v42 = vsel %vm116_vm0, %v1666_v6, %v1668_v43  ;;  %v1780_v52 = vrot.slane %v4242_v10, 3  ;;  %v4381_v61 = vld [vmem:[%s5384_s5 + $0x38] sm:$0xff]  ;;  %v4390_v6 = vld [vmem:[%s5384_s5 + $0x30] sm:$0xff] }
 0x35d   :  { %1525 = vrot.lane.b32.xlu0 %v1510_v13, %s3137_s3  ;;  %v3028_v37 = vpack.i.bf16 %v1773_v19, %v1771_v29  ;;  %v3023_v0 = vpack.i.bf16 %v1732_v12, %v1730_v1  ;;  %v3018_v48 = vpack.i.bf16 %v1692_v15, %v1690_v40  ;;  %v1733_v58 = vrot.slane %v4289_v63, 2  ;;  %1570 = vmatpush.msrb.mxu1 %v4340_v36  ;;  %v4398_v19 = vld [vmem:[%s5384_s5 + $0x28] sm:$0xff]  ;;  %v4405_v12 = vld [vmem:[%s5384_s5 + $0x20] sm:$0xff] }
 0x35e   :  { %v1735_v56 = vrot.slane %v4292_v42, 2  ;;  %v1693_v13 = vrot.slane %v4289_v63, 1  ;;  %v1695_v46 = vrot.slane %v4292_v42, 1  ;;  %v1774_v21 = vrot.slane %v4289_v63, 3 }
 0x35f   :  { %v1734_v59 = vsel %vm249_vm3, %v1731_v50, %v1733_v58  ;;  %v1776_v7 = vrot.slane %v4292_v42, 3  ;;  %1571 = vmatpush.msrb.mxu1 %v4348_v44  ;;  %v1741_v29 = vrot.slane %v4230_v45, 2  ;;  %v1701_v1 = vrot.slane %v4230_v45, 1 }
 0x360   :  { %v1736_v54 = vsel %vm249_vm3, %v1733_v58, %v1735_v56  ;;  %v1694_v23 = vsel %vm168_vm2, %v1691_v14, %v1693_v13  ;;  %v1696_v34 = vsel %vm168_vm2, %v1693_v13, %v1695_v46  ;;  %v1775_v26 = vsel %vm331_vm1, %v1772_v27, %v1774_v21  ;;  %v4431_v13 = vld [vmem:[%s5384_s5 + $0x8] sm:$0xff] }
 0x361   :  { %v3038_v28 = vpack.i.bf16 %v1736_v54, %v1734_v59  ;;  %v1739_v27 = vrot.slane %v4242_v10, 2 }
 0x363   :  { %v1742_v15 = vsel %vm249_vm3, %v1739_v27, %v1741_v29 }
 0x364   :  { %1529 = vrot.lane.b32.xlu2 %v1514_v53, %s3137_s3  ;;  %1488 = vrot.lane.b32.xlu1 %v1473_v31, %s3138_s4  ;;  %v3033_v53 = vpack.i.bf16 %v1696_v34, %v1694_v23  ;;  %v1699_v31 = vrot.slane %v4242_v10, 1 }
 0x365   :  { %1446 = vrot.lane.b32.xlu0 %v1433_v32, %s3139_s25 }
 0x36c   :  { %1531 = vrot.lane.b32.xlu2 %v1516_v3, %s3137_s3  ;;  %1490 = vrot.lane.b32.xlu1 %v1475_v41, %s3138_s4  ;;  %v1777_v3 = vsel %vm331_vm1, %v1774_v21, %v1776_v7  ;;  %v4357_v41 = vld [vmem:[%s5384_s5 + $0x50] sm:$0xff]  ;;  %v4438_v21 = vld [vmem:[%s5384_s5] sm:$0xff] }
 0x36d   :  { %1448 = vrot.lane.b32.xlu0 %v1432_v2, %s3139_s25  ;;  %v4308_v2 = vsel %vm116_vm0, %v1668_v43, %v4226_v20  ;;  %1572 = vmatpush.msrb.mxu1 %v4357_v41  ;;  %v1782_v43 = vrot.slane %v4230_v45, 3 }
 0x36e   :  { %v1697_v9 = vrot.slane %v4308_v2, 1  ;;  %v1737_v20 = vrot.slane %v4308_v2, 2  ;;  %v1778_v35 = vrot.slane %v4308_v2, 3 }
 0x36f   :  { %1573 = vmatpush.msrb.mxu1 %v4366_v62  ;;  %v1783_v40 = vsel %vm331_vm1, %v1780_v52, %v1782_v43 }
 0x370   :  { %v1698_v11 = vsel %vm168_vm2, %v1695_v46, %v1697_v9  ;;  %v1700_v32 = vsel %vm168_vm2, %v1697_v9, %v1699_v31  ;;  %v1738_v24 = vsel %vm249_vm3, %v1735_v56, %v1737_v20  ;;  %v1781_v50 = vsel %vm331_vm1, %v1778_v35, %v1780_v52 }
 0x371   :  { %v3043_v22 = vpack.i.bf16 %v1700_v32, %v1698_v11  ;;  %v1740_v51 = vsel %vm249_vm3, %v1737_v20, %v1739_v27  ;;  %v1779_v14 = vsel %vm331_vm1, %v1776_v7, %v1778_v35  ;;  %1574 = vmatpush.msrb.mxu1 %v4372_v47 }
 0x373   :  { %1575 = vmatpush.msrb.mxu1 %v4381_v61 }
 0x374   :  { %3029 = vrot.lane.b32.xlu2 %v3028_v37, %s3137_s3  ;;  %3024 = vrot.lane.b32.xlu1 %v3023_v0, %s3138_s4  ;;  %v1686_v37 = vsel %vm116_vm0, %v4208_v55, 0.0  ;;  %v4416_v0 = vld [vmem:[%s5384_s5 + $0x18] sm:$0xff]  ;;  %v4426_v55 = vld [vmem:[%s5384_s5 + $0x10] sm:$0xff] }
 0x375   :  { %3019 = vrot.lane.b32.xlu0 %v3018_v48, %s3139_s25  ;;  %1576 = vmatpush.msrb.mxu1 %v4390_v6  ;;  %v1702_v48 = vsel %vm168_vm2, %v1699_v31, %v1701_v1  ;;  %v1784_v58 = vrot.slane %v1686_v37, 3  ;;  %v1743_v56 = vrot.slane %v1686_v37, 2 }
 0x377   :  { %1577 = vmatpush.msrb.mxu1 %v4398_v19  ;;  %v1785_v46 = vsel %vm331_vm1, %v1782_v43, %v1784_v58  ;;  %v1744_v59 = vsel %vm249_vm3, %v1741_v29, %v1743_v56 }
 0x379   :  { %1578 = vmatpush.msrb.mxu1 %v4405_v12 }
 0x37b   :  { %1579 = vmatpush.msrb.mxu1 %v4416_v0 }
 0x37c   :  { %1790 = vrot.lane.b32.xlu2 %v1775_v26, %s3137_s3  ;;  %3039 = vrot.lane.b32.xlu1 %v3038_v28, %s3138_s4 }
 0x37d   :  { %3034 = vrot.lane.b32.xlu0 %v3033_v53, %s3139_s25  ;;  %1580 = vmatpush.msrb.mxu1 %v4426_v55 }
 0x37f   :  { %1581 = vmatpush.msrb.mxu1 %v4431_v13 }
 0x381   :  { %1582 = vmatpush.msrb.mxu1 %v4438_v21 }
 0x384   :  { %1753 = vrot.lane.b32.xlu2 %v1738_v24, %s3138_s4  ;;  %3044 = vrot.lane.b32.xlu1 %v3043_v22, %s3139_s25 }
 0x385   :  { %1792 = vrot.lane.b32.xlu0 %v1777_v3, %s3137_s3 }
 0x38c   :  { %1796 = vrot.lane.b32.xlu2 %v1781_v50, %s3137_s3  ;;  %1755 = vrot.lane.b32.xlu1 %v1740_v51, %s3138_s4 }
 0x38d   :  { %1794 = vrot.lane.b32.xlu0 %v1779_v14, %s3137_s3 }
 0x394   :  { %1798 = vrot.lane.b32.xlu2 %v1783_v40, %s3137_s3  ;;  %1757 = vrot.lane.b32.xlu1 %v1742_v15, %s3138_s4 }
 0x395   :  { %1715 = vrot.lane.b32.xlu0 %v1702_v48, %s3139_s25 }
 0x39c   :  { %1800 = vrot.lane.b32.xlu2 %v1785_v46, %s3137_s3  ;;  %1759 = vrot.lane.b32.xlu1 %v1744_v59, %s3138_s4 }
 0x39d   :  { %1717 = vrot.lane.b32.xlu0 %v1701_v1, %s3139_s25 }
 0x39e   :  { %v3000_v23 = vpop.permute.xlu2 %2999 }
 0x39f   :  { %v3001_v53 = vunpack.i.l.bf16 %v3000_v23  ;;  %v3002_v3 = vunpack.i.h.bf16 %v3000_v23 }
 0x3a6   :  { %v1522_v14 = vpop.permute.xlu2 %1521 }
 0x3ae   :  { %v1485_v56 = vpop.permute.xlu2 %1484 }
 0x3b6   :  { %v2995_v54 = vpop.permute.xlu1 %2994 }
 0x3b7   :  { %v2996_v34 = vunpack.i.l.bf16 %v2995_v54  ;;  %v2990_v26 = vpop.permute.xlu0 %2989  ;;  %v2997_v32 = vunpack.i.h.bf16 %v2995_v54 }
 0x3b8   :  { %v2991_v28 = vunpack.i.l.bf16 %v2990_v26  ;;  %v2992_v9 = vunpack.i.h.bf16 %v2990_v26  ;;  %v1528_v26 = vpop.permute.xlu2 %1527 }
 0x3ba   :  { %v1541_v31 = vsel %vm1165_vm10, %v4134_v30, %v2991_v28  ;;  %v1542_v7 = vsel %vm1165_vm10, %v4128_v4, %v2992_v9 }
 0x3bb   :  { %v1550_v20 = vsel %vm1549_vm15, %v1541_v31, %v2996_v34  ;;  %v1551_v22 = vsel %vm1549_vm15, %v1542_v7, %v2997_v32 }
 0x3bc   :  { %v1559_v11 = vsel %vm1558_vm4, %v1550_v20, %v3001_v53  ;;  %v1560_v27 = vsel %vm1558_vm4, %v1551_v22, %v3002_v3 }
 0x3bd   :  { %1583 = vmatmul.f32.vlgmr.msrb.gmra.mxu1 %v1559_v11 }
 0x3be   :  { %v3010_v35 = vpop.permute.xlu1 %3009 }
 0x3bf   :  { %v3005_v24 = vpop.permute.xlu0 %3004  ;;  %v3011_v50 = vunpack.i.l.bf16 %v3010_v35  ;;  %v3012_v1 = vunpack.i.h.bf16 %v3010_v35 }
 0x3c0   :  { %v3006_v52 = vunpack.i.l.bf16 %v3005_v24  ;;  %v3007_v43 = vunpack.i.h.bf16 %v3005_v24  ;;  %v1530_v20 = vpop.permute.xlu2 %1529 }
 0x3c2   :  { %v1543_v30 = vsel %vm1165_vm10, %v4131_v60, %v3006_v52  ;;  %v1544_v15 = vsel %vm1165_vm10, %v4148_v57, %v3007_v43 }
 0x3c3   :  { %v1552_v51 = vsel %vm1549_vm15, %v1543_v30, %v3011_v50  ;;  %v1553_v37 = vsel %vm1549_vm15, %v1544_v15, %v3012_v1 }
 0x3c4   :  { %v1561_v29 = vsel %vm1558_vm4, %v1552_v51, %v1522_v14 }
 0x3c5   :  { %1586 = vmatmul.f32.gmra.mxu1 %v1560_v27 }
 0x3c6   :  { %v3015_v40 = vpop.permute.xlu1 %3014 }
 0x3c7   :  { %v1524_v4 = vpop.permute.xlu0 %1523  ;;  %v3016_v48 = vunpack.i.l.bf16 %v3015_v40  ;;  %v3017_v23 = vunpack.i.h.bf16 %v3015_v40 }
 0x3c8   :  { %v1562_v58 = vsel %vm1558_vm4, %v1553_v37, %v1524_v4  ;;  %v1532_v3 = vpop.permute.xlu2 %1531 }
 0x3c9   :  { %v1545_v46 = vsel %vm1165_vm10, %v4155_v18, %v3016_v48  ;;  %v1546_v57 = vsel %vm1165_vm10, %v4174_v5, %v3017_v23 }
 0x3ca   :  { %v1554_v54 = vsel %vm1549_vm15, %v1545_v46, %v1485_v56 }
 0x3cd   :  { %1589 = vmatmul.f32.gmra.mxu1 %v1561_v29  ;;  %v4492_v29 = vld [vmem:[%s5385_s6 + $0x8] sm:$0xff] }
 0x3ce   :  { %v1487_v59 = vpop.permute.xlu1 %1486 }
 0x3cf   :  { %v1526_v60 = vpop.permute.xlu0 %1525  ;;  %v1555_v28 = vsel %vm1549_vm15, %v1546_v57, %v1487_v59 }
 0x3d0   :  { %v1563_v34 = vsel %vm1558_vm4, %v1554_v54, %v1526_v60  ;;  %v1564_v31 = vsel %vm1558_vm4, %v1555_v28, %v1528_v26 }
 0x3d5   :  { %1592 = vmatmul.f32.gmra.mxu1 %v1562_v58 }
 0x3d6   :  { %v1489_v9 = vpop.permute.xlu1 %1488 }
 0x3d7   :  { %v1447_v53 = vpop.permute.xlu0 %1446 }
 0x3d8   :  { %v1547_v18 = vsel %vm1165_vm10, %v4177_v16, %v1447_v53 }
 0x3d9   :  { %v1556_v11 = vsel %vm1549_vm15, %v1547_v18, %v1489_v9 }
 0x3da   :  { %v1565_v7 = vsel %vm1558_vm4, %v1556_v11, %v1530_v20 }
 0x3dd   :  { %1595 = vmatmul.f32.gmra.mxu1 %v1563_v34 }
 0x3de   :  { %v1491_v24 = vpop.permute.xlu1 %1490 }
 0x3df   :  { %v1449_v32 = vpop.permute.xlu0 %1448 }
 0x3e0   :  { %v1548_v5 = vsel %vm1165_vm10, %v4223_v17, %v1449_v32  ;;  %v4482_v17 = vld [vmem:[%s5385_s6] sm:$0xff] }
 0x3e1   :  { %v1557_v22 = vsel %vm1549_vm15, %v1548_v5, %v1491_v24 }
 0x3e2   :  { %v1566_v35 = vsel %vm1558_vm4, %v1557_v22, %v1532_v3 }
 0x3e5   :  { %1598 = vmatmul.f32.gmra.mxu1 %v1564_v31 }
 0x3ed   :  { %1601 = vmatmul.f32.gmra.mxu1 %v1565_v7 }
 0x3f5   :  { %1604 = vmatmul.f32.gmra.mxu1 %v1566_v35 }
 0x43a   :  { %v1584_v52 = vpop.f32.mrf.mxu1 }
 0x442   :  { %v1587_v27 = vpop.f32.mrf.mxu1 }
 0x44a   :  { %v1590_v16 = vpop.f32.mrf.mxu1 }
 0x452   :  { %v1593_v50 = vpop.f32.mrf.mxu1 }
 0x45a   :  { %v1596_v30 = vpop.f32.mrf.mxu1 }
 0x462   :  { %v1599_v51 = vpop.f32.mrf.mxu1 }
 0x46a   :  { %v1602_v14 = vpop.f32.mrf.mxu1 }
 0x472   :  { %v1605_v43 = vpop.f32.mrf.mxu1 }
 0x473   :  { %2951 = vmatpush.msk.msrb.mxu3 %vm168_vm2, %v1605_v43 }
 0x475   :  { %1633 = vmatpush.msrb.mxu3 %v1602_v14 }
 0x477   :  { %1634 = vmatpush.msrb.mxu3 %v1599_v51 }
 0x479   :  { %1635 = vmatpush.msrb.mxu3 %v1596_v30 }
 0x47b   :  { %1636 = vmatpush.msrb.mxu3 %v1593_v50 }
 0x47d   :  { %1637 = vmatpush.msrb.mxu3 %v1590_v16 }
 0x47f   :  { %1638 = vmatpush.msrb.mxu3 %v1587_v27 }
 0x481   :  { %1639 = vmatpush.msrb.mxu3 %v1584_v52 }
 0x482   :  { %2952 = vmatmul.msk.f32.vlgmr.msrb.gmra.mxu3 %vm1608_vm5, %v4482_v17 }
 0x483   :  { %1834 = vmatpush.msra.mxu3 %v4319_v25  ;;  %v4503_v25 = vld [vmem:[%s5385_s6 + $0x10] sm:$0xff] }
 0x485   :  { %1835 = vmatpush.msra.mxu3 %v4326_v39  ;;  %v3020_v39 = vpop.permute.xlu0 %3019 }
 0x487   :  { %1836 = vmatpush.msra.mxu3 %v4333_v33  ;;  %v3025_v33 = vpop.permute.xlu1 %3024 }
 0x488   :  { %v3027_v4 = vunpack.i.h.bf16 %v3025_v33 }
 0x489   :  { %1837 = vmatpush.msra.mxu3 %v4340_v36  ;;  %v3021_v36 = vunpack.i.l.bf16 %v3020_v39 }
 0x48a   :  { %2953 = vmatmul.msk.f32.gmra.mxu3 %vm1608_vm5, %v4492_v29 }
 0x48b   :  { %1838 = vmatpush.msra.mxu3 %v4348_v44  ;;  %v4514_v44 = vld [vmem:[%s5385_s6 + $0x18] sm:$0xff]  ;;  %s2887_s6 = sshll.u32 %s5396_s17, 4  ;;  %s2888_s6 = int_to_ptr.hbm [resolvable:$true] %s2887_s6 }
 0x48d   :  { %1839 = vmatpush.msra.mxu3 %v4357_v41  ;;  %v3026_v41 = vunpack.i.l.bf16 %v3025_v33  ;;  %v3035_v1 = vpop.permute.xlu0 %3034 }
 0x48e   :  { %v3036_v15 = vunpack.i.l.bf16 %v3035_v1  ;;  %v3037_v56 = vunpack.i.h.bf16 %v3035_v1 }
 0x48f   :  { %1840 = vmatpush.msra.mxu3 %v4366_v62  ;;  %v1810_v62 = vsel %vm1165_vm10, %v4266_v38, %v3021_v36 }
 0x490   :  { %v1813_v54 = vsel %vm1165_vm10, %v4289_v63, %v3037_v56 }
 0x491   :  { %1841 = vmatpush.msra.mxu3 %v4372_v47  ;;  %v3030_v47 = vpop.permute.xlu2 %3029 }
 0x492   :  { %2954 = vmatmul.msk.f32.gmra.mxu3 %vm1608_vm5, %v4503_v25  ;;  %v3032_v40 = vunpack.i.h.bf16 %v3030_v47 }
 0x493   :  { %1842 = vmatpush.msra.mxu3 %v4381_v61  ;;  %v1818_v61 = vsel %vm1549_vm15, %v1810_v62, %v3026_v41 }
 0x495   :  { %1843 = vmatpush.msra.mxu3 %v4390_v6  ;;  %v3031_v6 = vunpack.i.l.bf16 %v3030_v47 }
 0x497   :  { %1844 = vmatpush.msra.mxu3 %v4398_v19  ;;  %v3022_v19 = vunpack.i.h.bf16 %v3020_v39 }
 0x499   :  { %1845 = vmatpush.msra.mxu3 %v4405_v12  ;;  %v1826_v12 = vsel %vm1558_vm4, %v1818_v61, %v3031_v6  ;;  %v1811_v38 = vsel %vm1165_vm10, %v4260_v49, %v3022_v19  ;;  %v1791_v58 = vpop.permute.xlu2 %1790  ;;  %v1793_v49 = vpop.permute.xlu0 %1792 }
 0x49a   :  { %2955 = vmatmul.msk.f32.gmra.mxu3 %vm1608_vm5, %v4514_v44 }
 0x49b   :  { %1846 = vmatpush.msra.mxu3 %v4416_v0  ;;  %v1819_v0 = vsel %vm1549_vm15, %v1811_v38, %v3027_v4 }
 0x49c   :  { %v1827_v37 = vsel %vm1558_vm4, %v1819_v0, %v3032_v40 }
 0x49d   :  { %1847 = vmatpush.msra.mxu3 %v4426_v55  ;;  %v3040_v55 = vpop.permute.xlu1 %3039 }
 0x49e   :  { %v3041_v48 = vunpack.i.l.bf16 %v3040_v55  ;;  %v3042_v46 = vunpack.i.h.bf16 %v3040_v55 }
 0x49f   :  { %1848 = vmatpush.msra.mxu3 %v4431_v13  ;;  %v1812_v13 = vsel %vm1165_vm10, %v4263_v8, %v3036_v15 }
 0x4a0   :  { %v1821_v23 = vsel %vm1549_vm15, %v1813_v54, %v3042_v46 }
 0x4a1   :  { %1849 = vmatpush.msra.mxu3 %v4438_v21  ;;  %v1820_v21 = vsel %vm1549_vm15, %v1812_v13, %v3041_v48  ;;  %v1829_v26 = vsel %vm1558_vm4, %v1821_v23, %v1793_v49  ;;  %v1754_v57 = vpop.permute.xlu2 %1753  ;;  %v1795_v8 = vpop.permute.xlu0 %1794 }
 0x4a2   :  { %1850 = vmatmul.f32.vlgmr.msra.gmra.mxu3 %v1826_v12  ;;  %v1828_v60 = vsel %vm1558_vm4, %v1820_v21, %v1791_v58  ;;  %v3140_v12 = vmov 64.0  }
 0x4a3   :  { %3095 = vrcp.f32 %v3140_v12 }
 0x4a5   :  { %v3045_v59 = vpop.permute.xlu1 %3044 }
 0x4a6   :  { %v3046_v34 = vunpack.i.l.bf16 %v3045_v59  ;;  %v3047_v31 = vunpack.i.h.bf16 %v3045_v59 }
 0x4a8   :  { %v1814_v28 = vsel %vm1165_vm10, %v4292_v42, %v3046_v34  ;;  %v1815_v63 = vsel %vm1165_vm10, %v4308_v2, %v3047_v31 }
 0x4a9   :  { %v1822_v9 = vsel %vm1549_vm15, %v1814_v28, %v1754_v57  ;;  %v1797_v20 = vpop.permute.xlu2 %1796  ;;  %v1716_v32 = vpop.permute.xlu0 %1715 }
 0x4aa   :  { %1853 = vmatmul.f32.gmra.mxu3 %v1827_v37  ;;  %v1830_v18 = vsel %vm1558_vm4, %v1822_v9, %v1795_v8  ;;  %v1816_v42 = vsel %vm1165_vm10, %v4242_v10, %v1716_v32  ;;  %v3096_v40 = vpop.eup %3095 }
 0x4ab   :  { %v1929_v48 = vmul.f32 64.0, %v3096_v40  ;;  %vm1933_vm6 = vweird.f32 %v3096_v40 }
 0x4ad   :  { %v1756_v53 = vpop.permute.xlu1 %1755 }
 0x4ae   :  { %v1823_v11 = vsel %vm1549_vm15, %v1815_v63, %v1756_v53 }
 0x4af   :  { %v1831_v24 = vsel %vm1558_vm4, %v1823_v11, %v1797_v20 }
 0x4b1   :  { %v1799_v5 = vpop.permute.xlu2 %1798  ;;  %v1718_v3 = vpop.permute.xlu0 %1717 }
 0x4b2   :  { %1856 = vmatmul.f32.gmra.mxu3 %v1828_v60  ;;  %v1817_v2 = vsel %vm1165_vm10, %v4230_v45, %v1718_v3  ;;  %v1930_v60 = vsub.f32 1.0, %v1929_v48  ;;  %vm2198_vm10 = vcmask 252928  }
 0x4b4   :  { %v1931_v59 = vmul.f32 %v3096_v40, %v1930_v60 }
 0x4b5   :  { %v1758_v7 = vpop.permute.xlu1 %1757 }
 0x4b6   :  { %v1824_v22 = vsel %vm1549_vm15, %v1816_v42, %v1758_v7  ;;  %v1932_v34 = vadd.f32 %v3096_v40, %v1931_v59 }
 0x4b7   :  { %v1832_v35 = vsel %vm1558_vm4, %v1824_v22, %v1799_v5 }
 0x4b8   :  { %v1934_v8 = vsel %vm1933_vm6, %v3096_v40, %v1932_v34 }
 0x4b9   :  { %v1801_v16 = vpop.permute.xlu2 %1800 }
 0x4ba   :  { %1859 = vmatmul.f32.gmra.mxu3 %v1829_v26 }
 0x4bd   :  { %v1760_v52 = vpop.permute.xlu1 %1759 }
 0x4be   :  { %v1825_v27 = vsel %vm1549_vm15, %v1817_v2, %v1760_v52 }
 0x4bf   :  { %v1833_v50 = vsel %vm1558_vm4, %v1825_v27, %v1801_v16 }
 0x4c2   :  { %1862 = vmatmul.f32.gmra.mxu3 %v1830_v18 }
 0x4ca   :  { %1865 = vmatmul.f32.gmra.mxu3 %v1831_v24 }
 0x4d2   :  { %1868 = vmatmul.f32.gmra.mxu3 %v1832_v35 }
 0x4da   :  { %1871 = vmatmul.f32.gmra.mxu3 %v1833_v50 }
 0x505   :  { %v1641_v30 = vpop.f32.mrf.mxu3 }
 0x506   :  { %v1907_v4 = vsel %vm1549_vm15, %v1641_v30, 0.0 }
 0x50d   :  { %v1644_v51 = vpop.f32.mrf.mxu3 }
 0x50e   :  { %v1908_v19 = vsel %vm1549_vm15, %v1644_v51, 0.0 }
 0x515   :  { %v1647_v10 = vpop.f32.mrf.mxu3 }
 0x516   :  { %v1910_v38 = vsel %vm1549_vm15, %v1647_v10, 0.0 }
 0x51d   :  { %v1650_v14 = vpop.f32.mrf.mxu3 }
 0x51e   :  { %v1912_v1 = vsel %vm1549_vm15, %v1650_v14, 0.0 }
 0x525   :  { %v1851_v43 = vpop.f32.mrf.mxu3 }
 0x52d   :  { %v1854_v39 = vpop.f32.mrf.mxu3 }
 0x535   :  { %v1857_v33 = vpop.f32.mrf.mxu3 }
 0x53d   :  { %v1860_v36 = vpop.f32.mrf.mxu3 }
 0x545   :  { %v1863_v41 = vpop.f32.mrf.mxu3 }
 0x54d   :  { %v1866_v62 = vpop.f32.mrf.mxu3 }
 0x555   :  { %v1869_v47 = vpop.f32.mrf.mxu3 }
 0x55d   :  { %v1872_v61 = vpop.f32.mrf.mxu3 }
 0x55e   :  { %2956 = vmatpush.msk.msrb.mxu0 %vm168_vm2, %v1872_v61 }
 0x560   :  { %1887 = vmatpush.msrb.mxu0 %v1869_v47 }
 0x562   :  { %1888 = vmatpush.msrb.mxu0 %v1866_v62 }
 0x564   :  { %1889 = vmatpush.msrb.mxu0 %v1863_v41 }
 0x566   :  { %1890 = vmatpush.msrb.mxu0 %v1860_v36 }
 0x568   :  { %1891 = vmatpush.msrb.mxu0 %v1857_v33 }
 0x56a   :  { %1892 = vmatpush.msrb.mxu0 %v1854_v39 }
 0x56c   :  { %1893 = vmatpush.msrb.mxu0 %v1851_v43 }
 0x56d   :  { %2957 = vmatmul.msk.f32.vlgmr.msrb.gmra.mxu0 %vm1608_vm5, %v4482_v17  ;;  %v1909_v17 = vadd.f32 %v1908_v19, %v1907_v4 }
 0x575   :  { %2958 = vmatmul.msk.f32.gmra.mxu0 %vm1608_vm5, %v4492_v29  ;;  %v1911_v29 = vadd.f32 %v1910_v38, %v1909_v17 }
 0x577   :  { %v1913_v55 = vadd.f32 %v1912_v1, %v1911_v29 }
 0x57d   :  { %2959 = vmatmul.msk.f32.gmra.mxu0 %vm1608_vm5, %v4503_v25 }
 0x585   :  { %2960 = vmatmul.msk.f32.gmra.mxu0 %vm1608_vm5, %v4514_v44 }
 0x5ea   :  { %v1895_v45 = vpop.f32.mrf.mxu0 }
 0x5eb   :  { %v1914_v25 = vsel %vm1549_vm15, %v1895_v45, 0.0 }
 0x5ec   :  { %v1915_v15 = vadd.f32 %v1914_v25, %v1913_v55 }
 0x5f2   :  { %v1898_v6 = vpop.f32.mrf.mxu0 }
 0x5f3   :  { %v1916_v44 = vsel %vm1549_vm15, %v1898_v6, 0.0 }
 0x5f4   :  { %v1917_v13 = vadd.f32 %v1916_v44, %v1915_v15  ;;  %v3085_v15 = vld [vmem:[%s5386_s7] ss:$0 sm:$0xff] }
 0x5fa   :  { %v1901_v0 = vpop.f32.mrf.mxu0 }
 0x5fb   :  { %v1918_v37 = vsel %vm1549_vm15, %v1901_v0, 0.0 }
 0x5fc   :  { %v1919_v21 = vadd.f32 %v1918_v37, %v1917_v13 }
 0x602   :  { %v1904_v58 = vpop.f32.mrf.mxu0 }
 0x603   :  { %v1920_v56 = vsel %vm1549_vm15, %v1904_v58, 0.0 }
 0x604   :  { %v1921_v49 = vadd.f32 %v1920_v56, %v1919_v21  ;;  %v3086_v56 = vld [vmem:[%s5387_s8] ss:$0 sm:$0xff] }
 0x606   :  { %v1922_v46 = vrot.slane %v1921_v49, 4 }
 0x608   :  { %v1923_v54 = vadd.f32 %v1922_v46, %v1921_v49 }
 0x60a   :  { %v1924_v23 = vrot.slane %v1923_v54, 2 }
 0x60c   :  { %v1925_v26 = vadd.f32 %v1924_v23, %v1923_v54 }
 0x60e   :  { %v1926_v57 = vrot.slane %v1925_v26, 1 }
 0x610   :  { %v1927_v28 = vadd.f32 %v1926_v57, %v1925_v26  ;;  %v4589_v57 = vld [vmem:[%s5388_s9 + $0x78] sm:$0xff] }
 0x611   :  { %2140 = vmatpush.msrb.mxu2 %v4589_v57 }
 0x612   :  { %v1935_v53 = vmul.f32 %v1934_v8, %v1927_v28 }
 0x614   :  { %v1936_v9 = vsub.f32 %v1641_v30, %v1935_v53  ;;  %v1937_v31 = vsub.f32 %v1644_v51, %v1935_v53  ;;  %v1938_v18 = vsub.f32 %v1647_v10, %v1935_v53  ;;  %v1939_v20 = vsub.f32 %v1650_v14, %v1935_v53 }
 0x615   :  { %v1940_v63 = vsub.f32 %v1895_v45, %v1935_v53  ;;  %v1941_v24 = vsub.f32 %v1898_v6, %v1935_v53  ;;  %v1942_v35 = vsub.f32 %v1901_v0, %v1935_v53  ;;  %v1943_v16 = vsub.f32 %v1904_v58, %v1935_v53 }
 0x616   :  { %v1944_v11 = vmul.f32 %v1936_v9, %v1936_v9  ;;  %v1945_v32 = vmul.f32 %v1937_v31, %v1937_v31  ;;  %v1946_v7 = vmul.f32 %v1938_v18, %v1938_v18  ;;  %v1947_v42 = vmul.f32 %v1939_v20, %v1939_v20 }
 0x617   :  { %v1948_v52 = vmul.f32 %v1940_v63, %v1940_v63  ;;  %v1949_v50 = vmul.f32 %v1941_v24, %v1941_v24  ;;  %v1950_v10 = vmul.f32 %v1942_v35, %v1942_v35  ;;  %v1951_v39 = vmul.f32 %v1943_v16, %v1943_v16 }
 0x618   :  { %v1952_v5 = vsel %vm1549_vm15, %v1944_v11, 0.0  ;;  %v1953_v22 = vsel %vm1549_vm15, %v1945_v32, 0.0  ;;  %v1955_v2 = vsel %vm1549_vm15, %v1946_v7, 0.0  ;;  %v1957_v30 = vsel %vm1549_vm15, %v1947_v42, 0.0 }
 0x619   :  { %v1954_v3 = vadd.f32 %v1953_v22, %v1952_v5  ;;  %v1959_v14 = vsel %vm1549_vm15, %v1948_v52, 0.0  ;;  %v1961_v33 = vsel %vm1549_vm15, %v1949_v50, 0.0  ;;  %v1963_v41 = vsel %vm1549_vm15, %v1950_v10, 0.0 }
 0x61a   :  { %v1965_v47 = vsel %vm1549_vm15, %v1951_v39, 0.0 }
 0x61b   :  { %v1956_v27 = vadd.f32 %v1955_v2, %v1954_v3 }
 0x61d   :  { %v1958_v51 = vadd.f32 %v1957_v30, %v1956_v27 }
 0x61f   :  { %v1960_v43 = vadd.f32 %v1959_v14, %v1958_v51 }
 0x621   :  { %v1962_v36 = vadd.f32 %v1961_v33, %v1960_v43 }
 0x623   :  { %v1964_v62 = vadd.f32 %v1963_v41, %v1962_v36 }
 0x625   :  { %v1966_v61 = vadd.f32 %v1965_v47, %v1964_v62 }
 0x627   :  { %v1967_v45 = vrot.slane %v1966_v61, 4 }
 0x629   :  { %v1968_v6 = vadd.f32 %v1967_v45, %v1966_v61 }
 0x62b   :  { %v1969_v19 = vrot.slane %v1968_v6, 2 }
 0x62d   :  { %v1970_v12 = vadd.f32 %v1969_v19, %v1968_v6 }
 0x62f   :  { %v1971_v4 = vrot.slane %v1970_v12, 1 }
 0x631   :  { %v1972_v38 = vadd.f32 %v1971_v4, %v1970_v12 }
 0x633   :  { %v1973_v17 = vmul.f32 %v1972_v38, %v1934_v8  ;;  %v4594_v8 = vld [vmem:[%s5388_s9 + $0x70] sm:$0xff] }
 0x634   :  { %2141 = vmatpush.msrb.mxu2 %v4594_v8 }
 0x635   :  { %v1974_v1 = vadd.f32 1e-05, %v1973_v17 }
 0x637   :  { %3097 = vrsqrt.f32 %v1974_v1  ;;  %vm1981_vm8 = vweird.f32 %v1974_v1 }
 0x63d   :  { %v3098_v29 = vpop.eup %3097 }
 0x63e   :  { %v1976_v0 = vmul.f32 %v3098_v29, %v1974_v1  ;;  %vm1982_vm7 = vweird.f32 %v3098_v29 }
 0x63f   :  { %vm1983_vm9 = vmor %vm1981_vm8, %vm1982_vm7 }
 0x640   :  { %v1977_v25 = vmul.f32 %v3098_v29, %v1976_v0 }
 0x642   :  { %v1978_v40 = vmul.f32 0.5, %v1977_v25 }
 0x644   :  { %v1979_v55 = vsub.f32 1.5, %v1978_v40 }
 0x646   :  { %v1980_v44 = vmul.f32 %v3098_v29, %v1979_v55 }
 0x648   :  { %v1984_v37 = vsel %vm1983_vm9, %v3098_v29, %v1980_v44 }
 0x649   :  { %v1988_v48 = vmul.f32 %v1984_v37, %v1939_v20  ;;  %v1989_v13 = vmul.f32 %v1984_v37, %v1940_v63  ;;  %v1990_v21 = vmul.f32 %v1984_v37, %v1941_v24  ;;  %v1991_v58 = vmul.f32 %v1984_v37, %v1942_v35  ;;  %v4610_v24 = vld [vmem:[%s5388_s9 + $0x68] sm:$0xff] }
 0x64a   :  { %v1992_v60 = vmul.f32 %v1984_v37, %v1943_v16  ;;  %v1985_v49 = vmul.f32 %v1984_v37, %v1936_v9  ;;  %v1986_v46 = vmul.f32 %v1984_v37, %v1937_v31  ;;  %v1987_v59 = vmul.f32 %v1984_v37, %v1938_v18  ;;  %v4600_v31 = vld [vmem:[%s5388_s9 + $0xf8] sm:$0xff]  ;;  %v4605_v18 = vld [vmem:[%s5388_s9 + $0xf0] sm:$0xff]  ;;  %v4617_v16 = vld [vmem:[%s5388_s9 + $0x60] sm:$0xff]  ;;  %2142 = vmatpush.msrb.mxu2 %v4610_v24 }
 0x64b   :  { %v2001_v54 = vmul.f32 %v3085_v15, %v1990_v21  ;;  %v2002_v23 = vmul.f32 %v3085_v15, %v1991_v58  ;;  %v1999_v34 = vmul.f32 %v3085_v15, %v1988_v48  ;;  %v2000_v26 = vmul.f32 %v3085_v15, %v1989_v13  ;;  %2169 = vmatpush.msra.mxu1 %v4600_v31 }
 0x64c   :  { %v2003_v28 = vmul.f32 %v3085_v15, %v1992_v60  ;;  %v1996_v53 = vmul.f32 %v3085_v15, %v1985_v49  ;;  %v1997_v20 = vmul.f32 %v3085_v15, %v1986_v46  ;;  %v1998_v9 = vmul.f32 %v3085_v15, %v1987_v59  ;;  %2143 = vmatpush.msrb.mxu2 %v4617_v16 }
 0x64d   :  { %v2013_v63 = vadd.f32 %v3086_v56, %v2002_v23  ;;  %v2010_v11 = vadd.f32 %v3086_v56, %v1999_v34  ;;  %v2011_v32 = vadd.f32 %v3086_v56, %v2000_v26  ;;  %v2012_v7 = vadd.f32 %v3086_v56, %v2001_v54  ;;  %2170 = vmatpush.msra.mxu1 %v4605_v18 }
 0x64e   :  { %v2014_v42 = vadd.f32 %v3086_v56, %v2003_v28  ;;  %v2007_v5 = vadd.f32 %v3086_v56, %v1996_v53  ;;  %v2008_v22 = vadd.f32 %v3086_v56, %v1997_v20  ;;  %v2009_v3 = vadd.f32 %v3086_v56, %v1998_v9 }
 0x64f   :  { %v2021_v35 = vmax.f32 %v2013_v63, 0.0  ;;  %v2018_v52 = vmax.f32 %v2010_v11, 0.0  ;;  %v2019_v2 = vmax.f32 %v2011_v32, 0.0  ;;  %v2020_v27 = vmax.f32 %v2012_v7, 0.0 }
 0x650   :  { %v2015_v50 = vmax.f32 %v2007_v5, 0.0  ;;  %v2016_v30 = vmax.f32 %v2008_v22, 0.0  ;;  %v2017_v51 = vmax.f32 %v2009_v3, 0.0  ;;  %v2022_v62 = vmax.f32 %v2014_v42, 0.0 }
 0x651   :  { %v2238_v10 = vrot.slane %v2021_v35, 7  ;;  %v2068_v14 = vrot.slane %v2018_v52, 7  ;;  %v2235_v43 = vrot.slane %v2019_v2, 7  ;;  %v2236_v39 = vrot.slane %v2020_v27, 7 }
 0x652   :  { %v2063_v33 = vrot.slane %v2015_v50, 7  ;;  %v2064_v36 = vrot.slane %v2016_v30, 7  ;;  %v2066_v41 = vrot.slane %v2017_v51, 7  ;;  %v2240_v48 = vrot.slane %v2022_v62, 7  ;;  %v2049_v62 = vld [vmem:[%s5388_s9 + $0xd0] sm:$0xff] }
 0x653   :  { %v4623_v47 = vsel %vm116_vm0, %v2235_v43, %v2236_v39  ;;  %v4626_v61 = vsel %vm116_vm0, %v2236_v39, %v2238_v10  ;;  %v4638_v12 = vsel %vm116_vm0, 0.0, %v2235_v43  ;;  %v4654_v37 = vsel %vm116_vm0, %v2068_v14, 0.0  ;;  %v2033_v43 = vld [vmem:[%s5388_s9 + $0x50] sm:$0xff]  ;;  %v2051_v39 = vld [vmem:[%s5388_s9 + $0xe0] sm:$0xff] }
 0x654   :  { %v4629_v45 = vsel %vm116_vm0, %v2063_v33, %v2064_v36  ;;  %v4632_v6 = vsel %vm116_vm0, 0.0, %v2063_v33  ;;  %v4635_v19 = vsel %vm116_vm0, %v2064_v36, %v2066_v41  ;;  %v4643_v17 = vsel %vm116_vm0, %v2066_v41, %v2068_v14  ;;  %v2052_v14 = vld [vmem:[%s5388_s9 + $0xe8] sm:$0xff]  ;;  %v2050_v36 = vld [vmem:[%s5388_s9 + $0xd8] sm:$0xff]  ;;  %v2031_v41 = vld [vmem:[%s5388_s9 + $0x40] sm:$0xff] }
 0x655   :  { %v2078_v4 = vrot.slane %v4632_v6, 1  ;;  %v2079_v38 = vrot.slane %v4629_v45, 1  ;;  %v2081_v1 = vrot.slane %v4635_v19, 1  ;;  %v2083_v29 = vrot.slane %v4643_v17, 1  ;;  %2171 = vmatpush.msra.mxu1 %v2052_v14  ;;  %v2032_v33 = vld [vmem:[%s5388_s9 + $0x48] sm:$0xff] }
 0x656   :  { %v2112_v0 = vrot.slane %v4629_v45, 3  ;;  %v2114_v25 = vrot.slane %v4635_v19, 3  ;;  %v2111_v40 = vrot.slane %v4632_v6, 3  ;;  %v2116_v15 = vrot.slane %v4643_v17, 3 }
 0x657   :  { %v2080_v55 = vsel %vm168_vm2, %v2078_v4, %v2079_v38  ;;  %v2082_v44 = vsel %vm168_vm2, %v2079_v38, %v2081_v1  ;;  %v2084_v13 = vsel %vm168_vm2, %v2081_v1, %v2083_v29  ;;  %v2251_v49 = vrot.slane %v4623_v47, 1  ;;  %2172 = vmatpush.msra.mxu1 %v2051_v39  ;;  %v2030_v4 = vld [vmem:[%s5388_s9 + $0x38] sm:$0xff]  ;;  %v2048_v38 = vld [vmem:[%s5388_s9 + $0xc8] sm:$0xff]  ;;  %v2029_v1 = vld [vmem:[%s5388_s9 + $0x30] sm:$0xff] }
 0x658   :  { %2085 = vrot.lane.b32.xlu0 %v2080_v55, %s3138_s4  ;;  %v2115_v21 = vsel %vm331_vm1, %v2112_v0, %v2114_v25  ;;  %v2113_v58 = vsel %vm331_vm1, %v2111_v40, %v2112_v0  ;;  %v2253_v46 = vrot.slane %v4626_v61, 1  ;;  %v2117_v59 = vsel %vm331_vm1, %v2114_v25, %v2116_v15  ;;  %v2028_v0 = vld [vmem:[%s5388_s9 + $0x28] sm:$0xff]  ;;  %v2046_v25 = vld [vmem:[%s5388_s9 + $0xb8] sm:$0xff]  ;;  %v2027_v40 = vld [vmem:[%s5388_s9 + $0x20] sm:$0xff] }
 0x659   :  { %v3053_v56 = vpack.i.bf16 %v2084_v13, %v2115_v21  ;;  %v3048_v60 = vpack.i.bf16 %v2082_v44, %v2113_v58  ;;  %v2283_v54 = vrot.slane %v4638_v12, 3  ;;  %v2284_v23 = vrot.slane %v4623_v47, 3  ;;  %2173 = vmatpush.msra.mxu1 %v2050_v36  ;;  %v2045_v55 = vld [vmem:[%s5388_s9 + $0xb0] sm:$0xff]  ;;  %v2026_v44 = vld [vmem:[%s5388_s9 + $0x18] sm:$0xff]  ;;  %v2043_v13 = vld [vmem:[%s5388_s9 + $0xa0] sm:$0xff] }
 0x65a   :  { %v2118_v34 = vrot.slane %v4654_v37, 3  ;;  %v2250_v26 = vrot.slane %v4638_v12, 1  ;;  %v4670_v28 = vsel %vm116_vm0, %v2238_v10, %v2240_v48  ;;  %v3058_v53 = vpack.i.bf16 %v2083_v29, %v2117_v59  ;;  %v2034_v10 = vld [vmem:[%s5388_s9 + $0x58] sm:$0xff]  ;;  %v2047_v29 = vld [vmem:[%s5388_s9 + $0xc0] sm:$0xff]  ;;  %v2024_v21 = vld [vmem:[%s5388_s9 + $0x8] sm:$0xff] }
 0x65b   :  { %3054 = vrot.lane.b32.xlu2 %v3053_v56, %s3138_s4  ;;  %3049 = vrot.lane.b32.xlu1 %v3048_v60, %s3138_s4  ;;  %v2254_v20 = vsel %vm168_vm2, %v2251_v49, %v2253_v46  ;;  %v2285_v9 = vsel %vm331_vm1, %v2283_v54, %v2284_v23  ;;  %v2255_v32 = vrot.slane %v4670_v28, 1  ;;  %v2286_v7 = vrot.slane %v4626_v61, 3  ;;  %v2042_v58 = vld [vmem:[%s5388_s9 + $0x98] sm:$0xff]  ;;  %v2023_v56 = vld [vmem:[%s5388_s9] sm:$0xff] }
 0x65c   :  { %v2119_v63 = vsel %vm331_vm1, %v2116_v15, %v2118_v34  ;;  %v2252_v11 = vsel %vm168_vm2, %v2250_v26, %v2251_v49  ;;  %v3068_v42 = vpack.i.bf16 %v2254_v20, %v2285_v9  ;;  %v2288_v22 = vrot.slane %v4670_v28, 3  ;;  %2144 = vmatpush.msrb.mxu2 %v2034_v10  ;;  %2174 = vmatpush.msra.mxu1 %v2049_v62  ;;  %v2044_v15 = vld [vmem:[%s5388_s9 + $0xa8] sm:$0xff]  ;;  %v2041_v60 = vld [vmem:[%s5388_s9 + $0x90] sm:$0xff] }
 0x65d   :  { %v3063_v5 = vpack.i.bf16 %v2252_v11, %v2119_v63  ;;  %v2256_v3 = vsel %vm168_vm2, %v2253_v46, %v2255_v32  ;;  %v2287_v35 = vsel %vm331_vm1, %v2284_v23, %v2286_v7  ;;  %v4685_v52 = vsel %vm116_vm0, %v2240_v48, 0.0  ;;  %v2025_v48 = vld [vmem:[%s5388_s9 + $0x10] sm:$0xff]  ;;  %v2040_v49 = vld [vmem:[%s5388_s9 + $0x88] sm:$0xff]  ;;  %v2039_v46 = vld [vmem:[%s5388_s9 + $0x80] sm:$0xff] }
 0x65e   :  { %v3073_v2 = vpack.i.bf16 %v2256_v3, %v2287_v35  ;;  %v2290_v27 = vrot.slane %v4685_v52, 3  ;;  %v2289_v50 = vsel %vm331_vm1, %v2286_v7, %v2288_v22  ;;  %2145 = vmatpush.msrb.mxu2 %v2033_v43  ;;  %2175 = vmatpush.msra.mxu1 %v2048_v38  ;;  %v2103_v7 = vrot.slane %v4643_v17, 2 }
 0x65f   :  { %v3078_v30 = vpack.i.bf16 %v2255_v32, %v2289_v50 }
 0x660   :  { %3059 = vrot.lane.b32.xlu0 %v3058_v53, %s3138_s4  ;;  %v2291_v51 = vsel %vm331_vm1, %v2288_v22, %v2290_v27  ;;  %2146 = vmatpush.msrb.mxu2 %v2032_v33 }
 0x661   :  { %2176 = vmatpush.msra.mxu1 %v2047_v29 }
 0x662   :  { %2147 = vmatpush.msrb.mxu2 %v2031_v41 }
 0x663   :  { %3069 = vrot.lane.b32.xlu2 %v3068_v42, %s3138_s4  ;;  %3064 = vrot.lane.b32.xlu1 %v3063_v5, %s3138_s4 }
 0x664   :  { %2148 = vmatpush.msrb.mxu2 %v2030_v4  ;;  %2177 = vmatpush.msra.mxu1 %v2046_v25 }
 0x666   :  { %2149 = vmatpush.msrb.mxu2 %v2029_v1  ;;  %2178 = vmatpush.msra.mxu1 %v2045_v55 }
 0x668   :  { %3074 = vrot.lane.b32.xlu0 %v3073_v2, %s3138_s4  ;;  %2150 = vmatpush.msrb.mxu2 %v2028_v0  ;;  %v2105_v2 = vrot.slane %v4654_v37, 2 }
 0x669   :  { %2179 = vmatpush.msra.mxu1 %v2044_v15 }
 0x66a   :  { %2151 = vmatpush.msrb.mxu2 %v2027_v40 }
 0x66b   :  { %2298 = vrot.lane.b32.xlu2 %v2291_v51, %s3138_s4  ;;  %3079 = vrot.lane.b32.xlu1 %v3078_v30, %s3138_s4 }
 0x66c   :  { %2152 = vmatpush.msrb.mxu2 %v2026_v44  ;;  %2180 = vmatpush.msra.mxu1 %v2043_v13 }
 0x66e   :  { %2153 = vmatpush.msrb.mxu2 %v2025_v48  ;;  %2181 = vmatpush.msra.mxu1 %v2042_v58 }
 0x670   :  { %2154 = vmatpush.msrb.mxu2 %v2024_v21  ;;  %2182 = vmatpush.msra.mxu1 %v2041_v60 }
 0x672   :  { %2155 = vmatpush.msrb.mxu2 %v2023_v56  ;;  %2183 = vmatpush.msra.mxu1 %v2040_v49 }
 0x674   :  { %2312 = vmatpush.msra.mxu2 %v4589_v57  ;;  %2184 = vmatpush.msra.mxu1 %v2039_v46 }
 0x676   :  { %2313 = vmatpush.msra.mxu2 %v4594_v8  ;;  %2341 = vmatpush.msrb.mxu1 %v4600_v31  ;;  %v2098_v31 = vrot.slane %v4632_v6, 2 }
 0x678   :  { %2314 = vmatpush.msra.mxu2 %v4610_v24  ;;  %2342 = vmatpush.msrb.mxu1 %v4605_v18  ;;  %v2099_v18 = vrot.slane %v4629_v45, 2 }
 0x67a   :  { %2315 = vmatpush.msra.mxu2 %v4617_v16  ;;  %2343 = vmatpush.msrb.mxu1 %v2052_v14  ;;  %v2100_v54 = vsel %vm249_vm3, %v2098_v31, %v2099_v18  ;;  %v2270_v14 = vrot.slane %v4638_v12, 2 }
 0x67c   :  { %2316 = vmatpush.msra.mxu2 %v2034_v10  ;;  %2344 = vmatpush.msrb.mxu1 %v2051_v39 }
 0x67e   :  { %2317 = vmatpush.msra.mxu2 %v2033_v43  ;;  %2345 = vmatpush.msrb.mxu1 %v2050_v36  ;;  %v2271_v43 = vrot.slane %v4623_v47, 2 }
 0x680   :  { %2318 = vmatpush.msra.mxu2 %v2032_v33  ;;  %2346 = vmatpush.msrb.mxu1 %v2049_v62  ;;  %v2272_v37 = vsel %vm249_vm3, %v2270_v14, %v2271_v43  ;;  %v2273_v62 = vrot.slane %v4626_v61, 2 }
 0x682   :  { %2319 = vmatpush.msra.mxu2 %v2031_v41  ;;  %2347 = vmatpush.msrb.mxu1 %v2048_v38 }
 0x684   :  { %2320 = vmatpush.msra.mxu2 %v2030_v4  ;;  %2348 = vmatpush.msrb.mxu1 %v2047_v29 }
 0x686   :  { %2321 = vmatpush.msra.mxu2 %v2029_v1  ;;  %2349 = vmatpush.msrb.mxu1 %v2046_v25  ;;  %v2275_v25 = vrot.slane %v4670_v28, 2 }
 0x688   :  { %2322 = vmatpush.msra.mxu2 %v2028_v0  ;;  %2350 = vmatpush.msrb.mxu1 %v2045_v55 }
 0x68a   :  { %2323 = vmatpush.msra.mxu2 %v2027_v40  ;;  %2351 = vmatpush.msrb.mxu1 %v2044_v15 }
 0x68c   :  { %2324 = vmatpush.msra.mxu2 %v2026_v44  ;;  %2352 = vmatpush.msrb.mxu1 %v2043_v13 }
 0x68e   :  { %2325 = vmatpush.msra.mxu2 %v2025_v48  ;;  %2353 = vmatpush.msrb.mxu1 %v2042_v58  ;;  %v2277_v48 = vrot.slane %v4685_v52, 2 }
 0x690   :  { %2326 = vmatpush.msra.mxu2 %v2024_v21  ;;  %2354 = vmatpush.msrb.mxu1 %v2041_v60  ;;  %v2278_v21 = vsel %vm249_vm3, %v2275_v25, %v2277_v48 }
 0x692   :  { %2327 = vmatpush.msra.mxu2 %v2023_v56  ;;  %2355 = vmatpush.msrb.mxu1 %v2040_v49 }
 0x694   :  { %2356 = vmatpush.msrb.mxu1 %v2039_v46 }
 0x6b5   :  { %v3055_v34 = vpop.permute.xlu2 %3054 }
 0x6b6   :  { %v3056_v53 = vunpack.i.l.bf16 %v3055_v34  ;;  %v3057_v20 = vunpack.i.h.bf16 %v3055_v34  ;;  %v2056_v34 = vld [vmem:[%s5389_s10 + $0x8] sm:$0xff] }
 0x6b8   :  { %v2134_v32 = vsel %vm1549_vm15, %v4635_v19, %v3057_v20 }
 0x6bd   :  { %v3070_v51 = vpop.permute.xlu2 %3069 }
 0x6be   :  { %v3071_v39 = vunpack.i.l.bf16 %v3070_v51 }
 0x6c0   :  { %v2308_v33 = vsel %vm1549_vm15, %v2272_v37, %v3071_v39 }
 0x6c5   :  { %v2299_v13 = vpop.permute.xlu2 %2298 }
 0x6ca   :  { %v2086_v57 = vpop.permute.xlu0 %2085 }
 0x6cb   :  { %v2132_v8 = vsel %vm1549_vm15, %v4632_v6, %v2086_v57  ;;  %v2101_v6 = vrot.slane %v4635_v19, 2  ;;  %v2106_v19 = vsel %vm249_vm3, %v2103_v7, %v2105_v2 }
 0x6cc   :  { %2156 = vmatmul.f32.vlgmr.msrb.gmra.mxu2 %v2132_v8 }
 0x6cd   :  { %v3050_v24 = vpop.permute.xlu1 %3049  ;;  %v2102_v9 = vsel %vm249_vm3, %v2099_v18, %v2101_v6 }
 0x6ce   :  { %v3051_v16 = vunpack.i.l.bf16 %v3050_v24  ;;  %v3052_v59 = vunpack.i.h.bf16 %v3050_v24  ;;  %v2137_v63 = vsel %vm1549_vm15, %v2102_v9, %v3056_v53 }
 0x6d0   :  { %v2136_v23 = vsel %vm1549_vm15, %v2100_v54, %v3051_v16  ;;  %v2133_v26 = vsel %vm1549_vm15, %v4629_v45, %v3052_v59  ;;  %v2104_v45 = vsel %vm249_vm3, %v2101_v6, %v2103_v7  ;;  %v2055_v59 = vld [vmem:[%s5389_s10] sm:$0xff] }
 0x6d1   :  { %2185 = vmatmul.f32.vlgmr.msra.gmra.mxu1 %v2136_v23 }
 0x6d2   :  { %v3060_v11 = vpop.permute.xlu0 %3059 }
 0x6d3   :  { %v3061_v42 = vunpack.i.l.bf16 %v3060_v11  ;;  %v3062_v5 = vunpack.i.h.bf16 %v3060_v11 }
 0x6d4   :  { %2159 = vmatmul.f32.gmra.mxu2 %v2133_v26 }
 0x6d5   :  { %v2138_v22 = vsel %vm1549_vm15, %v2104_v45, %v3061_v42  ;;  %v3065_v3 = vpop.permute.xlu1 %3064  ;;  %v2135_v35 = vsel %vm1549_vm15, %v4643_v17, %v3062_v5  ;;  %v3072_v17 = vunpack.i.h.bf16 %v3070_v51  ;;  %v3141_v45 = vmov 32.0  }
 0x6d6   :  { %v3066_v27 = vunpack.i.l.bf16 %v3065_v3  ;;  %v3067_v50 = vunpack.i.h.bf16 %v3065_v3  ;;  %3099 = vrcp.f32 %v3141_v45  ;;  %v5005_v45 = vld [vmem:[%s5392_s13 + $0x1c0] sm:$0xff] }
 0x6d7   :  { %v2305_v41 = vsel %vm1549_vm15, %v4623_v47, %v3072_v17  ;;  %v2276_v47 = vsel %vm249_vm3, %v2273_v62, %v2275_v25 }
 0x6d8   :  { %v2139_v30 = vsel %vm1549_vm15, %v2106_v19, %v3066_v27  ;;  %v2304_v10 = vsel %vm1549_vm15, %v4638_v12, %v3067_v50  ;;  %v2274_v12 = vsel %vm249_vm3, %v2271_v43, %v2273_v62 }
 0x6d9   :  { %2188 = vmatmul.f32.gmra.mxu1 %v2137_v63 }
 0x6da   :  { %v3075_v36 = vpop.permute.xlu0 %3074 }
 0x6db   :  { %v3076_v4 = vunpack.i.l.bf16 %v3075_v36  ;;  %v3077_v38 = vunpack.i.h.bf16 %v3075_v36 }
 0x6dc   :  { %2162 = vmatmul.f32.gmra.mxu2 %v2134_v32  ;;  %v3100_v3 = vpop.eup %3099 }
 0x6dd   :  { %v2309_v1 = vsel %vm1549_vm15, %v2274_v12, %v3076_v4  ;;  %v3080_v29 = vpop.permute.xlu1 %3079  ;;  %v2306_v0 = vsel %vm1549_vm15, %v4626_v61, %v3077_v38  ;;  %v2311_v61 = vsel %vm1549_vm15, %v2278_v21, %v2299_v13  ;;  %vm2410_vm11 = vweird.f32 %v3100_v3  ;;  %v4850_v13 = vld [vmem:[%s5392_s13 + $0xf8] sm:$0xff] }
 0x6de   :  { %v3081_v40 = vunpack.i.l.bf16 %v3080_v29  ;;  %v3082_v55 = vunpack.i.h.bf16 %v3080_v29  ;;  %v4855_v21 = vld [vmem:[%s5392_s13 + $0x178] sm:$0xff]  ;;  %2585 = vmatpush.msrb.mxu2 %v4850_v13 }
 0x6e0   :  { %v2310_v44 = vsel %vm1549_vm15, %v2276_v47, %v3081_v40  ;;  %v2307_v15 = vsel %vm1549_vm15, %v4670_v28, %v3082_v55  ;;  %vm5277_vm15 = vmneg %vm116_vm0 }
 0x6e1   :  { %2191 = vmatmul.f32.gmra.mxu1 %v2138_v22 }
 0x6e4   :  { %2165 = vmatmul.f32.gmra.mxu2 %v2135_v35  ;;  %v2406_v35 = vmul.f32 32.0, %v3100_v3 }
 0x6e6   :  { %v2407_v19 = vsub.f32 1.0, %v2406_v35  ;;  %v5022_v35 = vld [vmem:[%s5392_s13 + $0x138] sm:$0xff] }
 0x6e9   :  { %2194 = vmatmul.f32.gmra.mxu1 %v2139_v30 }
 0x6ec   :  { %2328 = vmatmul.f32.vlgmr.msra.gmra.mxu2 %v2304_v10  ;;  %v2408_v10 = vmul.f32 %v3100_v3, %v2407_v19  ;;  %v5046_v19 = vld [vmem:[%s5392_s13 + $0x130] sm:$0xff] }
 0x6ee   :  { %v2409_v39 = vadd.f32 %v3100_v3, %v2408_v10  ;;  %v5058_v10 = vld [vmem:[%s5392_s13 + $0x50] sm:$0xff] }
 0x6f1   :  { %2357 = vmatmul.f32.vlgmr.msrb.gmra.mxu1 %v2308_v33  ;;  %v2411_v33 = vsel %vm2410_vm11, %v3100_v3, %v2409_v39  ;;  %v5017_v3 = vld [vmem:[%s5392_s13 + $0xb8] sm:$0xff]  ;;  %v5071_v39 = vld [vmem:[%s5392_s13 + $0x128] sm:$0xff] }
 0x6f2   :  { %5413 = vst [vmem:[#allocation7_spill] sm:$0xff] %v5017_v3 }
 0x6f4   :  { %2331 = vmatmul.f32.gmra.mxu2 %v2305_v41 }
 0x6f9   :  { %2360 = vmatmul.f32.gmra.mxu1 %v2309_v1 }
 0x6fc   :  { %2334 = vmatmul.f32.gmra.mxu2 %v2306_v0 }
 0x701   :  { %2363 = vmatmul.f32.gmra.mxu1 %v2310_v44 }
 0x704   :  { %2337 = vmatmul.f32.gmra.mxu2 %v2307_v15 }
 0x709   :  { %2366 = vmatmul.f32.gmra.mxu1 %v2311_v61  ;;  %v4860_v61 = vld [vmem:[%s5392_s13 + $0x1f8] sm:$0xff] }
 0x70a   :  { %2631 = vmatpush.msra.mxu1 %v4860_v61 }
 0x74e   :  { %v2186_v58 = vpop.f32.mrf.mxu1 }
 0x74f   :  { %v2157_v56 = vpop.f32.mrf.mxu2 }
 0x750   :  { %v2187_v52 = vadd.f32 %v2186_v58, %v2157_v56  ;;  %v4868_v56 = vld [vmem:[%s5392_s13 + $0xf0] sm:$0xff] }
 0x751   :  { %2586 = vmatpush.msrb.mxu2 %v4868_v56 }
 0x756   :  { %v2189_v60 = vpop.f32.mrf.mxu1 }
 0x757   :  { %v2160_v49 = vpop.f32.mrf.mxu2 }
 0x758   :  { %v2190_v28 = vadd.f32 %v2189_v60, %v2160_v49  ;;  %v4873_v60 = vld [vmem:[%s5392_s13 + $0x170] sm:$0xff] }
 0x759   :  { %v4878_v49 = vld [vmem:[%s5392_s13 + $0x1f0] sm:$0xff] }
 0x75a   :  { %2632 = vmatpush.msra.mxu1 %v4878_v49 }
 0x75e   :  { %v2192_v46 = vpop.f32.mrf.mxu1 }
 0x75f   :  { %v2163_v57 = vpop.f32.mrf.mxu2 }
 0x760   :  { %v2193_v24 = vadd.f32 %v2192_v46, %v2163_v57  ;;  %v4886_v57 = vld [vmem:[%s5392_s13 + $0xe8] sm:$0xff] }
 0x761   :  { %2587 = vmatpush.msrb.mxu2 %v4886_v57 }
 0x766   :  { %v2195_v8 = vpop.f32.mrf.mxu1 }
 0x767   :  { %v2166_v31 = vpop.f32.mrf.mxu2 }
 0x768   :  { %v2196_v18 = vadd.f32 %v2195_v8, %v2166_v31  ;;  %v4891_v8 = vld [vmem:[%s5392_s13 + $0x168] sm:$0xff] }
 0x769   :  { %v4896_v31 = vld [vmem:[%s5392_s13 + $0x1e8] sm:$0xff] }
 0x76a   :  { %2961 = vmatpush.msk.msra.mxu0 %vm168_vm2, %v2196_v18  ;;  %2633 = vmatpush.msra.mxu1 %v4896_v31 }
 0x76c   :  { %2221 = vmatpush.msra.mxu0 %v2193_v24  ;;  %v4904_v24 = vld [vmem:[%s5392_s13 + $0xe0] sm:$0xff] }
 0x76d   :  { %2588 = vmatpush.msrb.mxu2 %v4904_v24 }
 0x76e   :  { %v2358_v16 = vpop.f32.mrf.mxu1  ;;  %2222 = vmatpush.msra.mxu0 %v2190_v28  ;;  %v4909_v28 = vld [vmem:[%s5392_s13 + $0x160] sm:$0xff] }
 0x76f   :  { %v2329_v54 = vpop.f32.mrf.mxu2 }
 0x770   :  { %2223 = vmatpush.msra.mxu0 %v2187_v52  ;;  %v2359_v7 = vadd.f32 %v2358_v16, %v2329_v54  ;;  %v4914_v52 = vld [vmem:[%s5392_s13 + $0x1e0] sm:$0xff]  ;;  %v4926_v54 = vld [vmem:[%s5392_s13 + $0x158] sm:$0xff] }
 0x771   :  { %2962 = vmatmul.msk.f32.vlgmr.msra.gmra.mxu0 %vm2198_vm10, %v2055_v59  ;;  %2634 = vmatpush.msra.mxu1 %v4914_v52 }
 0x776   :  { %v2361_v23 = vpop.f32.mrf.mxu1 }
 0x777   :  { %v2332_v26 = vpop.f32.mrf.mxu2 }
 0x778   :  { %v2362_v32 = vadd.f32 %v2361_v23, %v2332_v26  ;;  %v4931_v23 = vld [vmem:[%s5392_s13 + $0x1d8] sm:$0xff]  ;;  %v4942_v26 = vld [vmem:[%s5392_s13 + $0x150] sm:$0xff] }
 0x779   :  { %2963 = vmatmul.msk.f32.gmra.mxu0 %vm2198_vm10, %v2056_v34  ;;  %2635 = vmatpush.msra.mxu1 %v4931_v23 }
 0x77e   :  { %v2364_v6 = vpop.f32.mrf.mxu1 }
 0x77f   :  { %v2335_v53 = vpop.f32.mrf.mxu2 }
 0x780   :  { %v2365_v11 = vadd.f32 %v2364_v6, %v2335_v53  ;;  %v4951_v53 = vld [vmem:[%s5392_s13 + $0x1d0] sm:$0xff] }
 0x781   :  { %2636 = vmatpush.msra.mxu1 %v4951_v53 }
 0x786   :  { %v2367_v20 = vpop.f32.mrf.mxu1 }
 0x787   :  { %v2338_v9 = vpop.f32.mrf.mxu2 }
 0x788   :  { %v2368_v63 = vadd.f32 %v2367_v20, %v2338_v9  ;;  %v4956_v20 = vld [vmem:[%s5392_s13 + $0x78] sm:$0xff]  ;;  %v4963_v9 = vld [vmem:[%s5392_s13 + $0xc8] sm:$0xff] }
 0x789   :  { %2562 = vmatpush.msrb.mxu3 %v4956_v20  ;;  %5411 = vst [vmem:[#allocation5_spill] sm:$0xff] %v4963_v9 }
 0x78a   :  { %2964 = vmatpush.msk.msrb.mxu0 %vm168_vm2, %v2368_v63  ;;  %v4968_v63 = vld [vmem:[%s5392_s13 + $0x148] sm:$0xff] }
 0x78c   :  { %2386 = vmatpush.msrb.mxu0 %v2365_v11  ;;  %v4973_v11 = vld [vmem:[%s5392_s13 + $0x70] sm:$0xff] }
 0x78d   :  { %2563 = vmatpush.msrb.mxu3 %v4973_v11 }
 0x78e   :  { %2387 = vmatpush.msrb.mxu0 %v2362_v32  ;;  %v4981_v32 = vld [vmem:[%s5392_s13 + $0x1c8] sm:$0xff] }
 0x78f   :  { %2637 = vmatpush.msra.mxu1 %v4981_v32 }
 0x790   :  { %2388 = vmatpush.msrb.mxu0 %v2359_v7  ;;  %v4986_v7 = vld [vmem:[%s5392_s13 + $0x68] sm:$0xff] }
 0x791   :  { %2965 = vmatmul.msk.f32.vlgmr.msrb.gmra.mxu0 %vm2198_vm10, %v2055_v59  ;;  %v4921_v59 = vld [vmem:[%s5392_s13 + $0xd8] sm:$0xff]  ;;  %2564 = vmatpush.msrb.mxu3 %v4986_v7 }
 0x792   :  { %2608 = vmatpush.msra.mxu0 %v4855_v21  ;;  %2589 = vmatpush.msrb.mxu2 %v4921_v59 }
 0x793   :  { %2638 = vmatpush.msra.mxu1 %v5005_v45 }
 0x794   :  { %2609 = vmatpush.msra.mxu0 %v4873_v60 }
 0x796   :  { %2610 = vmatpush.msra.mxu0 %v4891_v8 }
 0x798   :  { %2611 = vmatpush.msra.mxu0 %v4909_v28 }
 0x799   :  { %2966 = vmatmul.msk.f32.gmra.mxu0 %vm2198_vm10, %v2056_v34  ;;  %v4937_v34 = vld [vmem:[%s5392_s13 + $0xd0] sm:$0xff] }
 0x79a   :  { %2612 = vmatpush.msra.mxu0 %v4926_v54  ;;  %2590 = vmatpush.msrb.mxu2 %v4937_v34 }
 0x79c   :  { %2613 = vmatpush.msra.mxu0 %v4942_v26  ;;  %2591 = vmatpush.msrb.mxu2 %v4963_v9 }
 0x79e   :  { %2614 = vmatpush.msra.mxu0 %v4968_v63 }
 0x7ee   :  { %v2225_v42 = vpop.f32.mrf.mxu0 }
 0x7f6   :  { %v2228_v5 = vpop.f32.mrf.mxu0 }
 0x7f7   :  { %v2396_v2 = vadd.f32 %v2228_v5, %v2225_v42 }
 0x80e   :  { %v2390_v22 = vpop.f32.mrf.mxu0 }
 0x80f   :  { %v2397_v27 = vadd.f32 %v2396_v2, %v2390_v22  ;;  %v5029_v2 = vld [vmem:[%s5392_s13 + $0x1b8] sm:$0xff] }
 0x810   :  { %2639 = vmatpush.msra.mxu1 %v5029_v2 }
 0x816   :  { %v2393_v50 = vpop.f32.mrf.mxu0 }
 0x817   :  { %v2398_v30 = vadd.f32 %v2397_v27, %v2393_v50  ;;  %v5034_v27 = vld [vmem:[%s5392_s13 + $0x58] sm:$0xff] }
 0x819   :  { %v2399_v51 = vrot.slane %v2398_v30, 4 }
 0x81b   :  { %v2400_v14 = vadd.f32 %v2399_v51, %v2398_v30  ;;  %v5053_v51 = vld [vmem:[%s5392_s13 + $0x1b0] sm:$0xff] }
 0x81c   :  { %2640 = vmatpush.msra.mxu1 %v5053_v51 }
 0x81d   :  { %v2401_v43 = vrot.slane %v2400_v14, 2 }
 0x81f   :  { %v2402_v17 = vadd.f32 %v2401_v43, %v2400_v14  ;;  %v5066_v43 = vld [vmem:[%s5392_s13 + $0xa8] sm:$0xff] }
 0x820   :  { %5415 = vst [vmem:[#allocation9_spill] sm:$0xff] %v5066_v43 }
 0x821   :  { %v2403_v37 = vrot.slane %v2402_v17, 1 }
 0x823   :  { %v2404_v36 = vadd.f32 %v2403_v37, %v2402_v17  ;;  %v5078_v17 = vld [vmem:[%s5392_s13 + $0x1a8] sm:$0xff] }
 0x824   :  { %v5083_v37 = vld [vmem:[%s5392_s13 + $0x48] sm:$0xff]  ;;  %2641 = vmatpush.msra.mxu1 %v5078_v17 }
 0x825   :  { %v2412_v41 = vmul.f32 %v2411_v33, %v2404_v36  ;;  %v5090_v36 = vld [vmem:[%s5392_s13 + $0xa0] sm:$0xff] }
 0x826   :  { %5416 = vst [vmem:[#allocation10_spill] sm:$0xff] %v5090_v36 }
 0x827   :  { %v4831_v62 = vsub.f32 %v2225_v42, %v2412_v41  ;;  %v4833_v4 = vsub.f32 %v2228_v5, %v2412_v41  ;;  %v4835_v38 = vsub.f32 %v2390_v22, %v2412_v41  ;;  %v4837_v12 = vsub.f32 %v2393_v50, %v2412_v41  ;;  %v4993_v42 = vld [vmem:[%s5392_s13 + $0xc0] sm:$0xff]  ;;  %v5041_v50 = vld [vmem:[%s5392_s13 + $0xb0] sm:$0xff] }
 0x828   :  { %5412 = vst [vmem:[#allocation6_spill] sm:$0xff] %v4993_v42  ;;  %v4998_v5 = vld [vmem:[%s5392_s13 + $0x140] sm:$0xff]  ;;  %2592 = vmatpush.msrb.mxu2 %v4993_v42 }
 0x829   :  { %v2417_v1 = vmul.f32 %v4831_v62, %v4831_v62  ;;  %v2418_v29 = vmul.f32 %v4833_v4, %v4833_v4  ;;  %v2419_v0 = vmul.f32 %v4835_v38, %v4835_v38  ;;  %v2420_v40 = vmul.f32 %v4837_v12, %v4837_v12  ;;  %v5010_v22 = vld [vmem:[%s5392_s13 + $0x60] sm:$0xff]  ;;  %2615 = vmatpush.msra.mxu0 %v4998_v5 }
 0x82a   :  { %2565 = vmatpush.msrb.mxu3 %v5010_v22  ;;  %5414 = vst [vmem:[#allocation8_spill] sm:$0xff] %v5041_v50  ;;  %2593 = vmatpush.msrb.mxu2 %v5017_v3  ;;  %v5095_v41 = vld [vmem:[%s5392_s13 + $0x120] sm:$0xff] }
 0x82b   :  { %v2421_v25 = vadd.f32 %v2418_v29, %v2417_v1  ;;  %2616 = vmatpush.msra.mxu0 %v5022_v35  ;;  %v5102_v1 = vld [vmem:[%s5392_s13 + $0x1a0] sm:$0xff] }
 0x82c   :  { %2566 = vmatpush.msrb.mxu3 %v5034_v27  ;;  %2594 = vmatpush.msrb.mxu2 %v5041_v50  ;;  %v5107_v29 = vld [vmem:[%s5392_s13 + $0x40] sm:$0xff] }
 0x82d   :  { %v2422_v55 = vadd.f32 %v2421_v25, %v2419_v0  ;;  %2617 = vmatpush.msra.mxu0 %v5046_v19  ;;  %v5114_v25 = vld [vmem:[%s5392_s13 + $0x98] sm:$0xff]  ;;  %2642 = vmatpush.msra.mxu1 %v5102_v1  ;;  %v5219_v50 = vld [vmem:[%s5392_s13 + $0x20] sm:$0xff] }
 0x82e   :  { %2567 = vmatpush.msrb.mxu3 %v5058_v10  ;;  %2595 = vmatpush.msrb.mxu2 %v5066_v43  ;;  %5417 = vst [vmem:[#allocation11_spill] sm:$0xff] %v5114_v25 }
 0x82f   :  { %v2423_v47 = vadd.f32 %v2422_v55, %v2420_v40  ;;  %2618 = vmatpush.msra.mxu0 %v5071_v39  ;;  %v5119_v40 = vld [vmem:[%s5392_s13 + $0x118] sm:$0xff] }
 0x830   :  { %2568 = vmatpush.msrb.mxu3 %v5083_v37  ;;  %2596 = vmatpush.msrb.mxu2 %v5090_v36  ;;  %v5126_v55 = vld [vmem:[%s5392_s13 + $0x198] sm:$0xff] }
 0x831   :  { %v2424_v44 = vrot.slane %v2423_v47, 4  ;;  %2619 = vmatpush.msra.mxu0 %v5095_v41  ;;  %2643 = vmatpush.msra.mxu1 %v5126_v55 }
 0x832   :  { %2569 = vmatpush.msrb.mxu3 %v5107_v29  ;;  %2597 = vmatpush.msrb.mxu2 %v5114_v25 }
 0x833   :  { %v2425_v15 = vadd.f32 %v2424_v44, %v2423_v47  ;;  %v5131_v47 = vld [vmem:[%s5392_s13 + $0x38] sm:$0xff]  ;;  %2620 = vmatpush.msra.mxu0 %v5119_v40 }
 0x834   :  { %2570 = vmatpush.msrb.mxu3 %v5131_v47 }
 0x835   :  { %v2426_v48 = vrot.slane %v2425_v15, 2 }
 0x837   :  { %v2427_v58 = vadd.f32 %v2426_v48, %v2425_v15  ;;  %v5138_v15 = vld [vmem:[%s5392_s13 + $0x90] sm:$0xff] }
 0x838   :  { %5418 = vst [vmem:[#allocation12_spill] sm:$0xff] %v5138_v15  ;;  %v5143_v48 = vld [vmem:[%s5392_s13 + $0x110] sm:$0xff]  ;;  %2598 = vmatpush.msrb.mxu2 %v5138_v15 }
 0x839   :  { %v2428_v46 = vrot.slane %v2427_v58, 1  ;;  %2621 = vmatpush.msra.mxu0 %v5143_v48 }
 0x83b   :  { %v2429_v18 = vadd.f32 %v2428_v46, %v2427_v58  ;;  %v5150_v58 = vld [vmem:[%s5392_s13 + $0x190] sm:$0xff] }
 0x83c   :  { %v5155_v46 = vld [vmem:[%s5392_s13 + $0x30] sm:$0xff]  ;;  %2644 = vmatpush.msra.mxu1 %v5150_v58 }
 0x83d   :  { %v2430_v16 = vmul.f32 %v2429_v18, %v2411_v33  ;;  %2571 = vmatpush.msrb.mxu3 %v5155_v46 }
 0x83f   :  { %v4944_v6 = vadd.f32 1e-05, %v2430_v16  ;;  %v3087_v16 = vld [vmem:[%s5390_s11] ss:$0 sm:$0xff]  ;;  %s3143_s11 = smov [#allocation2]  }
 0x840   :  { %s2885_s30 = sshll.u32 %s3143_s11, 4  ;;  %s2886_s30 = int_to_ptr.vmem [resolvable:$true] %s2885_s30 }
 0x841   :  { %3101 = vrsqrt.f32 %v4944_v6  ;;  %vm2438_vm13 = vweird.f32 %v4944_v6 }
 0x847   :  { %v3102_v30 = vpop.eup %3101 }
 0x848   :  { %v2433_v14 = vmul.f32 %v3102_v30, %v4944_v6  ;;  %vm2439_vm12 = vweird.f32 %v3102_v30  ;;  %v5174_v6 = vld [vmem:[%s5392_s13 + $0x108] sm:$0xff] }
 0x849   :  { %vm2440_vm14 = vmor %vm2438_vm13, %vm2439_vm12  ;;  %2622 = vmatpush.msra.mxu0 %v5174_v6 }
 0x84a   :  { %v2434_v33 = vmul.f32 %v3102_v30, %v2433_v14  ;;  %v5166_v14 = vld [vmem:[%s5392_s13 + $0x88] sm:$0xff] }
 0x84b   :  { %5419 = vst [vmem:[#allocation13_spill] sm:$0xff] %v5166_v14  ;;  %2599 = vmatpush.msrb.mxu2 %v5166_v14 }
 0x84c   :  { %v2435_v0 = vmul.f32 0.5, %v2434_v33  ;;  %v5179_v33 = vld [vmem:[%s5392_s13 + $0x188] sm:$0xff] }
 0x84d   :  { %2645 = vmatpush.msra.mxu1 %v5179_v33 }
 0x84e   :  { %v2436_v44 = vsub.f32 1.5, %v2435_v0 }
 0x850   :  { %v2437_v18 = vmul.f32 %v3102_v30, %v2436_v44  ;;  %v5186_v44 = vld [vmem:[%s5392_s13 + $0x80] sm:$0xff] }
 0x851   :  { %2600 = vmatpush.msrb.mxu2 %v5186_v44 }
 0x852   :  { %v2441_v0 = vsel %vm2440_vm14, %v3102_v30, %v2437_v18  ;;  %v3088_v30 = vld [vmem:[%s5391_s12] ss:$0 sm:$0xff] }
 0x853   :  { %v2442_v15 = vmul.f32 %v2441_v0, %v4831_v62  ;;  %v2443_v25 = vmul.f32 %v2441_v0, %v4833_v4  ;;  %v2444_v36 = vmul.f32 %v2441_v0, %v4835_v38  ;;  %v2445_v43 = vmul.f32 %v2441_v0, %v4837_v12  ;;  %v5199_v18 = vld [vmem:[%s5392_s13 + $0x100] sm:$0xff]  ;;  %v5211_v4 = vld [vmem:[%s5392_s13 + $0x28] sm:$0xff]  ;;  %2712 = vmatpush.msra.mxu2 %v4956_v20 }
 0x854   :  { %v5204_v62 = vld [vmem:[%s5392_s13 + $0x180] sm:$0xff]  ;;  %2623 = vmatpush.msra.mxu0 %v5199_v18  ;;  %2572 = vmatpush.msrb.mxu3 %v5211_v4 }
 0x855   :  { %v2449_v38 = vmul.f32 %v3087_v16, %v2442_v15  ;;  %v2450_v12 = vmul.f32 %v3087_v16, %v2443_v25  ;;  %v2451_v0 = vmul.f32 %v3087_v16, %v2444_v36  ;;  %v2452_v14 = vmul.f32 %v3087_v16, %v2445_v43  ;;  %2646 = vmatpush.msra.mxu1 %v5204_v62  ;;  %v5228_v43 = vld [vmem:[%s5392_s13 + $0x18] sm:$0xff] }
 0x856   :  { %2758 = vmatpush.msrb.mxu0 %v4855_v21  ;;  %2573 = vmatpush.msrb.mxu3 %v5219_v50  ;;  %v5237_v21 = vld [vmem:[%s5392_s13 + $0x10] sm:$0xff] }
 0x857   :  { %v2457_v3 = vadd.f32 %v3088_v30, %v2450_v12  ;;  %v2458_v42 = vadd.f32 %v3088_v30, %v2451_v0  ;;  %v2459_v9 = vadd.f32 %v3088_v30, %v2452_v14  ;;  %2781 = vmatpush.msrb.mxu1 %v4860_v61  ;;  %v2456_v36 = vadd.f32 %v3088_v30, %v2449_v38 }
 0x858   :  { %2713 = vmatpush.msra.mxu2 %v4973_v11  ;;  %2759 = vmatpush.msrb.mxu0 %v4873_v60  ;;  %v5250_v60 = vld [vmem:[%s5392_s13 + $0x8] sm:$0xff] }
 0x859   :  { %v2461_v25 = vmax.f32 %v2457_v3, 0.0  ;;  %v2462_v15 = vmax.f32 %v2458_v42, 0.0  ;;  %v2463_v16 = vmax.f32 %v2459_v9, 0.0  ;;  %2782 = vmatpush.msrb.mxu1 %v4878_v49  ;;  %v2460_v61 = vmax.f32 %v2456_v36, 0.0  ;;  %2574 = vmatpush.msrb.mxu3 %v5228_v43 }
 0x85a   :  { %2714 = vmatpush.msra.mxu2 %v4986_v7  ;;  %2760 = vmatpush.msrb.mxu0 %v4891_v8  ;;  %v5259_v8 = vld [vmem:[%s5392_s13] sm:$0xff] }
 0x85b   :  { %v2534_v20 = vrot.slane %v2461_v25, 7  ;;  %v5239_v14 = vrot.slane %v2462_v15, 7  ;;  %v5241_v3 = vrot.slane %v2463_v16, 7  ;;  %2783 = vmatpush.msrb.mxu1 %v4896_v31  ;;  %v2533_v49 = vrot.slane %v2460_v61, 7  ;;  %2575 = vmatpush.msrb.mxu3 %v5237_v21  ;;  %v2528_v15 = vld [vmem:[%s5393_s14] sm:$0xff]  ;;  %v5422_v16 = vld [vmem:[#allocation5_spill] sm:$0xff] }
 0x85c   :  { %2715 = vmatpush.msra.mxu2 %v5010_v22  ;;  %2761 = vmatpush.msrb.mxu0 %v4909_v28  ;;  %v5424_v61 = vld [vmem:[#allocation7_spill] sm:$0xff] }
 0x85d   :  { %2784 = vmatpush.msrb.mxu1 %v4914_v52  ;;  %v2535_v31 = vsel %vm116_vm0, %v2533_v49, %v2534_v20  ;;  %v2539_v9 = vsel %vm116_vm0, 0.0, %v2533_v49  ;;  %v5266_v11 = vsel %vm116_vm0, %v5239_v14, %v5241_v3  ;;  %2576 = vmatpush.msrb.mxu3 %v5250_v60  ;;  %v5272_v7 = vsel %vm116_vm0, 0.0, %v5239_v14 }
 0x85e   :  { %2716 = vmatpush.msra.mxu2 %v5034_v27  ;;  %v2548_v28 = vrot.slane %v2539_v9, 2  ;;  %v2549_v52 = vrot.slane %v2535_v31, 2  ;;  %2762 = vmatpush.msrb.mxu0 %v4926_v54  ;;  %v2542_v22 = vrot.slane %v2539_v9, 1  ;;  %v2543_v30 = vrot.slane %v2535_v31, 1 }
 0x85f   :  { %2785 = vmatpush.msrb.mxu1 %v4931_v23  ;;  %v2555_v38 = vrot.slane %v2539_v9, 3  ;;  %v2556_v12 = vrot.slane %v2535_v31, 3  ;;  %2577 = vmatpush.msrb.mxu3 %v5259_v8  ;;  %v2692_v23 = vrot.slane %v5272_v7, 1  ;;  %v2693_v27 = vrot.slane %v5266_v11, 1 }
 0x860   :  { %2717 = vmatpush.msra.mxu2 %v5058_v10  ;;  %2763 = vmatpush.msrb.mxu0 %v4942_v26  ;;  %v2550_v54 = vsel %vm249_vm3, %v2548_v28, %v2549_v52  ;;  %v2544_v10 = vsel %vm168_vm2, %v2542_v22, %v2543_v30 }
 0x861   :  { %2786 = vmatpush.msrb.mxu1 %v4951_v53  ;;  %2968 = vmatmul.msk.f32.vlgmr.msrb.gmra.mxu3 %vm5277_vm15, %v2533_v49  ;;  %v2557_v26 = vsel %vm331_vm1, %v2555_v38, %v2556_v12  ;;  %v2540_v53 = vsel %vm116_vm0, %v2534_v20, 0.0  ;;  %v5425_v20 = vld [vmem:[#allocation8_spill] sm:$0xff] }
 0x862   :  { %2718 = vmatpush.msra.mxu2 %v5083_v37  ;;  %2764 = vmatpush.msrb.mxu0 %v4968_v63  ;;  %v5300_v37 = vsel %vm168_vm2, %v2692_v23, %v2693_v27  ;;  %v2551_v63 = vrot.slane %v2540_v53, 2 }
 0x863   :  { %2787 = vmatpush.msrb.mxu1 %v4981_v32  ;;  %2624 = vmatmul.f32.vlgmr.msra.gmra.mxu0 %v2550_v54  ;;  %v2558_v32 = vrot.slane %v2540_v53, 3 }
 0x864   :  { %2719 = vmatpush.msra.mxu2 %v5107_v29  ;;  %2765 = vmatpush.msrb.mxu0 %v4998_v5  ;;  %v2552_v5 = vsel %vm249_vm3, %v2549_v52, %v2551_v63 }
 0x865   :  { %2788 = vmatpush.msrb.mxu1 %v5005_v45  ;;  %2601 = vmatmul.f32.vlgmr.msrb.gmra.mxu2 %v2544_v10  ;;  %v2559_v45 = vsel %vm331_vm1, %v2556_v12, %v2558_v32 }
 0x866   :  { %2647 = vmatmul.f32.vlgmr.msra.gmra.mxu1 %v2557_v26  ;;  %2720 = vmatpush.msra.mxu2 %v5131_v47 }
 0x867   :  { %2766 = vmatpush.msrb.mxu0 %v5022_v35  ;;  %2789 = vmatpush.msrb.mxu1 %v5029_v2  ;;  %v2698_v35 = vrot.slane %v5272_v7, 2  ;;  %v2699_v2 = vrot.slane %v5266_v11, 2 }
 0x868   :  { %2721 = vmatpush.msra.mxu2 %v5155_v46 }
 0x869   :  { %2767 = vmatpush.msrb.mxu0 %v5046_v19  ;;  %2790 = vmatpush.msrb.mxu1 %v5053_v51  ;;  %v2706_v19 = vrot.slane %v5266_v11, 3  ;;  %v2700_v51 = vsel %vm249_vm3, %v2698_v35, %v2699_v2 }
 0x86a   :  { %2581 = vmatmul.f32.gmra.mxu3 %v2535_v31  ;;  %2722 = vmatpush.msra.mxu2 %v5211_v4 }
 0x86b   :  { %2768 = vmatpush.msrb.mxu0 %v5071_v39  ;;  %2791 = vmatpush.msrb.mxu1 %v5078_v17  ;;  %v2690_v17 = vsel %vm116_vm0, %v5241_v3, 0.0  ;;  %vm2654_vm0 = vcmask 121856  }
 0x86c   :  { %2627 = vmatmul.f32.gmra.mxu0 %v2552_v5  ;;  %2723 = vmatpush.msra.mxu2 %v5219_v50  ;;  %v2705_v50 = vrot.slane %v5272_v7, 3 }
 0x86d   :  { %2769 = vmatpush.msrb.mxu0 %v5095_v41  ;;  %2792 = vmatpush.msrb.mxu1 %v5102_v1  ;;  %v2701_v41 = vrot.slane %v2690_v17, 2  ;;  %v2708_v1 = vrot.slane %v2690_v17, 3 }
 0x86e   :  { %2604 = vmatmul.f32.gmra.mxu2 %v2543_v30  ;;  %2650 = vmatmul.f32.gmra.mxu1 %v2559_v45  ;;  %v2707_v39 = vsel %vm331_vm1, %v2705_v50, %v2706_v19 }
 0x86f   :  { %2724 = vmatpush.msra.mxu2 %v5228_v43  ;;  %2770 = vmatpush.msrb.mxu0 %v5119_v40  ;;  %v2702_v29 = vsel %vm249_vm3, %v2699_v2, %v2701_v41  ;;  %v2709_v40 = vsel %vm331_vm1, %v2706_v19, %v2708_v1 }
 0x870   :  { %2793 = vmatpush.msrb.mxu1 %v5126_v55 }
 0x871   :  { %2725 = vmatpush.msra.mxu2 %v5237_v21  ;;  %2771 = vmatpush.msrb.mxu0 %v5143_v48  ;;  %v5423_v21 = vld [vmem:[#allocation6_spill] sm:$0xff] }
 0x872   :  { %2794 = vmatpush.msrb.mxu1 %v5150_v58 }
 0x873   :  { %2726 = vmatpush.msra.mxu2 %v5250_v60  ;;  %2772 = vmatpush.msrb.mxu0 %v5174_v6 }
 0x874   :  { %2795 = vmatpush.msrb.mxu1 %v5179_v33 }
 0x875   :  { %2727 = vmatpush.msra.mxu2 %v5259_v8  ;;  %2773 = vmatpush.msrb.mxu0 %v5199_v18 }
 0x876   :  { %2796 = vmatpush.msrb.mxu1 %v5204_v62  ;;  %2972 = vmatmul.msk.f32.vlgmr.msra.gmra.mxu2 %vm5277_vm15, %v5239_v14  ;;  %v5427_v14 = vld [vmem:[#allocation10_spill] sm:$0xff] }
 0x877   :  { %2774 = vmatmul.f32.vlgmr.msrb.gmra.mxu0 %v2700_v51  ;;  %2797 = vmatmul.f32.vlgmr.msrb.gmra.mxu1 %v2707_v39 }
 0x87e   :  { %2731 = vmatmul.f32.gmra.mxu2 %v5266_v11  ;;  %v3142_v11 = vmov 16.0  }
 0x87f   :  { %2777 = vmatmul.f32.gmra.mxu0 %v2702_v29  ;;  %2800 = vmatmul.f32.gmra.mxu1 %v2709_v40  ;;  %3103 = vrcp.f32 %v3142_v11 }
 0x885   :  { %v3104_v38 = vpop.eup %3103 }
 0x886   :  { %v2835_v12 = vmul.f32 16.0, %v3104_v38  ;;  %vm2839_vm1 = vweird.f32 %v3104_v38 }
 0x888   :  { %v2836_v23 = vsub.f32 1.0, %v2835_v12 }
 0x88a   :  { %v2837_v26 = vmul.f32 %v3104_v38, %v2836_v23 }
 0x88c   :  { %v2838_v63 = vadd.f32 %v3104_v38, %v2837_v26 }
 0x88e   :  { %v2840_v45 = vsel %vm2839_vm1, %v3104_v38, %v2838_v63 }
 0x8e0   :  { %v2625_v47 = vpop.f32.mrf.mxu0 }
 0x8e3   :  { %v2648_v58 = vpop.f32.mrf.mxu1 }
 0x8e4   :  { %v2579_v55 = vpop.f32.mrf.mxu3 }
 0x8e8   :  { %v2602_v48 = vpop.f32.mrf.mxu2 }
 0x8e9   :  { %v2603_v46 = vadd.f32 %v2602_v48, %v2579_v55  ;;  %v2628_v62 = vpop.f32.mrf.mxu0 }
 0x8eb   :  { %v2626_v4 = vadd.f32 %v2625_v47, %v2603_v46  ;;  %v2651_v43 = vpop.f32.mrf.mxu1 }
 0x8ed   :  { %v2582_v6 = vpop.f32.mrf.mxu3  ;;  %v2649_v25 = vadd.f32 %v2648_v58, %v2626_v4 }
 0x8f1   :  { %v2605_v33 = vpop.f32.mrf.mxu2 }
 0x8f2   :  { %v2606_v18 = vadd.f32 %v2605_v33, %v2582_v6 }
 0x8f4   :  { %v2629_v0 = vadd.f32 %v2628_v62, %v2606_v18  ;;  %v2775_v3 = vpop.f32.mrf.mxu0  ;;  %v2798_v49 = vpop.f32.mrf.mxu1 }
 0x8f6   :  { %v2652_v36 = vadd.f32 %v2651_v43, %v2629_v0  ;;  %v3089_v0 = vld [vmem:[%s5394_s15] ss:$0 sm:$0xff]  ;;  %s3144_s15 = smov 128  }
 0x8f8   :  { %2969 = vmatpush.msk.msra.mxu3 %vm168_vm2, %v2652_v36 }
 0x8fa   :  { %2676 = vmatpush.msra.mxu3 %v2649_v25 }
 0x8fb   :  { %2970 = vmatmul.msk.f32.vlgmr.msra.gmra.mxu3 %vm2654_vm0, %v2528_v15 }
 0x8fc   :  { %2735 = vmatpush.msrb.mxu3 %v4850_v13  ;;  %v5426_v13 = vld [vmem:[#allocation9_spill] sm:$0xff]  ;;  %v2778_v52 = vpop.f32.mrf.mxu0  ;;  %v2801_v22 = vpop.f32.mrf.mxu1 }
 0x8fe   :  { %2736 = vmatpush.msrb.mxu3 %v4868_v56  ;;  %v5428_v56 = vld [vmem:[#allocation11_spill] sm:$0xff] }
 0x900   :  { %2737 = vmatpush.msrb.mxu3 %v4886_v57  ;;  %v5429_v57 = vld [vmem:[#allocation12_spill] sm:$0xff] }
 0x902   :  { %2738 = vmatpush.msrb.mxu3 %v4904_v24  ;;  %v5430_v24 = vld [vmem:[#allocation13_spill] sm:$0xff] }
 0x904   :  { %2739 = vmatpush.msrb.mxu3 %v4921_v59 }
 0x906   :  { %2740 = vmatpush.msrb.mxu3 %v4937_v34  ;;  %v2729_v34 = vpop.f32.mrf.mxu2 }
 0x908   :  { %2741 = vmatpush.msrb.mxu3 %v5422_v16 }
 0x90a   :  { %2742 = vmatpush.msrb.mxu3 %v5423_v21 }
 0x90c   :  { %2743 = vmatpush.msrb.mxu3 %v5424_v61 }
 0x90e   :  { %2744 = vmatpush.msrb.mxu3 %v5425_v20  ;;  %v2732_v31 = vpop.f32.mrf.mxu2 }
 0x910   :  { %2745 = vmatpush.msrb.mxu3 %v5426_v13 }
 0x912   :  { %2746 = vmatpush.msrb.mxu3 %v5427_v14 }
 0x914   :  { %2747 = vmatpush.msrb.mxu3 %v5428_v56 }
 0x916   :  { %2748 = vmatpush.msrb.mxu3 %v5429_v57 }
 0x918   :  { %2749 = vmatpush.msrb.mxu3 %v5430_v24 }
 0x91a   :  { %2750 = vmatpush.msrb.mxu3 %v5186_v44 }
 0x91b   :  { %2751 = vmatmul.f32.vlgmr.msrb.gmra.mxu3 %v5300_v37 }
 0x923   :  { %2754 = vmatmul.f32.gmra.mxu3 %v2693_v27 }
 0x97e   :  { %v2678_v59 = vpop.f32.mrf.mxu3 }
 0x99e   :  { %v2752_v60 = vpop.f32.mrf.mxu3 }
 0x99f   :  { %v2753_v8 = vadd.f32 %v2752_v60, %v2729_v34 }
 0x9a1   :  { %v2776_v7 = vadd.f32 %v2775_v3, %v2753_v8 }
 0x9a3   :  { %v2799_v44 = vadd.f32 %v2798_v49, %v2776_v7 }
 0x9a6   :  { %v2755_v9 = vpop.f32.mrf.mxu3 }
 0x9a7   :  { %v2756_v28 = vadd.f32 %v2755_v9, %v2732_v31 }
 0x9a9   :  { %v2779_v42 = vadd.f32 %v2778_v52, %v2756_v28 }
 0x9ab   :  { %v2802_v30 = vadd.f32 %v2801_v22, %v2779_v42 }
 0x9ad   :  { %2973 = vmatpush.msk.msrb.mxu2 %vm168_vm2, %v2802_v30 }
 0x9af   :  { %2822 = vmatpush.msrb.mxu2 %v2799_v44 }
 0x9b0   :  { %2974 = vmatmul.msk.f32.vlgmr.msrb.gmra.mxu2 %vm2654_vm0, %v2528_v15  ;;  %v3090_v15 = vld [vmem:[%s5395_s16] ss:$0 sm:$0xff] }
 0xa33   :  { %v2824_v54 = vpop.f32.mrf.mxu2 }
 0xa34   :  { %v2827_v27 = vadd.f32 %v2824_v54, %v2678_v59 }
 0xa36   :  { %v2828_v10 = vrot.slane %v2827_v27, 4 }
 0xa38   :  { %v2829_v53 = vadd.f32 %v2828_v10, %v2827_v27 }
 0xa3a   :  { %v2830_v37 = vrot.slane %v2829_v53, 2 }
 0xa3c   :  { %v2831_v32 = vadd.f32 %v2830_v37, %v2829_v53 }
 0xa3e   :  { %v2832_v5 = vrot.slane %v2831_v32, 1 }
 0xa40   :  { %v2833_v35 = vadd.f32 %v2832_v5, %v2831_v32 }
 0xa42   :  { %v2841_v2 = vmul.f32 %v2840_v45, %v2833_v35 }
 0xa44   :  { %v2842_v50 = vsub.f32 %v2678_v59, %v2841_v2  ;;  %v2843_v19 = vsub.f32 %v2824_v54, %v2841_v2 }
 0xa46   :  { %v2844_v51 = vmul.f32 %v2842_v50, %v2842_v50  ;;  %v2845_v39 = vmul.f32 %v2843_v19, %v2843_v19 }
 0xa48   :  { %v2846_v17 = vadd.f32 %v2845_v39, %v2844_v51 }
 0xa4a   :  { %v2847_v41 = vrot.slane %v2846_v17, 4 }
 0xa4c   :  { %v2848_v1 = vadd.f32 %v2847_v41, %v2846_v17 }
 0xa4e   :  { %v2849_v29 = vrot.slane %v2848_v1, 2 }
 0xa50   :  { %v2850_v40 = vadd.f32 %v2849_v29, %v2848_v1 }
 0xa52   :  { %v2851_v55 = vrot.slane %v2850_v40, 1 }
 0xa54   :  { %v2852_v47 = vadd.f32 %v2851_v55, %v2850_v40 }
 0xa56   :  { %v2853_v48 = vmul.f32 %v2852_v47, %v2840_v45 }
 0xa58   :  { %v2854_v58 = vadd.f32 1e-05, %v2853_v48 }
 0xa5a   :  { %3105 = vrsqrt.f32 %v2854_v58  ;;  %vm2861_vm3 = vweird.f32 %v2854_v58 }
 0xa60   :  { %v3106_v46 = vpop.eup %3105 }
 0xa61   :  { %v2856_v6 = vmul.f32 %v3106_v46, %v2854_v58  ;;  %vm2862_vm2 = vweird.f32 %v3106_v46 }
 0xa62   :  { %vm2863_vm4 = vmor %vm2861_vm3, %vm2862_vm2 }
 0xa63   :  { %v2857_v33 = vmul.f32 %v3106_v46, %v2856_v6 }
 0xa65   :  { %v2858_v18 = vmul.f32 0.5, %v2857_v33 }
 0xa67   :  { %v2859_v62 = vsub.f32 1.5, %v2858_v18 }
 0xa69   :  { %v2860_v4 = vmul.f32 %v3106_v46, %v2859_v62 }
 0xa6b   :  { %v2864_v43 = vsel %vm2863_vm4, %v3106_v46, %v2860_v4 }
 0xa6c   :  { %v2865_v36 = vmul.f32 %v2864_v43, %v2842_v50  ;;  %v2866_v25 = vmul.f32 %v2864_v43, %v2843_v19 }
 0xa6e   :  { %v2870_v16 = vmul.f32 %v3089_v0, %v2865_v36  ;;  %v2871_v21 = vmul.f32 %v3089_v0, %v2866_v25 }
 0xa70   :  { %v2875_v61 = vadd.f32 %v3090_v15, %v2870_v16  ;;  %v2876_v20 = vadd.f32 %v3090_v15, %v2871_v21 }
 0xa72   :  { %v2877_v13 = vmax.f32 %v2875_v61, 0.0  ;;  %v2878_v14 = vmax.f32 %v2876_v20, 0.0 }
 0xa74   :  { %2879 = vst [vmem:[#allocation2] sm:$0xff] %v2877_v13 }
 0xa75   :  { %2880 = vst [vmem:[#allocation2 + $0x8] sm:$0xff] %v2878_v14 }
 0xa76   :  { %2893 = dma.vmem_to_hbm [thread:$0]  %s2886_s30, 256, %s2888_s6, [#allocation3], %s3144_s15, %s3144_s15, %s3145_s1  }
 0xa77   :  { %3131 = dma.done.wait [#allocation3], 256  }
 0xa78   :  { %3132 = vsyncadd [#allocation3], 4294967040 }
 0xa79   :  { %2898 = vsyncpa [#allocation3], 1 }

</bundles_post_ra>
